<compile_context>
chip_gen: v5e
topology: v5e:2x2
jax: 0.10.0
libtpu: 0.0.40
codegen_flags: <defaults>
</compile_context>

<pallas_src>
import functools

import jax
import jax.numpy as jnp
import numpy as np
from jax.experimental import pallas as pl
from jax.experimental.pallas import tpu as pltpu


# ----------------------------- small helpers --------------------------------

def _round_up(x, m):
    return ((x + m - 1) // m) * m


def _sigmoid(x):
    # sigmoid(x) = 0.5 * tanh(0.5 * x) + 0.5  -- one EUP pass, no divide.
    return 0.5 * jnp.tanh(0.5 * x) + 0.5


def _largest_divisor_leq(n, target):
    target = max(1, min(n, target))
    for d in range(target, 0, -1):
        if n % d == 0:
            return d
    return 1


def _vmem_budget_bytes():
    """~80% of per-core physical VMEM (leaves compiler headroom)."""
    try:
        cap = int(pltpu.get_tpu_info().vmem_capacity_bytes)
    except Exception:
        cap = 64 * 1024 * 1024          # conservative: safe on every generation
    return max(32 * 1024 * 1024, int(cap * 0.8))


def _default_batch_block(B):
    """v7x has 2 TensorCores/chip: give the 'parallel' batch axis extent >= 2
    there.  On v5e/v6e (1 TC) keep the full batch (bigger MXU M dim)."""
    try:
        kind = jax.devices()[0].device_kind.lower()
    except Exception:
        kind = ""
    if ("v7" in kind or "tpu7" in kind) and B % 16 == 0:
        return B // 2
    return B


def _pad_axis(a, axis, new_size):
    pad = new_size - a.shape[axis]
    if pad == 0:
        return a
    widths = [(0, 0)] * a.ndim
    widths[axis] = (0, pad)
    return jnp.pad(a, widths)


def _pad_gate_weight(w, H, Hp, d_in, d_in_p):
    """(4H, d_in) -> (4Hp, d_in_p): per-gate zero pad of the hidden axis and
    zero pad of the input axis.  Numerically transparent."""
    w4 = w.reshape(4, H, d_in)
    w4 = jnp.pad(w4, ((0, 0), (0, Hp - H), (0, d_in_p - d_in)))
    return w4.reshape(4 * Hp, d_in_p)


def _pad_gate_bias(b, H, Hp):
    b4 = b.reshape(4, H)
    b4 = jnp.pad(b4, ((0, 0), (0, Hp - H)))
    return b4.reshape(4 * Hp)


# ------------------------------- the kernel ----------------------------------

def _lstm_fused_kernel(x_ref, h0_ref, c0_ref, b_ref, wih_hbm, whh_hbm,   # in
                       y_ref,                                            # out
                       wih_vmem, whh_vmem, h_scr, c_scr, dma_sem,        # scratch
                       *, hidden, t_chunk, unroll):
    """grid = (batch_blocks, time_chunks); one invocation runs t_chunk
    timesteps for one batch block.  h/c are carried in VMEM scratch across the
    time axis (which must stay the innermost, 'arbitrary' grid axis)."""
    ti = pl.program_id(1)

    @pl.when(ti == 0)
    def _init():
        # One-shot DMA of the loop-invariant weights into single-buffered
        # VMEM.  Gated on ti == 0 (re-issued per batch block): scratch memory
        # is not guaranteed zero-initialised, so an SMEM "already loaded" flag
        # is not safe; the per-extra-block re-DMA is a few microseconds and is
        # overlapped with the h/c state init below.
        cp_ih = pltpu.make_async_copy(wih_hbm, wih_vmem, dma_sem.at[0])
        cp_hh = pltpu.make_async_copy(whh_hbm, whh_vmem, dma_sem.at[1])
        cp_ih.start()
        cp_hh.start()
        h_scr[...] = h0_ref[...].astype(h_scr.dtype)
        c_scr[...] = c0_ref[...].astype(c_scr.dtype)
        cp_ih.wait()
        cp_hh.wait()

    H = hidden    # padded hidden size (multiple of 128)

    def step(t, carry):
        h_prev = h_scr[...]                       # (Bb, Hp), matmul dtype
        c_prev = c_scr[...]                       # (Bb, Hp), f32
        # Fused input projection + recurrent matmul.  The weights are read
        # from their VMEM refs *inside* the loop so the MXU streams its RHS
        # from VMEM (no multi-MiB value kept live across the unrolled loop).
        xg = jnp.dot(x_ref[t].astype(wih_vmem.dtype), wih_vmem[...],
                     preferred_element_type=jnp.float32)
        hg = jnp.dot(h_prev.astype(whh_vmem.dtype), whh_vmem[...],
                     preferred_element_type=jnp.float32)
        gates = xg + hg + b_ref[...].astype(jnp.float32)      # (Bb, 4Hp) f32
        # PyTorch gate order: i, f, g, o.  All gate math in f32.
        i = _sigmoid(gates[:, 0 * H:1 * H])
        f = _sigmoid(gates[:, 1 * H:2 * H])
        g = jnp.tanh(gates[:, 2 * H:3 * H])
        o = _sigmoid(gates[:, 3 * H:4 * H])
        c_new = f * c_prev + i * g
        h_new = (o * jnp.tanh(c_new)).astype(h_scr.dtype)
        c_scr[...] = c_new
        h_scr[...] = h_new
        y_ref[t] = h_new.astype(y_ref.dtype)
        return carry

    jax.lax.fori_loop(0, t_chunk, step, None, unroll=unroll)


# ------------------------------ layer wrapper ---------------------------------

def lstm_layer_pallas(x_tbd, h0, c0, w_ih_t, w_hh_t, bias,
                      *, t_chunk=None, batch_block=None):
    """One LSTM layer.
      x_tbd : (T, B, D)  time-major, matmul dtype
      h0,c0 : (B, Hp)    f32 (Hp = padded hidden, multiple of 128)
      w_ih_t: (D, 4Hp)   matmul dtype     w_hh_t: (Hp, 4Hp) matmul dtype
      bias  : (1, 4Hp)   f32  (= b_ih + b_hh, gate-padded)
    Returns y: (T, B, Hp) in the matmul dtype."""
    T, B, D = x_tbd.shape
    Hp = h0.shape[-1]
    G = 4 * Hp
    assert w_ih_t.shape == (D, G) and w_hh_t.shape == (Hp, G)
    assert bias.shape == (1, G)

    out_dtype = x_tbd.dtype
    x_item = x_tbd.dtype.itemsize
    y_item = jnp.dtype(out_dtype).itemsize
    w_item = w_ih_t.dtype.itemsize

    Bb = _default_batch_block(B) if batch_block is None else batch_block
    assert B % Bb == 0 and (Bb == B or Bb % 8 == 0)

    vmem_budget = _vmem_budget_bytes()
    weight_bytes = (D + Hp) * G * w_item            # single-buffered in VMEM
    state_bytes = Bb * Hp * (y_item + 4)            # h (matmul dtype) + c (f32)
    per_step_bytes = Bb * (D * x_item + Hp * y_item)     # streamed per timestep

    # Time chunking: ~4 MiB of streamed x+y per grid step (amortizes the
    # ~0.35us/step grid overhead), capped by what double-buffering leaves in
    # VMEM next to the weights; chosen as a divisor of T to avoid padding.
    stream_budget = max(2 * per_step_bytes,
                        vmem_budget // 2 - weight_bytes - state_bytes)
    if t_chunk is None:
        t_target = min(T,
                       max(1, (4 << 20) // per_step_bytes),
                       max(1, stream_budget // (2 * per_step_bytes)))
        t_chunk = _largest_divisor_leq(T, t_target)
        if t_chunk * 8 < t_target:       # awkward T (e.g. prime): pad instead
            t_chunk = min(T, t_target)
    n_t = pl.cdiv(T, t_chunk)
    Tp = n_t * t_chunk
    if Tp != T:
        x_tbd = jnp.pad(x_tbd, ((0, Tp - T), (0, 0), (0, 0)))

    # Fixed partial unroll of the serial time loop (LLO scheduling visibility).
    unroll = max(u for u in (8, 4, 2, 1) if t_chunk % u == 0)

    vmem_est = (2 * t_chunk * per_step_bytes        # double-buffered x/y chunks
                + weight_bytes + state_bytes
                + 2 * G * 4                         # bias
                + 8 * Bb * G * 4)                   # in-loop gate temporaries
    vmem_limit = int(min(vmem_budget, max(32 << 20, 2 * vmem_est)))

    kernel = functools.partial(_lstm_fused_kernel, hidden=Hp,
                               t_chunk=t_chunk, unroll=unroll)

    y = pl.pallas_call(
        kernel,
        out_shape=jax.ShapeDtypeStruct((Tp, B, Hp), out_dtype),
        grid_spec=pltpu.PrefetchScalarGridSpec(
            num_scalar_prefetch=0,
            grid=(B // Bb, n_t),
            in_specs=[
                pl.BlockSpec((t_chunk, Bb, D), lambda bi, ti: (ti, bi, 0)),
                pl.BlockSpec((Bb, Hp), lambda bi, ti: (bi, 0)),
                pl.BlockSpec((Bb, Hp), lambda bi, ti: (bi, 0)),
                pl.BlockSpec((1, G), lambda bi, ti: (0, 0)),
                pl.BlockSpec(memory_space=pl.ANY),   # W_ih^T: manual one-shot DMA
                pl.BlockSpec(memory_space=pl.ANY),   # W_hh^T: manual one-shot DMA
            ],
            out_specs=pl.BlockSpec((t_chunk, Bb, Hp), lambda bi, ti: (ti, bi, 0)),
            scratch_shapes=[
                pltpu.VMEM((D, G), w_ih_t.dtype),    # resident W_ih^T
                pltpu.VMEM((Hp, G), w_hh_t.dtype),   # resident W_hh^T
                pltpu.VMEM((Bb, Hp), out_dtype),     # h carry (matmul dtype)
                pltpu.VMEM((Bb, Hp), jnp.float32),   # c carry (f32)
                pltpu.SemaphoreType.DMA((2,)),
            ]),
        compiler_params=pltpu.CompilerParams(
            dimension_semantics=("parallel", "arbitrary"),
            vmem_limit_bytes=vmem_limit),
    )(x_tbd, h0, c0, bias, w_ih_t, w_hh_t)
    return y[:T]


# ------------------------------- full module ----------------------------------

class LSTMSuitPallas:
    """Pallas equivalent of LSTM_Suit: (B, C_in, T) -> (B, H, T).

    The PyTorch module draws h0/c0 with torch.randn inside forward(); here they
    are explicit deterministic inputs of shape (layers, B, H)."""

    def __init__(self, in_channel_count, out_channel_count, layer_count,
                 batch_count, key, matmul_dtype=jnp.bfloat16):
        self.in_channels = in_channel_count
        self.hidden = out_channel_count
        self.hidden_padded = _round_up(out_channel_count, 128)   # lane-dense
        self.layers = layer_count
        self.batch = batch_count
        self.matmul_dtype = jnp.dtype(matmul_dtype)
        H, Hp = out_channel_count, self.hidden_padded
        bound = 1.0 / np.sqrt(H)              # PyTorch default LSTM init range
        params, kparams = [], []
        for l in range(layer_count):
            d_in = in_channel_count if l == 0 else H
            d_in_p = in_channel_count if l == 0 else Hp
            key, k1, k2, k3, k4 = jax.random.split(key, 5)
            w_ih = jax.random.uniform(k1, (4 * H, d_in), jnp.float32, -bound, bound)
            w_hh = jax.random.uniform(k2, (4 * H, H), jnp.float32, -bound, bound)
            b_ih = jax.random.uniform(k3, (4 * H,), jnp.float32, -bound, bound)
            b_hh = jax.random.uniform(k4, (4 * H,), jnp.float32, -bound, bound)
            params.append((w_ih, w_hh, b_ih, b_hh))
            # Kernel-side weights: gate-padded to Hp, transposed, matmul dtype.
            # TODO(synk): optional fp8 W_hh/W_ih on v7x (needs a precision gate).
            wih_p = _pad_gate_weight(w_ih, H, Hp, d_in, d_in_p)
            whh_p = _pad_gate_weight(w_hh, H, Hp, H, Hp)
            bias_p = _pad_gate_bias(b_ih + b_hh, H, Hp)
            kparams.append((
                jnp.transpose(wih_p).astype(self.matmul_dtype),   # (d_in_p, 4Hp)
                jnp.transpose(whh_p).astype(self.matmul_dtype),   # (Hp, 4Hp)
                bias_p.reshape(1, 4 * Hp).astype(jnp.float32)))
        self.params = params          # unpadded f32 (reference semantics)
        self.kernel_params = kparams  # padded / transposed / matmul dtype

    def __call__(self, x_bct, h0, c0):
        H, Hp = self.hidden, self.hidden_padded
        # Single fused relayout (B, C_in, T) -> time-major (T, B, C_in).
        y = jnp.transpose(x_bct, (2, 0, 1)).astype(self.matmul_dtype)
        for l, (w_ih_t, w_hh_t, bias) in enumerate(self.kernel_params):
            h0l = _pad_axis(h0[l].astype(jnp.float32), 1, Hp)
            c0l = _pad_axis(c0[l].astype(jnp.float32), 1, Hp)
            y = lstm_layer_pallas(y, h0l, c0l, w_ih_t, w_hh_t, bias)
            # y: (T, B, Hp) in matmul dtype; padded hidden lanes stay exactly 0.
        y = y[:, :, :H]
        # Single fused relayout (T, B, H) -> (B, H, T); module returns f32.
        return jnp.transpose(y, (1, 2, 0)).astype(jnp.float32)


# ----------------------------- pure-JAX reference ------------------------------

def lstm_ref(x_bct, h0, c0, params, matmul_dtype=jnp.float32):
    """lax.scan reference mirroring the kernel's precision recipe: matmuls in
    `matmul_dtype` with f32 accumulation, gates/c in f32, h carried in
    `matmul_dtype`.  matmul_dtype=f32 == the module's exact f32 semantics."""
    matmul_dtype = jnp.dtype(matmul_dtype)
    y = jnp.transpose(x_bct, (2, 0, 1))                  # (T, B, D)
    for l, (w_ih, w_hh, b_ih, b_hh) in enumerate(params):
        H = w_hh.shape[1]
        wih_t = jnp.transpose(w_ih).astype(matmul_dtype)
        whh_t = jnp.transpose(w_hh).astype(matmul_dtype)
        b = (b_ih + b_hh).astype(jnp.float32)[None, :]
        xs = y.astype(matmul_dtype)

        def step(carry, x_t, wih_t=wih_t, whh_t=whh_t, b=b, H=H):
            h, c = carry
            gates = (jnp.dot(x_t, wih_t, preferred_element_type=jnp.float32)
                     + jnp.dot(h, whh_t, preferred_element_type=jnp.float32)
                     + b)
            i = _sigmoid(gates[:, 0 * H:1 * H])
            f = _sigmoid(gates[:, 1 * H:2 * H])
            g = jnp.tanh(gates[:, 2 * H:3 * H])
            o = _sigmoid(gates[:, 3 * H:4 * H])
            c = f * c + i * g
            h = (o * jnp.tanh(c)).astype(matmul_dtype)
            return (h, c), h

        (_, _), y = jax.lax.scan(
            step, (h0[l].astype(matmul_dtype), c0[l].astype(jnp.float32)), xs)
    return jnp.transpose(y, (1, 2, 0)).astype(jnp.float32)   # (B, H, T)


# ----------------------------------- test --------------------------------------

if __name__ == "__main__":
    B, C_IN, T, H, L = 2, 8, 8, 32, 2

    key = jax.random.PRNGKey(0)
    key, kx, kh, kc, kp = jax.random.split(key, 5)

    x = jax.random.normal(kx, (B, C_IN, T), jnp.float32)       # (B, C_in, T)
    h0 = jax.random.normal(kh, (L, B, H), jnp.float32)
    c0 = jax.random.normal(kc, (L, B, H), jnp.float32)

    # --- recommended config: bf16 MXU operands / h carry, f32 gates & c -----
    model_bf16 = LSTMSuitPallas(C_IN, H, L, B, kp, matmul_dtype=jnp.bfloat16)
    out_bf16 = jax.block_until_ready(model_bf16(x, h0, c0))
    assert out_bf16.shape == (B, H, T), out_bf16.shape

    # Tight check against a precision-matched (same bf16 recipe) reference.
    ref_bf16 = jax.block_until_ready(
        lstm_ref(x, h0, c0, model_bf16.params, matmul_dtype=jnp.bfloat16))
    np.testing.assert_allclose(np.asarray(out_bf16), np.asarray(ref_bf16),
                               rtol=5e-3, atol=5e-3)

    # Loose sanity check against the module's pure-f32 semantics.
    ref_f32 = jax.block_until_ready(
        lstm_ref(x, h0, c0, model_bf16.params, matmul_dtype=jnp.float32))
    np.testing.assert_allclose(np.asarray(out_bf16), np.asarray(ref_f32),
                               rtol=1e-1, atol=1e-1)

    # --- full-f32 kernel config matches f32 semantics tightly ---------------
    model_f32 = LSTMSuitPallas(C_IN, H, L, B, kp, matmul_dtype=jnp.float32)
    out_f32 = jax.block_until_ready(model_f32(x, h0, c0))
    np.testing.assert_allclose(np.asarray(out_f32), np.asarray(ref_f32),
                               rtol=1e-3, atol=1e-3)

    print("KERNEL_OK")
</pallas_src>

<mosaic_0001>
module attributes {stable_mosaic.version = 11 : i64} {
  func.func @_lstm_fused_kernel(%arg0: i32, %arg1: i32, %arg2: memref<8x2x8xbf16, #tpu.memory_space<vmem>>, %arg3: memref<2x128xf32, #tpu.memory_space<vmem>>, %arg4: memref<2x128xf32, #tpu.memory_space<vmem>>, %arg5: memref<1x512xf32, #tpu.memory_space<vmem>>, %arg6: memref<8x512xbf16, #tpu.memory_space<any>>, %arg7: memref<128x512xbf16, #tpu.memory_space<any>>, %arg8: memref<8x2x128xbf16, #tpu.memory_space<vmem>>, %arg9: memref<8x512xbf16, #tpu.memory_space<vmem>>, %arg10: memref<128x512xbf16, #tpu.memory_space<vmem>>, %arg11: memref<2x128xbf16, #tpu.memory_space<vmem>>, %arg12: memref<2x128xf32, #tpu.memory_space<vmem>>, %arg13: memref<2x!tpu.dma_semaphore, #tpu.memory_space<semaphore_mem>>) attributes {dimension_semantics = [#tpu.dimension_semantics<parallel>, #tpu.dimension_semantics<arbitrary>], iteration_bounds = array<i64: 1, 1>, scalar_prefetch = 0 : i64, scratch_operands = 5 : i64, tpu.core_type = #tpu.core_type<tc>, window_params = [{transform_indices = @transform_0, window_bounds = array<i64: 8, 2, 8>}, {transform_indices = @transform_1, window_bounds = array<i64: 2, 128>}, {transform_indices = @transform_2, window_bounds = array<i64: 2, 128>}, {pipeline_mode = #tpu.pipeline_mode<synchronous>, transform_indices = @transform_3, window_bounds = array<i64: 1, 512>}, {}, {}, {transform_indices = @transform_6, window_bounds = array<i64: 8, 2, 128>}]} {
    %c0_i32 = arith.constant 0 : i32
    %0 = arith.cmpi eq, %arg1, %c0_i32 : i32
    %1 = arith.extui %0 : i1 to i32
    %c0_i32_0 = arith.constant 0 : i32
    %2 = arith.cmpi ne, %1, %c0_i32_0 : i32
    scf.if %2 {
      %c0_i32_232 = arith.constant 0 : i32
      %411 = tpu.memref_slice %arg13[%c0_i32_232] : memref<2x!tpu.dma_semaphore, #tpu.memory_space<semaphore_mem>> -> memref<1x!tpu.dma_semaphore, #tpu.memory_space<semaphore_mem>>
      %412 = tpu.memref_squeeze %411 : memref<1x!tpu.dma_semaphore, #tpu.memory_space<semaphore_mem>> -> memref<!tpu.dma_semaphore, #tpu.memory_space<semaphore_mem>>
      tpu.enqueue_dma source(%arg6 : memref<8x512xbf16, #tpu.memory_space<any>>) target(%arg9 : memref<8x512xbf16, #tpu.memory_space<vmem>>) target_semaphore(%412 : memref<!tpu.dma_semaphore, #tpu.memory_space<semaphore_mem>>)
      %c1_i32_233 = arith.constant 1 : i32
      %413 = tpu.memref_slice %arg13[%c1_i32_233] : memref<2x!tpu.dma_semaphore, #tpu.memory_space<semaphore_mem>> -> memref<1x!tpu.dma_semaphore, #tpu.memory_space<semaphore_mem>>
      %414 = tpu.memref_squeeze %413 : memref<1x!tpu.dma_semaphore, #tpu.memory_space<semaphore_mem>> -> memref<!tpu.dma_semaphore, #tpu.memory_space<semaphore_mem>>
      tpu.enqueue_dma source(%arg7 : memref<128x512xbf16, #tpu.memory_space<any>>) target(%arg10 : memref<128x512xbf16, #tpu.memory_space<vmem>>) target_semaphore(%414 : memref<!tpu.dma_semaphore, #tpu.memory_space<semaphore_mem>>)
      %c0_234 = arith.constant 0 : index
      %c0_235 = arith.constant 0 : index
      %415 = vector.load %arg3[%c0_234, %c0_235] : memref<2x128xf32, #tpu.memory_space<vmem>>, vector<2x128xf32>
      %416 = arith.truncf %415 : vector<2x128xf32> to vector<2x128xbf16>
      %c0_236 = arith.constant 0 : index
      %c0_237 = arith.constant 0 : index
      %417 = vector.load %arg11[%c0_236, %c0_237] : memref<2x128xbf16, #tpu.memory_space<vmem>>, vector<2x128xbf16>
      tpu.vector_store %arg11[%c0_236, %c0_237], %416 {strides = array<i32>} : memref<2x128xbf16, #tpu.memory_space<vmem>>, vector<2x128xbf16>,
      %c0_238 = arith.constant 0 : index
      %c0_239 = arith.constant 0 : index
      %418 = vector.load %arg4[%c0_238, %c0_239] : memref<2x128xf32, #tpu.memory_space<vmem>>, vector<2x128xf32>
      %c0_240 = arith.constant 0 : index
      %c0_241 = arith.constant 0 : index
      %419 = vector.load %arg12[%c0_240, %c0_241] : memref<2x128xf32, #tpu.memory_space<vmem>>, vector<2x128xf32>
      tpu.vector_store %arg12[%c0_240, %c0_241], %418 {strides = array<i32>} : memref<2x128xf32, #tpu.memory_space<vmem>>, vector<2x128xf32>,
      %c0_i32_242 = arith.constant 0 : i32
      %420 = tpu.memref_slice %arg13[%c0_i32_242] : memref<2x!tpu.dma_semaphore, #tpu.memory_space<semaphore_mem>> -> memref<1x!tpu.dma_semaphore, #tpu.memory_space<semaphore_mem>>
      %421 = tpu.memref_squeeze %420 : memref<1x!tpu.dma_semaphore, #tpu.memory_space<semaphore_mem>> -> memref<!tpu.dma_semaphore, #tpu.memory_space<semaphore_mem>>
      tpu.wait_dma2 semaphore(%421 : memref<!tpu.dma_semaphore, #tpu.memory_space<semaphore_mem>>) src(%arg6 : memref<8x512xbf16, #tpu.memory_space<any>>) dst(%arg9 : memref<8x512xbf16, #tpu.memory_space<vmem>>)
      %c1_i32_243 = arith.constant 1 : i32
      %422 = tpu.memref_slice %arg13[%c1_i32_243] : memref<2x!tpu.dma_semaphore, #tpu.memory_space<semaphore_mem>> -> memref<1x!tpu.dma_semaphore, #tpu.memory_space<semaphore_mem>>
      %423 = tpu.memref_squeeze %422 : memref<1x!tpu.dma_semaphore, #tpu.memory_space<semaphore_mem>> -> memref<!tpu.dma_semaphore, #tpu.memory_space<semaphore_mem>>
      tpu.wait_dma2 semaphore(%423 : memref<!tpu.dma_semaphore, #tpu.memory_space<semaphore_mem>>) src(%arg7 : memref<128x512xbf16, #tpu.memory_space<any>>) dst(%arg10 : memref<128x512xbf16, #tpu.memory_space<vmem>>)
    } else {
    }
    %c0_i32_1 = arith.constant 0 : i32
    %c0 = arith.constant 0 : index
    %c0_2 = arith.constant 0 : index
    %3 = vector.load %arg11[%c0, %c0_2] : memref<2x128xbf16, #tpu.memory_space<vmem>>, vector<2x128xbf16>
    %c0_3 = arith.constant 0 : index
    %c0_4 = arith.constant 0 : index
    %4 = vector.load %arg12[%c0_3, %c0_4] : memref<2x128xf32, #tpu.memory_space<vmem>>, vector<2x128xf32>
    %5 = arith.index_cast %c0_i32_1 : i32 to index
    %c0_5 = arith.constant 0 : index
    %c0_6 = arith.constant 0 : index
    %6 = vector.load %arg2[%5, %c0_5, %c0_6] : memref<8x2x8xbf16, #tpu.memory_space<vmem>>, vector<1x2x8xbf16>
    %7 = vector.shape_cast %6 : vector<1x2x8xbf16> to vector<2x8xbf16>
    %c0_7 = arith.constant 0 : index
    %c0_8 = arith.constant 0 : index
    %8 = vector.load %arg9[%c0_7, %c0_8] : memref<8x512xbf16, #tpu.memory_space<vmem>>, vector<8x512xbf16>
    %cst = arith.constant dense<0.000000e+00> : vector<2x512xf32>
    %9 = tpu.matmul %7, %8, %cst {dimension_numbers = #tpu.dot_dimension_numbers<[1], [0], [0], [1], [0, 0, 1, 1], [], []>} : vector<2x8xbf16>, vector<8x512xbf16>, vector<2x512xf32> -> vector<2x512xf32>
    %c0_9 = arith.constant 0 : index
    %c0_10 = arith.constant 0 : index
    %10 = vector.load %arg10[%c0_9, %c0_10] : memref<128x512xbf16, #tpu.memory_space<vmem>>, vector<128x512xbf16>
    %cst_11 = arith.constant dense<0.000000e+00> : vector<2x512xf32>
    %11 = tpu.matmul %3, %10, %cst_11 {dimension_numbers = #tpu.dot_dimension_numbers<[1], [0], [0], [1], [0, 0, 1, 1], [], []>} : vector<2x128xbf16>, vector<128x512xbf16>, vector<2x512xf32> -> vector<2x512xf32>
    %12 = arith.addf %9, %11 : vector<2x512xf32>
    %c0_12 = arith.constant 0 : index
    %c0_13 = arith.constant 0 : index
    %13 = vector.load %arg5[%c0_12, %c0_13] : memref<1x512xf32, #tpu.memory_space<vmem>>, vector<1x512xf32>
    %14 = vector.broadcast %13 : vector<1x512xf32> to vector<2x512xf32>
    %15 = arith.addf %12, %14 : vector<2x512xf32>
    %16 = vector.extract_strided_slice %15 {offsets = [0, 0], sizes = [2, 128], strides = [1, 1]} : vector<2x512xf32> to vector<2x128xf32>
    %cst_14 = arith.constant 5.000000e-01 : f32
    %17 = vector.broadcast %cst_14 : f32 to vector<2x128xf32>
    %18 = arith.mulf %17, %16 : vector<2x128xf32>
    %19 = math.tanh %18 : vector<2x128xf32>
    %cst_15 = arith.constant 5.000000e-01 : f32
    %20 = vector.broadcast %cst_15 : f32 to vector<2x128xf32>
    %21 = arith.mulf %20, %19 : vector<2x128xf32>
    %cst_16 = arith.constant 5.000000e-01 : f32
    %22 = vector.broadcast %cst_16 : f32 to vector<2x128xf32>
    %23 = arith.addf %21, %22 : vector<2x128xf32>
    %24 = vector.extract_strided_slice %15 {offsets = [0, 128], sizes = [2, 128], strides = [1, 1]} : vector<2x512xf32> to vector<2x128xf32>
    %cst_17 = arith.constant 5.000000e-01 : f32
    %25 = vector.broadcast %cst_17 : f32 to vector<2x128xf32>
    %26 = arith.mulf %25, %24 : vector<2x128xf32>
    %27 = math.tanh %26 : vector<2x128xf32>
    %cst_18 = arith.constant 5.000000e-01 : f32
    %28 = vector.broadcast %cst_18 : f32 to vector<2x128xf32>
    %29 = arith.mulf %28, %27 : vector<2x128xf32>
    %cst_19 = arith.constant 5.000000e-01 : f32
    %30 = vector.broadcast %cst_19 : f32 to vector<2x128xf32>
    %31 = arith.addf %29, %30 : vector<2x128xf32>
    %32 = vector.extract_strided_slice %15 {offsets = [0, 256], sizes = [2, 128], strides = [1, 1]} : vector<2x512xf32> to vector<2x128xf32>
    %33 = math.tanh %32 : vector<2x128xf32>
    %34 = vector.extract_strided_slice %15 {offsets = [0, 384], sizes = [2, 128], strides = [1, 1]} : vector<2x512xf32> to vector<2x128xf32>
    %cst_20 = arith.constant 5.000000e-01 : f32
    %35 = vector.broadcast %cst_20 : f32 to vector<2x128xf32>
    %36 = arith.mulf %35, %34 : vector<2x128xf32>
    %37 = math.tanh %36 : vector<2x128xf32>
    %cst_21 = arith.constant 5.000000e-01 : f32
    %38 = vector.broadcast %cst_21 : f32 to vector<2x128xf32>
    %39 = arith.mulf %38, %37 : vector<2x128xf32>
    %cst_22 = arith.constant 5.000000e-01 : f32
    %40 = vector.broadcast %cst_22 : f32 to vector<2x128xf32>
    %41 = arith.addf %39, %40 : vector<2x128xf32>
    %42 = arith.mulf %31, %4 : vector<2x128xf32>
    %43 = arith.mulf %23, %33 : vector<2x128xf32>
    %44 = arith.addf %42, %43 : vector<2x128xf32>
    %45 = math.tanh %44 : vector<2x128xf32>
    %46 = arith.mulf %41, %45 : vector<2x128xf32>
    %47 = arith.truncf %46 : vector<2x128xf32> to vector<2x128xbf16>
    %c0_23 = arith.constant 0 : index
    %c0_24 = arith.constant 0 : index
    %48 = vector.load %arg12[%c0_23, %c0_24] : memref<2x128xf32, #tpu.memory_space<vmem>>, vector<2x128xf32>
    tpu.vector_store %arg12[%c0_23, %c0_24], %44 {strides = array<i32>} : memref<2x128xf32, #tpu.memory_space<vmem>>, vector<2x128xf32>,
    %c0_25 = arith.constant 0 : index
    %c0_26 = arith.constant 0 : index
    %49 = vector.load %arg11[%c0_25, %c0_26] : memref<2x128xbf16, #tpu.memory_space<vmem>>, vector<2x128xbf16>
    tpu.vector_store %arg11[%c0_25, %c0_26], %47 {strides = array<i32>} : memref<2x128xbf16, #tpu.memory_space<vmem>>, vector<2x128xbf16>,
    %50 = arith.index_cast %c0_i32_1 : i32 to index
    %c0_27 = arith.constant 0 : index
    %c0_28 = arith.constant 0 : index
    %51 = vector.load %arg8[%50, %c0_27, %c0_28] : memref<8x2x128xbf16, #tpu.memory_space<vmem>>, vector<1x2x128xbf16>
    %52 = vector.shape_cast %51 : vector<1x2x128xbf16> to vector<2x128xbf16>
    %53 = vector.shape_cast %47 : vector<2x128xbf16> to vector<1x2x128xbf16>
    tpu.vector_store %arg8[%50, %c0_27, %c0_28], %53 {strides = array<i32>} : memref<8x2x128xbf16, #tpu.memory_space<vmem>>, vector<1x2x128xbf16>,
    %c1_i32 = arith.constant 1 : i32
    %c0_29 = arith.constant 0 : index
    %c0_30 = arith.constant 0 : index
    %54 = vector.load %arg11[%c0_29, %c0_30] : memref<2x128xbf16, #tpu.memory_space<vmem>>, vector<2x128xbf16>
    %c0_31 = arith.constant 0 : index
    %c0_32 = arith.constant 0 : index
    %55 = vector.load %arg12[%c0_31, %c0_32] : memref<2x128xf32, #tpu.memory_space<vmem>>, vector<2x128xf32>
    %56 = arith.index_cast %c1_i32 : i32 to index
    %c0_33 = arith.constant 0 : index
    %c0_34 = arith.constant 0 : index
    %57 = vector.load %arg2[%56, %c0_33, %c0_34] : memref<8x2x8xbf16, #tpu.memory_space<vmem>>, vector<1x2x8xbf16>
    %58 = vector.shape_cast %57 : vector<1x2x8xbf16> to vector<2x8xbf16>
    %c0_35 = arith.constant 0 : index
    %c0_36 = arith.constant 0 : index
    %59 = vector.load %arg9[%c0_35, %c0_36] : memref<8x512xbf16, #tpu.memory_space<vmem>>, vector<8x512xbf16>
    %cst_37 = arith.constant dense<0.000000e+00> : vector<2x512xf32>
    %60 = tpu.matmul %58, %59, %cst_37 {dimension_numbers = #tpu.dot_dimension_numbers<[1], [0], [0], [1], [0, 0, 1, 1], [], []>} : vector<2x8xbf16>, vector<8x512xbf16>, vector<2x512xf32> -> vector<2x512xf32>
    %c0_38 = arith.constant 0 : index
    %c0_39 = arith.constant 0 : index
    %61 = vector.load %arg10[%c0_38, %c0_39] : memref<128x512xbf16, #tpu.memory_space<vmem>>, vector<128x512xbf16>
    %cst_40 = arith.constant dense<0.000000e+00> : vector<2x512xf32>
    %62 = tpu.matmul %54, %61, %cst_40 {dimension_numbers = #tpu.dot_dimension_numbers<[1], [0], [0], [1], [0, 0, 1, 1], [], []>} : vector<2x128xbf16>, vector<128x512xbf16>, vector<2x512xf32> -> vector<2x512xf32>
    %63 = arith.addf %60, %62 : vector<2x512xf32>
    %c0_41 = arith.constant 0 : index
    %c0_42 = arith.constant 0 : index
    %64 = vector.load %arg5[%c0_41, %c0_42] : memref<1x512xf32, #tpu.memory_space<vmem>>, vector<1x512xf32>
    %65 = vector.broadcast %64 : vector<1x512xf32> to vector<2x512xf32>
    %66 = arith.addf %63, %65 : vector<2x512xf32>
    %67 = vector.extract_strided_slice %66 {offsets = [0, 0], sizes = [2, 128], strides = [1, 1]} : vector<2x512xf32> to vector<2x128xf32>
    %cst_43 = arith.constant 5.000000e-01 : f32
    %68 = vector.broadcast %cst_43 : f32 to vector<2x128xf32>
    %69 = arith.mulf %68, %67 : vector<2x128xf32>
    %70 = math.tanh %69 : vector<2x128xf32>
    %cst_44 = arith.constant 5.000000e-01 : f32
    %71 = vector.broadcast %cst_44 : f32 to vector<2x128xf32>
    %72 = arith.mulf %71, %70 : vector<2x128xf32>
    %cst_45 = arith.constant 5.000000e-01 : f32
    %73 = vector.broadcast %cst_45 : f32 to vector<2x128xf32>
    %74 = arith.addf %72, %73 : vector<2x128xf32>
    %75 = vector.extract_strided_slice %66 {offsets = [0, 128], sizes = [2, 128], strides = [1, 1]} : vector<2x512xf32> to vector<2x128xf32>
    %cst_46 = arith.constant 5.000000e-01 : f32
    %76 = vector.broadcast %cst_46 : f32 to vector<2x128xf32>
    %77 = arith.mulf %76, %75 : vector<2x128xf32>
    %78 = math.tanh %77 : vector<2x128xf32>
    %cst_47 = arith.constant 5.000000e-01 : f32
    %79 = vector.broadcast %cst_47 : f32 to vector<2x128xf32>
    %80 = arith.mulf %79, %78 : vector<2x128xf32>
    %cst_48 = arith.constant 5.000000e-01 : f32
    %81 = vector.broadcast %cst_48 : f32 to vector<2x128xf32>
    %82 = arith.addf %80, %81 : vector<2x128xf32>
    %83 = vector.extract_strided_slice %66 {offsets = [0, 256], sizes = [2, 128], strides = [1, 1]} : vector<2x512xf32> to vector<2x128xf32>
    %84 = math.tanh %83 : vector<2x128xf32>
    %85 = vector.extract_strided_slice %66 {offsets = [0, 384], sizes = [2, 128], strides = [1, 1]} : vector<2x512xf32> to vector<2x128xf32>
    %cst_49 = arith.constant 5.000000e-01 : f32
    %86 = vector.broadcast %cst_49 : f32 to vector<2x128xf32>
    %87 = arith.mulf %86, %85 : vector<2x128xf32>
    %88 = math.tanh %87 : vector<2x128xf32>
    %cst_50 = arith.constant 5.000000e-01 : f32
    %89 = vector.broadcast %cst_50 : f32 to vector<2x128xf32>
    %90 = arith.mulf %89, %88 : vector<2x128xf32>
    %cst_51 = arith.constant 5.000000e-01 : f32
    %91 = vector.broadcast %cst_51 : f32 to vector<2x128xf32>
    %92 = arith.addf %90, %91 : vector<2x128xf32>
    %93 = arith.mulf %82, %55 : vector<2x128xf32>
    %94 = arith.mulf %74, %84 : vector<2x128xf32>
    %95 = arith.addf %93, %94 : vector<2x128xf32>
    %96 = math.tanh %95 : vector<2x128xf32>
    %97 = arith.mulf %92, %96 : vector<2x128xf32>
    %98 = arith.truncf %97 : vector<2x128xf32> to vector<2x128xbf16>
    %c0_52 = arith.constant 0 : index
    %c0_53 = arith.constant 0 : index
    %99 = vector.load %arg12[%c0_52, %c0_53] : memref<2x128xf32, #tpu.memory_space<vmem>>, vector<2x128xf32>
    tpu.vector_store %arg12[%c0_52, %c0_53], %95 {strides = array<i32>} : memref<2x128xf32, #tpu.memory_space<vmem>>, vector<2x128xf32>,
    %c0_54 = arith.constant 0 : index
    %c0_55 = arith.constant 0 : index
    %100 = vector.load %arg11[%c0_54, %c0_55] : memref<2x128xbf16, #tpu.memory_space<vmem>>, vector<2x128xbf16>
    tpu.vector_store %arg11[%c0_54, %c0_55], %98 {strides = array<i32>} : memref<2x128xbf16, #tpu.memory_space<vmem>>, vector<2x128xbf16>,
    %101 = arith.index_cast %c1_i32 : i32 to index
    %c0_56 = arith.constant 0 : index
    %c0_57 = arith.constant 0 : index
    %102 = vector.load %arg8[%101, %c0_56, %c0_57] : memref<8x2x128xbf16, #tpu.memory_space<vmem>>, vector<1x2x128xbf16>
    %103 = vector.shape_cast %102 : vector<1x2x128xbf16> to vector<2x128xbf16>
    %104 = vector.shape_cast %98 : vector<2x128xbf16> to vector<1x2x128xbf16>
    tpu.vector_store %arg8[%101, %c0_56, %c0_57], %104 {strides = array<i32>} : memref<8x2x128xbf16, #tpu.memory_space<vmem>>, vector<1x2x128xbf16>,
    %c2_i32 = arith.constant 2 : i32
    %c0_58 = arith.constant 0 : index
    %c0_59 = arith.constant 0 : index
    %105 = vector.load %arg11[%c0_58, %c0_59] : memref<2x128xbf16, #tpu.memory_space<vmem>>, vector<2x128xbf16>
    %c0_60 = arith.constant 0 : index
    %c0_61 = arith.constant 0 : index
    %106 = vector.load %arg12[%c0_60, %c0_61] : memref<2x128xf32, #tpu.memory_space<vmem>>, vector<2x128xf32>
    %107 = arith.index_cast %c2_i32 : i32 to index
    %c0_62 = arith.constant 0 : index
    %c0_63 = arith.constant 0 : index
    %108 = vector.load %arg2[%107, %c0_62, %c0_63] : memref<8x2x8xbf16, #tpu.memory_space<vmem>>, vector<1x2x8xbf16>
    %109 = vector.shape_cast %108 : vector<1x2x8xbf16> to vector<2x8xbf16>
    %c0_64 = arith.constant 0 : index
    %c0_65 = arith.constant 0 : index
    %110 = vector.load %arg9[%c0_64, %c0_65] : memref<8x512xbf16, #tpu.memory_space<vmem>>, vector<8x512xbf16>
    %cst_66 = arith.constant dense<0.000000e+00> : vector<2x512xf32>
    %111 = tpu.matmul %109, %110, %cst_66 {dimension_numbers = #tpu.dot_dimension_numbers<[1], [0], [0], [1], [0, 0, 1, 1], [], []>} : vector<2x8xbf16>, vector<8x512xbf16>, vector<2x512xf32> -> vector<2x512xf32>
    %c0_67 = arith.constant 0 : index
    %c0_68 = arith.constant 0 : index
    %112 = vector.load %arg10[%c0_67, %c0_68] : memref<128x512xbf16, #tpu.memory_space<vmem>>, vector<128x512xbf16>
    %cst_69 = arith.constant dense<0.000000e+00> : vector<2x512xf32>
    %113 = tpu.matmul %105, %112, %cst_69 {dimension_numbers = #tpu.dot_dimension_numbers<[1], [0], [0], [1], [0, 0, 1, 1], [], []>} : vector<2x128xbf16>, vector<128x512xbf16>, vector<2x512xf32> -> vector<2x512xf32>
    %114 = arith.addf %111, %113 : vector<2x512xf32>
    %c0_70 = arith.constant 0 : index
    %c0_71 = arith.constant 0 : index
    %115 = vector.load %arg5[%c0_70, %c0_71] : memref<1x512xf32, #tpu.memory_space<vmem>>, vector<1x512xf32>
    %116 = vector.broadcast %115 : vector<1x512xf32> to vector<2x512xf32>
    %117 = arith.addf %114, %116 : vector<2x512xf32>
    %118 = vector.extract_strided_slice %117 {offsets = [0, 0], sizes = [2, 128], strides = [1, 1]} : vector<2x512xf32> to vector<2x128xf32>
    %cst_72 = arith.constant 5.000000e-01 : f32
    %119 = vector.broadcast %cst_72 : f32 to vector<2x128xf32>
    %120 = arith.mulf %119, %118 : vector<2x128xf32>
    %121 = math.tanh %120 : vector<2x128xf32>
    %cst_73 = arith.constant 5.000000e-01 : f32
    %122 = vector.broadcast %cst_73 : f32 to vector<2x128xf32>
    %123 = arith.mulf %122, %121 : vector<2x128xf32>
    %cst_74 = arith.constant 5.000000e-01 : f32
    %124 = vector.broadcast %cst_74 : f32 to vector<2x128xf32>
    %125 = arith.addf %123, %124 : vector<2x128xf32>
    %126 = vector.extract_strided_slice %117 {offsets = [0, 128], sizes = [2, 128], strides = [1, 1]} : vector<2x512xf32> to vector<2x128xf32>
    %cst_75 = arith.constant 5.000000e-01 : f32
    %127 = vector.broadcast %cst_75 : f32 to vector<2x128xf32>
    %128 = arith.mulf %127, %126 : vector<2x128xf32>
    %129 = math.tanh %128 : vector<2x128xf32>
    %cst_76 = arith.constant 5.000000e-01 : f32
    %130 = vector.broadcast %cst_76 : f32 to vector<2x128xf32>
    %131 = arith.mulf %130, %129 : vector<2x128xf32>
    %cst_77 = arith.constant 5.000000e-01 : f32
    %132 = vector.broadcast %cst_77 : f32 to vector<2x128xf32>
    %133 = arith.addf %131, %132 : vector<2x128xf32>
    %134 = vector.extract_strided_slice %117 {offsets = [0, 256], sizes = [2, 128], strides = [1, 1]} : vector<2x512xf32> to vector<2x128xf32>
    %135 = math.tanh %134 : vector<2x128xf32>
    %136 = vector.extract_strided_slice %117 {offsets = [0, 384], sizes = [2, 128], strides = [1, 1]} : vector<2x512xf32> to vector<2x128xf32>
    %cst_78 = arith.constant 5.000000e-01 : f32
    %137 = vector.broadcast %cst_78 : f32 to vector<2x128xf32>
    %138 = arith.mulf %137, %136 : vector<2x128xf32>
    %139 = math.tanh %138 : vector<2x128xf32>
    %cst_79 = arith.constant 5.000000e-01 : f32
    %140 = vector.broadcast %cst_79 : f32 to vector<2x128xf32>
    %141 = arith.mulf %140, %139 : vector<2x128xf32>
    %cst_80 = arith.constant 5.000000e-01 : f32
    %142 = vector.broadcast %cst_80 : f32 to vector<2x128xf32>
    %143 = arith.addf %141, %142 : vector<2x128xf32>
    %144 = arith.mulf %133, %106 : vector<2x128xf32>
    %145 = arith.mulf %125, %135 : vector<2x128xf32>
    %146 = arith.addf %144, %145 : vector<2x128xf32>
    %147 = math.tanh %146 : vector<2x128xf32>
    %148 = arith.mulf %143, %147 : vector<2x128xf32>
    %149 = arith.truncf %148 : vector<2x128xf32> to vector<2x128xbf16>
    %c0_81 = arith.constant 0 : index
    %c0_82 = arith.constant 0 : index
    %150 = vector.load %arg12[%c0_81, %c0_82] : memref<2x128xf32, #tpu.memory_space<vmem>>, vector<2x128xf32>
    tpu.vector_store %arg12[%c0_81, %c0_82], %146 {strides = array<i32>} : memref<2x128xf32, #tpu.memory_space<vmem>>, vector<2x128xf32>,
    %c0_83 = arith.constant 0 : index
    %c0_84 = arith.constant 0 : index
    %151 = vector.load %arg11[%c0_83, %c0_84] : memref<2x128xbf16, #tpu.memory_space<vmem>>, vector<2x128xbf16>
    tpu.vector_store %arg11[%c0_83, %c0_84], %149 {strides = array<i32>} : memref<2x128xbf16, #tpu.memory_space<vmem>>, vector<2x128xbf16>,
    %152 = arith.index_cast %c2_i32 : i32 to index
    %c0_85 = arith.constant 0 : index
    %c0_86 = arith.constant 0 : index
    %153 = vector.load %arg8[%152, %c0_85, %c0_86] : memref<8x2x128xbf16, #tpu.memory_space<vmem>>, vector<1x2x128xbf16>
    %154 = vector.shape_cast %153 : vector<1x2x128xbf16> to vector<2x128xbf16>
    %155 = vector.shape_cast %149 : vector<2x128xbf16> to vector<1x2x128xbf16>
    tpu.vector_store %arg8[%152, %c0_85, %c0_86], %155 {strides = array<i32>} : memref<8x2x128xbf16, #tpu.memory_space<vmem>>, vector<1x2x128xbf16>,
    %c3_i32 = arith.constant 3 : i32
    %c0_87 = arith.constant 0 : index
    %c0_88 = arith.constant 0 : index
    %156 = vector.load %arg11[%c0_87, %c0_88] : memref<2x128xbf16, #tpu.memory_space<vmem>>, vector<2x128xbf16>
    %c0_89 = arith.constant 0 : index
    %c0_90 = arith.constant 0 : index
    %157 = vector.load %arg12[%c0_89, %c0_90] : memref<2x128xf32, #tpu.memory_space<vmem>>, vector<2x128xf32>
    %158 = arith.index_cast %c3_i32 : i32 to index
    %c0_91 = arith.constant 0 : index
    %c0_92 = arith.constant 0 : index
    %159 = vector.load %arg2[%158, %c0_91, %c0_92] : memref<8x2x8xbf16, #tpu.memory_space<vmem>>, vector<1x2x8xbf16>
    %160 = vector.shape_cast %159 : vector<1x2x8xbf16> to vector<2x8xbf16>
    %c0_93 = arith.constant 0 : index
    %c0_94 = arith.constant 0 : index
    %161 = vector.load %arg9[%c0_93, %c0_94] : memref<8x512xbf16, #tpu.memory_space<vmem>>, vector<8x512xbf16>
    %cst_95 = arith.constant dense<0.000000e+00> : vector<2x512xf32>
    %162 = tpu.matmul %160, %161, %cst_95 {dimension_numbers = #tpu.dot_dimension_numbers<[1], [0], [0], [1], [0, 0, 1, 1], [], []>} : vector<2x8xbf16>, vector<8x512xbf16>, vector<2x512xf32> -> vector<2x512xf32>
    %c0_96 = arith.constant 0 : index
    %c0_97 = arith.constant 0 : index
    %163 = vector.load %arg10[%c0_96, %c0_97] : memref<128x512xbf16, #tpu.memory_space<vmem>>, vector<128x512xbf16>
    %cst_98 = arith.constant dense<0.000000e+00> : vector<2x512xf32>
    %164 = tpu.matmul %156, %163, %cst_98 {dimension_numbers = #tpu.dot_dimension_numbers<[1], [0], [0], [1], [0, 0, 1, 1], [], []>} : vector<2x128xbf16>, vector<128x512xbf16>, vector<2x512xf32> -> vector<2x512xf32>
    %165 = arith.addf %162, %164 : vector<2x512xf32>
    %c0_99 = arith.constant 0 : index
    %c0_100 = arith.constant 0 : index
    %166 = vector.load %arg5[%c0_99, %c0_100] : memref<1x512xf32, #tpu.memory_space<vmem>>, vector<1x512xf32>
    %167 = vector.broadcast %166 : vector<1x512xf32> to vector<2x512xf32>
    %168 = arith.addf %165, %167 : vector<2x512xf32>
    %169 = vector.extract_strided_slice %168 {offsets = [0, 0], sizes = [2, 128], strides = [1, 1]} : vector<2x512xf32> to vector<2x128xf32>
    %cst_101 = arith.constant 5.000000e-01 : f32
    %170 = vector.broadcast %cst_101 : f32 to vector<2x128xf32>
    %171 = arith.mulf %170, %169 : vector<2x128xf32>
    %172 = math.tanh %171 : vector<2x128xf32>
    %cst_102 = arith.constant 5.000000e-01 : f32
    %173 = vector.broadcast %cst_102 : f32 to vector<2x128xf32>
    %174 = arith.mulf %173, %172 : vector<2x128xf32>
    %cst_103 = arith.constant 5.000000e-01 : f32
    %175 = vector.broadcast %cst_103 : f32 to vector<2x128xf32>
    %176 = arith.addf %174, %175 : vector<2x128xf32>
    %177 = vector.extract_strided_slice %168 {offsets = [0, 128], sizes = [2, 128], strides = [1, 1]} : vector<2x512xf32> to vector<2x128xf32>
    %cst_104 = arith.constant 5.000000e-01 : f32
    %178 = vector.broadcast %cst_104 : f32 to vector<2x128xf32>
    %179 = arith.mulf %178, %177 : vector<2x128xf32>
    %180 = math.tanh %179 : vector<2x128xf32>
    %cst_105 = arith.constant 5.000000e-01 : f32
    %181 = vector.broadcast %cst_105 : f32 to vector<2x128xf32>
    %182 = arith.mulf %181, %180 : vector<2x128xf32>
    %cst_106 = arith.constant 5.000000e-01 : f32
    %183 = vector.broadcast %cst_106 : f32 to vector<2x128xf32>
    %184 = arith.addf %182, %183 : vector<2x128xf32>
    %185 = vector.extract_strided_slice %168 {offsets = [0, 256], sizes = [2, 128], strides = [1, 1]} : vector<2x512xf32> to vector<2x128xf32>
    %186 = math.tanh %185 : vector<2x128xf32>
    %187 = vector.extract_strided_slice %168 {offsets = [0, 384], sizes = [2, 128], strides = [1, 1]} : vector<2x512xf32> to vector<2x128xf32>
    %cst_107 = arith.constant 5.000000e-01 : f32
    %188 = vector.broadcast %cst_107 : f32 to vector<2x128xf32>
    %189 = arith.mulf %188, %187 : vector<2x128xf32>
    %190 = math.tanh %189 : vector<2x128xf32>
    %cst_108 = arith.constant 5.000000e-01 : f32
    %191 = vector.broadcast %cst_108 : f32 to vector<2x128xf32>
    %192 = arith.mulf %191, %190 : vector<2x128xf32>
    %cst_109 = arith.constant 5.000000e-01 : f32
    %193 = vector.broadcast %cst_109 : f32 to vector<2x128xf32>
    %194 = arith.addf %192, %193 : vector<2x128xf32>
    %195 = arith.mulf %184, %157 : vector<2x128xf32>
    %196 = arith.mulf %176, %186 : vector<2x128xf32>
    %197 = arith.addf %195, %196 : vector<2x128xf32>
    %198 = math.tanh %197 : vector<2x128xf32>
    %199 = arith.mulf %194, %198 : vector<2x128xf32>
    %200 = arith.truncf %199 : vector<2x128xf32> to vector<2x128xbf16>
    %c0_110 = arith.constant 0 : index
    %c0_111 = arith.constant 0 : index
    %201 = vector.load %arg12[%c0_110, %c0_111] : memref<2x128xf32, #tpu.memory_space<vmem>>, vector<2x128xf32>
    tpu.vector_store %arg12[%c0_110, %c0_111], %197 {strides = array<i32>} : memref<2x128xf32, #tpu.memory_space<vmem>>, vector<2x128xf32>,
    %c0_112 = arith.constant 0 : index
    %c0_113 = arith.constant 0 : index
    %202 = vector.load %arg11[%c0_112, %c0_113] : memref<2x128xbf16, #tpu.memory_space<vmem>>, vector<2x128xbf16>
    tpu.vector_store %arg11[%c0_112, %c0_113], %200 {strides = array<i32>} : memref<2x128xbf16, #tpu.memory_space<vmem>>, vector<2x128xbf16>,
    %203 = arith.index_cast %c3_i32 : i32 to index
    %c0_114 = arith.constant 0 : index
    %c0_115 = arith.constant 0 : index
    %204 = vector.load %arg8[%203, %c0_114, %c0_115] : memref<8x2x128xbf16, #tpu.memory_space<vmem>>, vector<1x2x128xbf16>
    %205 = vector.shape_cast %204 : vector<1x2x128xbf16> to vector<2x128xbf16>
    %206 = vector.shape_cast %200 : vector<2x128xbf16> to vector<1x2x128xbf16>
    tpu.vector_store %arg8[%203, %c0_114, %c0_115], %206 {strides = array<i32>} : memref<8x2x128xbf16, #tpu.memory_space<vmem>>, vector<1x2x128xbf16>,
    %c4_i32 = arith.constant 4 : i32
    %c0_116 = arith.constant 0 : index
    %c0_117 = arith.constant 0 : index
    %207 = vector.load %arg11[%c0_116, %c0_117] : memref<2x128xbf16, #tpu.memory_space<vmem>>, vector<2x128xbf16>
    %c0_118 = arith.constant 0 : index
    %c0_119 = arith.constant 0 : index
    %208 = vector.load %arg12[%c0_118, %c0_119] : memref<2x128xf32, #tpu.memory_space<vmem>>, vector<2x128xf32>
    %209 = arith.index_cast %c4_i32 : i32 to index
    %c0_120 = arith.constant 0 : index
    %c0_121 = arith.constant 0 : index
    %210 = vector.load %arg2[%209, %c0_120, %c0_121] : memref<8x2x8xbf16, #tpu.memory_space<vmem>>, vector<1x2x8xbf16>
    %211 = vector.shape_cast %210 : vector<1x2x8xbf16> to vector<2x8xbf16>
    %c0_122 = arith.constant 0 : index
    %c0_123 = arith.constant 0 : index
    %212 = vector.load %arg9[%c0_122, %c0_123] : memref<8x512xbf16, #tpu.memory_space<vmem>>, vector<8x512xbf16>
    %cst_124 = arith.constant dense<0.000000e+00> : vector<2x512xf32>
    %213 = tpu.matmul %211, %212, %cst_124 {dimension_numbers = #tpu.dot_dimension_numbers<[1], [0], [0], [1], [0, 0, 1, 1], [], []>} : vector<2x8xbf16>, vector<8x512xbf16>, vector<2x512xf32> -> vector<2x512xf32>
    %c0_125 = arith.constant 0 : index
    %c0_126 = arith.constant 0 : index
    %214 = vector.load %arg10[%c0_125, %c0_126] : memref<128x512xbf16, #tpu.memory_space<vmem>>, vector<128x512xbf16>
    %cst_127 = arith.constant dense<0.000000e+00> : vector<2x512xf32>
    %215 = tpu.matmul %207, %214, %cst_127 {dimension_numbers = #tpu.dot_dimension_numbers<[1], [0], [0], [1], [0, 0, 1, 1], [], []>} : vector<2x128xbf16>, vector<128x512xbf16>, vector<2x512xf32> -> vector<2x512xf32>
    %216 = arith.addf %213, %215 : vector<2x512xf32>
    %c0_128 = arith.constant 0 : index
    %c0_129 = arith.constant 0 : index
    %217 = vector.load %arg5[%c0_128, %c0_129] : memref<1x512xf32, #tpu.memory_space<vmem>>, vector<1x512xf32>
    %218 = vector.broadcast %217 : vector<1x512xf32> to vector<2x512xf32>
    %219 = arith.addf %216, %218 : vector<2x512xf32>
    %220 = vector.extract_strided_slice %219 {offsets = [0, 0], sizes = [2, 128], strides = [1, 1]} : vector<2x512xf32> to vector<2x128xf32>
    %cst_130 = arith.constant 5.000000e-01 : f32
    %221 = vector.broadcast %cst_130 : f32 to vector<2x128xf32>
    %222 = arith.mulf %221, %220 : vector<2x128xf32>
    %223 = math.tanh %222 : vector<2x128xf32>
    %cst_131 = arith.constant 5.000000e-01 : f32
    %224 = vector.broadcast %cst_131 : f32 to vector<2x128xf32>
    %225 = arith.mulf %224, %223 : vector<2x128xf32>
    %cst_132 = arith.constant 5.000000e-01 : f32
    %226 = vector.broadcast %cst_132 : f32 to vector<2x128xf32>
    %227 = arith.addf %225, %226 : vector<2x128xf32>
    %228 = vector.extract_strided_slice %219 {offsets = [0, 128], sizes = [2, 128], strides = [1, 1]} : vector<2x512xf32> to vector<2x128xf32>
    %cst_133 = arith.constant 5.000000e-01 : f32
    %229 = vector.broadcast %cst_133 : f32 to vector<2x128xf32>
    %230 = arith.mulf %229, %228 : vector<2x128xf32>
    %231 = math.tanh %230 : vector<2x128xf32>
    %cst_134 = arith.constant 5.000000e-01 : f32
    %232 = vector.broadcast %cst_134 : f32 to vector<2x128xf32>
    %233 = arith.mulf %232, %231 : vector<2x128xf32>
    %cst_135 = arith.constant 5.000000e-01 : f32
    %234 = vector.broadcast %cst_135 : f32 to vector<2x128xf32>
    %235 = arith.addf %233, %234 : vector<2x128xf32>
    %236 = vector.extract_strided_slice %219 {offsets = [0, 256], sizes = [2, 128], strides = [1, 1]} : vector<2x512xf32> to vector<2x128xf32>
    %237 = math.tanh %236 : vector<2x128xf32>
    %238 = vector.extract_strided_slice %219 {offsets = [0, 384], sizes = [2, 128], strides = [1, 1]} : vector<2x512xf32> to vector<2x128xf32>
    %cst_136 = arith.constant 5.000000e-01 : f32
    %239 = vector.broadcast %cst_136 : f32 to vector<2x128xf32>
    %240 = arith.mulf %239, %238 : vector<2x128xf32>
    %241 = math.tanh %240 : vector<2x128xf32>
    %cst_137 = arith.constant 5.000000e-01 : f32
    %242 = vector.broadcast %cst_137 : f32 to vector<2x128xf32>
    %243 = arith.mulf %242, %241 : vector<2x128xf32>
    %cst_138 = arith.constant 5.000000e-01 : f32
    %244 = vector.broadcast %cst_138 : f32 to vector<2x128xf32>
    %245 = arith.addf %243, %244 : vector<2x128xf32>
    %246 = arith.mulf %235, %208 : vector<2x128xf32>
    %247 = arith.mulf %227, %237 : vector<2x128xf32>
    %248 = arith.addf %246, %247 : vector<2x128xf32>
    %249 = math.tanh %248 : vector<2x128xf32>
    %250 = arith.mulf %245, %249 : vector<2x128xf32>
    %251 = arith.truncf %250 : vector<2x128xf32> to vector<2x128xbf16>
    %c0_139 = arith.constant 0 : index
    %c0_140 = arith.constant 0 : index
    %252 = vector.load %arg12[%c0_139, %c0_140] : memref<2x128xf32, #tpu.memory_space<vmem>>, vector<2x128xf32>
    tpu.vector_store %arg12[%c0_139, %c0_140], %248 {strides = array<i32>} : memref<2x128xf32, #tpu.memory_space<vmem>>, vector<2x128xf32>,
    %c0_141 = arith.constant 0 : index
    %c0_142 = arith.constant 0 : index
    %253 = vector.load %arg11[%c0_141, %c0_142] : memref<2x128xbf16, #tpu.memory_space<vmem>>, vector<2x128xbf16>
    tpu.vector_store %arg11[%c0_141, %c0_142], %251 {strides = array<i32>} : memref<2x128xbf16, #tpu.memory_space<vmem>>, vector<2x128xbf16>,
    %254 = arith.index_cast %c4_i32 : i32 to index
    %c0_143 = arith.constant 0 : index
    %c0_144 = arith.constant 0 : index
    %255 = vector.load %arg8[%254, %c0_143, %c0_144] : memref<8x2x128xbf16, #tpu.memory_space<vmem>>, vector<1x2x128xbf16>
    %256 = vector.shape_cast %255 : vector<1x2x128xbf16> to vector<2x128xbf16>
    %257 = vector.shape_cast %251 : vector<2x128xbf16> to vector<1x2x128xbf16>
    tpu.vector_store %arg8[%254, %c0_143, %c0_144], %257 {strides = array<i32>} : memref<8x2x128xbf16, #tpu.memory_space<vmem>>, vector<1x2x128xbf16>,
    %c5_i32 = arith.constant 5 : i32
    %c0_145 = arith.constant 0 : index
    %c0_146 = arith.constant 0 : index
    %258 = vector.load %arg11[%c0_145, %c0_146] : memref<2x128xbf16, #tpu.memory_space<vmem>>, vector<2x128xbf16>
    %c0_147 = arith.constant 0 : index
    %c0_148 = arith.constant 0 : index
    %259 = vector.load %arg12[%c0_147, %c0_148] : memref<2x128xf32, #tpu.memory_space<vmem>>, vector<2x128xf32>
    %260 = arith.index_cast %c5_i32 : i32 to index
    %c0_149 = arith.constant 0 : index
    %c0_150 = arith.constant 0 : index
    %261 = vector.load %arg2[%260, %c0_149, %c0_150] : memref<8x2x8xbf16, #tpu.memory_space<vmem>>, vector<1x2x8xbf16>
    %262 = vector.shape_cast %261 : vector<1x2x8xbf16> to vector<2x8xbf16>
    %c0_151 = arith.constant 0 : index
    %c0_152 = arith.constant 0 : index
    %263 = vector.load %arg9[%c0_151, %c0_152] : memref<8x512xbf16, #tpu.memory_space<vmem>>, vector<8x512xbf16>
    %cst_153 = arith.constant dense<0.000000e+00> : vector<2x512xf32>
    %264 = tpu.matmul %262, %263, %cst_153 {dimension_numbers = #tpu.dot_dimension_numbers<[1], [0], [0], [1], [0, 0, 1, 1], [], []>} : vector<2x8xbf16>, vector<8x512xbf16>, vector<2x512xf32> -> vector<2x512xf32>
    %c0_154 = arith.constant 0 : index
    %c0_155 = arith.constant 0 : index
    %265 = vector.load %arg10[%c0_154, %c0_155] : memref<128x512xbf16, #tpu.memory_space<vmem>>, vector<128x512xbf16>
    %cst_156 = arith.constant dense<0.000000e+00> : vector<2x512xf32>
    %266 = tpu.matmul %258, %265, %cst_156 {dimension_numbers = #tpu.dot_dimension_numbers<[1], [0], [0], [1], [0, 0, 1, 1], [], []>} : vector<2x128xbf16>, vector<128x512xbf16>, vector<2x512xf32> -> vector<2x512xf32>
    %267 = arith.addf %264, %266 : vector<2x512xf32>
    %c0_157 = arith.constant 0 : index
    %c0_158 = arith.constant 0 : index
    %268 = vector.load %arg5[%c0_157, %c0_158] : memref<1x512xf32, #tpu.memory_space<vmem>>, vector<1x512xf32>
    %269 = vector.broadcast %268 : vector<1x512xf32> to vector<2x512xf32>
    %270 = arith.addf %267, %269 : vector<2x512xf32>
    %271 = vector.extract_strided_slice %270 {offsets = [0, 0], sizes = [2, 128], strides = [1, 1]} : vector<2x512xf32> to vector<2x128xf32>
    %cst_159 = arith.constant 5.000000e-01 : f32
    %272 = vector.broadcast %cst_159 : f32 to vector<2x128xf32>
    %273 = arith.mulf %272, %271 : vector<2x128xf32>
    %274 = math.tanh %273 : vector<2x128xf32>
    %cst_160 = arith.constant 5.000000e-01 : f32
    %275 = vector.broadcast %cst_160 : f32 to vector<2x128xf32>
    %276 = arith.mulf %275, %274 : vector<2x128xf32>
    %cst_161 = arith.constant 5.000000e-01 : f32
    %277 = vector.broadcast %cst_161 : f32 to vector<2x128xf32>
    %278 = arith.addf %276, %277 : vector<2x128xf32>
    %279 = vector.extract_strided_slice %270 {offsets = [0, 128], sizes = [2, 128], strides = [1, 1]} : vector<2x512xf32> to vector<2x128xf32>
    %cst_162 = arith.constant 5.000000e-01 : f32
    %280 = vector.broadcast %cst_162 : f32 to vector<2x128xf32>
    %281 = arith.mulf %280, %279 : vector<2x128xf32>
    %282 = math.tanh %281 : vector<2x128xf32>
    %cst_163 = arith.constant 5.000000e-01 : f32
    %283 = vector.broadcast %cst_163 : f32 to vector<2x128xf32>
    %284 = arith.mulf %283, %282 : vector<2x128xf32>
    %cst_164 = arith.constant 5.000000e-01 : f32
    %285 = vector.broadcast %cst_164 : f32 to vector<2x128xf32>
    %286 = arith.addf %284, %285 : vector<2x128xf32>
    %287 = vector.extract_strided_slice %270 {offsets = [0, 256], sizes = [2, 128], strides = [1, 1]} : vector<2x512xf32> to vector<2x128xf32>
    %288 = math.tanh %287 : vector<2x128xf32>
    %289 = vector.extract_strided_slice %270 {offsets = [0, 384], sizes = [2, 128], strides = [1, 1]} : vector<2x512xf32> to vector<2x128xf32>
    %cst_165 = arith.constant 5.000000e-01 : f32
    %290 = vector.broadcast %cst_165 : f32 to vector<2x128xf32>
    %291 = arith.mulf %290, %289 : vector<2x128xf32>
    %292 = math.tanh %291 : vector<2x128xf32>
    %cst_166 = arith.constant 5.000000e-01 : f32
    %293 = vector.broadcast %cst_166 : f32 to vector<2x128xf32>
    %294 = arith.mulf %293, %292 : vector<2x128xf32>
    %cst_167 = arith.constant 5.000000e-01 : f32
    %295 = vector.broadcast %cst_167 : f32 to vector<2x128xf32>
    %296 = arith.addf %294, %295 : vector<2x128xf32>
    %297 = arith.mulf %286, %259 : vector<2x128xf32>
    %298 = arith.mulf %278, %288 : vector<2x128xf32>
    %299 = arith.addf %297, %298 : vector<2x128xf32>
    %300 = math.tanh %299 : vector<2x128xf32>
    %301 = arith.mulf %296, %300 : vector<2x128xf32>
    %302 = arith.truncf %301 : vector<2x128xf32> to vector<2x128xbf16>
    %c0_168 = arith.constant 0 : index
    %c0_169 = arith.constant 0 : index
    %303 = vector.load %arg12[%c0_168, %c0_169] : memref<2x128xf32, #tpu.memory_space<vmem>>, vector<2x128xf32>
    tpu.vector_store %arg12[%c0_168, %c0_169], %299 {strides = array<i32>} : memref<2x128xf32, #tpu.memory_space<vmem>>, vector<2x128xf32>,
    %c0_170 = arith.constant 0 : index
    %c0_171 = arith.constant 0 : index
    %304 = vector.load %arg11[%c0_170, %c0_171] : memref<2x128xbf16, #tpu.memory_space<vmem>>, vector<2x128xbf16>
    tpu.vector_store %arg11[%c0_170, %c0_171], %302 {strides = array<i32>} : memref<2x128xbf16, #tpu.memory_space<vmem>>, vector<2x128xbf16>,
    %305 = arith.index_cast %c5_i32 : i32 to index
    %c0_172 = arith.constant 0 : index
    %c0_173 = arith.constant 0 : index
    %306 = vector.load %arg8[%305, %c0_172, %c0_173] : memref<8x2x128xbf16, #tpu.memory_space<vmem>>, vector<1x2x128xbf16>
    %307 = vector.shape_cast %306 : vector<1x2x128xbf16> to vector<2x128xbf16>
    %308 = vector.shape_cast %302 : vector<2x128xbf16> to vector<1x2x128xbf16>
    tpu.vector_store %arg8[%305, %c0_172, %c0_173], %308 {strides = array<i32>} : memref<8x2x128xbf16, #tpu.memory_space<vmem>>, vector<1x2x128xbf16>,
    %c6_i32 = arith.constant 6 : i32
    %c0_174 = arith.constant 0 : index
    %c0_175 = arith.constant 0 : index
    %309 = vector.load %arg11[%c0_174, %c0_175] : memref<2x128xbf16, #tpu.memory_space<vmem>>, vector<2x128xbf16>
    %c0_176 = arith.constant 0 : index
    %c0_177 = arith.constant 0 : index
    %310 = vector.load %arg12[%c0_176, %c0_177] : memref<2x128xf32, #tpu.memory_space<vmem>>, vector<2x128xf32>
    %311 = arith.index_cast %c6_i32 : i32 to index
    %c0_178 = arith.constant 0 : index
    %c0_179 = arith.constant 0 : index
    %312 = vector.load %arg2[%311, %c0_178, %c0_179] : memref<8x2x8xbf16, #tpu.memory_space<vmem>>, vector<1x2x8xbf16>
    %313 = vector.shape_cast %312 : vector<1x2x8xbf16> to vector<2x8xbf16>
    %c0_180 = arith.constant 0 : index
    %c0_181 = arith.constant 0 : index
    %314 = vector.load %arg9[%c0_180, %c0_181] : memref<8x512xbf16, #tpu.memory_space<vmem>>, vector<8x512xbf16>
    %cst_182 = arith.constant dense<0.000000e+00> : vector<2x512xf32>
    %315 = tpu.matmul %313, %314, %cst_182 {dimension_numbers = #tpu.dot_dimension_numbers<[1], [0], [0], [1], [0, 0, 1, 1], [], []>} : vector<2x8xbf16>, vector<8x512xbf16>, vector<2x512xf32> -> vector<2x512xf32>
    %c0_183 = arith.constant 0 : index
    %c0_184 = arith.constant 0 : index
    %316 = vector.load %arg10[%c0_183, %c0_184] : memref<128x512xbf16, #tpu.memory_space<vmem>>, vector<128x512xbf16>
    %cst_185 = arith.constant dense<0.000000e+00> : vector<2x512xf32>
    %317 = tpu.matmul %309, %316, %cst_185 {dimension_numbers = #tpu.dot_dimension_numbers<[1], [0], [0], [1], [0, 0, 1, 1], [], []>} : vector<2x128xbf16>, vector<128x512xbf16>, vector<2x512xf32> -> vector<2x512xf32>
    %318 = arith.addf %315, %317 : vector<2x512xf32>
    %c0_186 = arith.constant 0 : index
    %c0_187 = arith.constant 0 : index
    %319 = vector.load %arg5[%c0_186, %c0_187] : memref<1x512xf32, #tpu.memory_space<vmem>>, vector<1x512xf32>
    %320 = vector.broadcast %319 : vector<1x512xf32> to vector<2x512xf32>
    %321 = arith.addf %318, %320 : vector<2x512xf32>
    %322 = vector.extract_strided_slice %321 {offsets = [0, 0], sizes = [2, 128], strides = [1, 1]} : vector<2x512xf32> to vector<2x128xf32>
    %cst_188 = arith.constant 5.000000e-01 : f32
    %323 = vector.broadcast %cst_188 : f32 to vector<2x128xf32>
    %324 = arith.mulf %323, %322 : vector<2x128xf32>
    %325 = math.tanh %324 : vector<2x128xf32>
    %cst_189 = arith.constant 5.000000e-01 : f32
    %326 = vector.broadcast %cst_189 : f32 to vector<2x128xf32>
    %327 = arith.mulf %326, %325 : vector<2x128xf32>
    %cst_190 = arith.constant 5.000000e-01 : f32
    %328 = vector.broadcast %cst_190 : f32 to vector<2x128xf32>
    %329 = arith.addf %327, %328 : vector<2x128xf32>
    %330 = vector.extract_strided_slice %321 {offsets = [0, 128], sizes = [2, 128], strides = [1, 1]} : vector<2x512xf32> to vector<2x128xf32>
    %cst_191 = arith.constant 5.000000e-01 : f32
    %331 = vector.broadcast %cst_191 : f32 to vector<2x128xf32>
    %332 = arith.mulf %331, %330 : vector<2x128xf32>
    %333 = math.tanh %332 : vector<2x128xf32>
    %cst_192 = arith.constant 5.000000e-01 : f32
    %334 = vector.broadcast %cst_192 : f32 to vector<2x128xf32>
    %335 = arith.mulf %334, %333 : vector<2x128xf32>
    %cst_193 = arith.constant 5.000000e-01 : f32
    %336 = vector.broadcast %cst_193 : f32 to vector<2x128xf32>
    %337 = arith.addf %335, %336 : vector<2x128xf32>
    %338 = vector.extract_strided_slice %321 {offsets = [0, 256], sizes = [2, 128], strides = [1, 1]} : vector<2x512xf32> to vector<2x128xf32>
    %339 = math.tanh %338 : vector<2x128xf32>
    %340 = vector.extract_strided_slice %321 {offsets = [0, 384], sizes = [2, 128], strides = [1, 1]} : vector<2x512xf32> to vector<2x128xf32>
    %cst_194 = arith.constant 5.000000e-01 : f32
    %341 = vector.broadcast %cst_194 : f32 to vector<2x128xf32>
    %342 = arith.mulf %341, %340 : vector<2x128xf32>
    %343 = math.tanh %342 : vector<2x128xf32>
    %cst_195 = arith.constant 5.000000e-01 : f32
    %344 = vector.broadcast %cst_195 : f32 to vector<2x128xf32>
    %345 = arith.mulf %344, %343 : vector<2x128xf32>
    %cst_196 = arith.constant 5.000000e-01 : f32
    %346 = vector.broadcast %cst_196 : f32 to vector<2x128xf32>
    %347 = arith.addf %345, %346 : vector<2x128xf32>
    %348 = arith.mulf %337, %310 : vector<2x128xf32>
    %349 = arith.mulf %329, %339 : vector<2x128xf32>
    %350 = arith.addf %348, %349 : vector<2x128xf32>
    %351 = math.tanh %350 : vector<2x128xf32>
    %352 = arith.mulf %347, %351 : vector<2x128xf32>
    %353 = arith.truncf %352 : vector<2x128xf32> to vector<2x128xbf16>
    %c0_197 = arith.constant 0 : index
    %c0_198 = arith.constant 0 : index
    %354 = vector.load %arg12[%c0_197, %c0_198] : memref<2x128xf32, #tpu.memory_space<vmem>>, vector<2x128xf32>
    tpu.vector_store %arg12[%c0_197, %c0_198], %350 {strides = array<i32>} : memref<2x128xf32, #tpu.memory_space<vmem>>, vector<2x128xf32>,
    %c0_199 = arith.constant 0 : index
    %c0_200 = arith.constant 0 : index
    %355 = vector.load %arg11[%c0_199, %c0_200] : memref<2x128xbf16, #tpu.memory_space<vmem>>, vector<2x128xbf16>
    tpu.vector_store %arg11[%c0_199, %c0_200], %353 {strides = array<i32>} : memref<2x128xbf16, #tpu.memory_space<vmem>>, vector<2x128xbf16>,
    %356 = arith.index_cast %c6_i32 : i32 to index
    %c0_201 = arith.constant 0 : index
    %c0_202 = arith.constant 0 : index
    %357 = vector.load %arg8[%356, %c0_201, %c0_202] : memref<8x2x128xbf16, #tpu.memory_space<vmem>>, vector<1x2x128xbf16>
    %358 = vector.shape_cast %357 : vector<1x2x128xbf16> to vector<2x128xbf16>
    %359 = vector.shape_cast %353 : vector<2x128xbf16> to vector<1x2x128xbf16>
    tpu.vector_store %arg8[%356, %c0_201, %c0_202], %359 {strides = array<i32>} : memref<8x2x128xbf16, #tpu.memory_space<vmem>>, vector<1x2x128xbf16>,
    %c7_i32 = arith.constant 7 : i32
    %c0_203 = arith.constant 0 : index
    %c0_204 = arith.constant 0 : index
    %360 = vector.load %arg11[%c0_203, %c0_204] : memref<2x128xbf16, #tpu.memory_space<vmem>>, vector<2x128xbf16>
    %c0_205 = arith.constant 0 : index
    %c0_206 = arith.constant 0 : index
    %361 = vector.load %arg12[%c0_205, %c0_206] : memref<2x128xf32, #tpu.memory_space<vmem>>, vector<2x128xf32>
    %362 = arith.index_cast %c7_i32 : i32 to index
    %c0_207 = arith.constant 0 : index
    %c0_208 = arith.constant 0 : index
    %363 = vector.load %arg2[%362, %c0_207, %c0_208] : memref<8x2x8xbf16, #tpu.memory_space<vmem>>, vector<1x2x8xbf16>
    %364 = vector.shape_cast %363 : vector<1x2x8xbf16> to vector<2x8xbf16>
    %c0_209 = arith.constant 0 : index
    %c0_210 = arith.constant 0 : index
    %365 = vector.load %arg9[%c0_209, %c0_210] : memref<8x512xbf16, #tpu.memory_space<vmem>>, vector<8x512xbf16>
    %cst_211 = arith.constant dense<0.000000e+00> : vector<2x512xf32>
    %366 = tpu.matmul %364, %365, %cst_211 {dimension_numbers = #tpu.dot_dimension_numbers<[1], [0], [0], [1], [0, 0, 1, 1], [], []>} : vector<2x8xbf16>, vector<8x512xbf16>, vector<2x512xf32> -> vector<2x512xf32>
    %c0_212 = arith.constant 0 : index
    %c0_213 = arith.constant 0 : index
    %367 = vector.load %arg10[%c0_212, %c0_213] : memref<128x512xbf16, #tpu.memory_space<vmem>>, vector<128x512xbf16>
    %cst_214 = arith.constant dense<0.000000e+00> : vector<2x512xf32>
    %368 = tpu.matmul %360, %367, %cst_214 {dimension_numbers = #tpu.dot_dimension_numbers<[1], [0], [0], [1], [0, 0, 1, 1], [], []>} : vector<2x128xbf16>, vector<128x512xbf16>, vector<2x512xf32> -> vector<2x512xf32>
    %369 = arith.addf %366, %368 : vector<2x512xf32>
    %c0_215 = arith.constant 0 : index
    %c0_216 = arith.constant 0 : index
    %370 = vector.load %arg5[%c0_215, %c0_216] : memref<1x512xf32, #tpu.memory_space<vmem>>, vector<1x512xf32>
    %371 = vector.broadcast %370 : vector<1x512xf32> to vector<2x512xf32>
    %372 = arith.addf %369, %371 : vector<2x512xf32>
    %373 = vector.extract_strided_slice %372 {offsets = [0, 0], sizes = [2, 128], strides = [1, 1]} : vector<2x512xf32> to vector<2x128xf32>
    %cst_217 = arith.constant 5.000000e-01 : f32
    %374 = vector.broadcast %cst_217 : f32 to vector<2x128xf32>
    %375 = arith.mulf %374, %373 : vector<2x128xf32>
    %376 = math.tanh %375 : vector<2x128xf32>
    %cst_218 = arith.constant 5.000000e-01 : f32
    %377 = vector.broadcast %cst_218 : f32 to vector<2x128xf32>
    %378 = arith.mulf %377, %376 : vector<2x128xf32>
    %cst_219 = arith.constant 5.000000e-01 : f32
    %379 = vector.broadcast %cst_219 : f32 to vector<2x128xf32>
    %380 = arith.addf %378, %379 : vector<2x128xf32>
    %381 = vector.extract_strided_slice %372 {offsets = [0, 128], sizes = [2, 128], strides = [1, 1]} : vector<2x512xf32> to vector<2x128xf32>
    %cst_220 = arith.constant 5.000000e-01 : f32
    %382 = vector.broadcast %cst_220 : f32 to vector<2x128xf32>
    %383 = arith.mulf %382, %381 : vector<2x128xf32>
    %384 = math.tanh %383 : vector<2x128xf32>
    %cst_221 = arith.constant 5.000000e-01 : f32
    %385 = vector.broadcast %cst_221 : f32 to vector<2x128xf32>
    %386 = arith.mulf %385, %384 : vector<2x128xf32>
    %cst_222 = arith.constant 5.000000e-01 : f32
    %387 = vector.broadcast %cst_222 : f32 to vector<2x128xf32>
    %388 = arith.addf %386, %387 : vector<2x128xf32>
    %389 = vector.extract_strided_slice %372 {offsets = [0, 256], sizes = [2, 128], strides = [1, 1]} : vector<2x512xf32> to vector<2x128xf32>
    %390 = math.tanh %389 : vector<2x128xf32>
    %391 = vector.extract_strided_slice %372 {offsets = [0, 384], sizes = [2, 128], strides = [1, 1]} : vector<2x512xf32> to vector<2x128xf32>
    %cst_223 = arith.constant 5.000000e-01 : f32
    %392 = vector.broadcast %cst_223 : f32 to vector<2x128xf32>
    %393 = arith.mulf %392, %391 : vector<2x128xf32>
    %394 = math.tanh %393 : vector<2x128xf32>
    %cst_224 = arith.constant 5.000000e-01 : f32
    %395 = vector.broadcast %cst_224 : f32 to vector<2x128xf32>
    %396 = arith.mulf %395, %394 : vector<2x128xf32>
    %cst_225 = arith.constant 5.000000e-01 : f32
    %397 = vector.broadcast %cst_225 : f32 to vector<2x128xf32>
    %398 = arith.addf %396, %397 : vector<2x128xf32>
    %399 = arith.mulf %388, %361 : vector<2x128xf32>
    %400 = arith.mulf %380, %390 : vector<2x128xf32>
    %401 = arith.addf %399, %400 : vector<2x128xf32>
    %402 = math.tanh %401 : vector<2x128xf32>
    %403 = arith.mulf %398, %402 : vector<2x128xf32>
    %404 = arith.truncf %403 : vector<2x128xf32> to vector<2x128xbf16>
    %c0_226 = arith.constant 0 : index
    %c0_227 = arith.constant 0 : index
    %405 = vector.load %arg12[%c0_226, %c0_227] : memref<2x128xf32, #tpu.memory_space<vmem>>, vector<2x128xf32>
    tpu.vector_store %arg12[%c0_226, %c0_227], %401 {strides = array<i32>} : memref<2x128xf32, #tpu.memory_space<vmem>>, vector<2x128xf32>,
    %c0_228 = arith.constant 0 : index
    %c0_229 = arith.constant 0 : index
    %406 = vector.load %arg11[%c0_228, %c0_229] : memref<2x128xbf16, #tpu.memory_space<vmem>>, vector<2x128xbf16>
    tpu.vector_store %arg11[%c0_228, %c0_229], %404 {strides = array<i32>} : memref<2x128xbf16, #tpu.memory_space<vmem>>, vector<2x128xbf16>,
    %407 = arith.index_cast %c7_i32 : i32 to index
    %c0_230 = arith.constant 0 : index
    %c0_231 = arith.constant 0 : index
    %408 = vector.load %arg8[%407, %c0_230, %c0_231] : memref<8x2x128xbf16, #tpu.memory_space<vmem>>, vector<1x2x128xbf16>
    %409 = vector.shape_cast %408 : vector<1x2x128xbf16> to vector<2x128xbf16>
    %410 = vector.shape_cast %404 : vector<2x128xbf16> to vector<1x2x128xbf16>
    tpu.vector_store %arg8[%407, %c0_230, %c0_231], %410 {strides = array<i32>} : memref<8x2x128xbf16, #tpu.memory_space<vmem>>, vector<1x2x128xbf16>,
    %c8_i32 = arith.constant 8 : i32
    return
  }
  func.func @transform_0(%arg0: i32, %arg1: i32) -> (i32, i32, i32) {
    %c0_i32 = arith.constant 0 : i32
    %c0_i32_0 = arith.constant 0 : i32
    return %arg1, %arg0, %c0_i32 : i32, i32, i32
  }
  func.func @transform_1(%arg0: i32, %arg1: i32) -> (i32, i32) {
    %c0_i32 = arith.constant 0 : i32
    %c0_i32_0 = arith.constant 0 : i32
    return %arg0, %c0_i32 : i32, i32
  }
  func.func @transform_2(%arg0: i32, %arg1: i32) -> (i32, i32) {
    %c0_i32 = arith.constant 0 : i32
    %c0_i32_0 = arith.constant 0 : i32
    return %arg0, %c0_i32 : i32, i32
  }
  func.func @transform_3(%arg0: i32, %arg1: i32) -> (i32, i32) {
    %c0_i32 = arith.constant 0 : i32
    %c0_i32_0 = arith.constant 0 : i32
    %c0_i32_1 = arith.constant 0 : i32
    return %c0_i32, %c0_i32_0 : i32, i32
  }
  func.func @transform_6(%arg0: i32, %arg1: i32) -> (i32, i32, i32) {
    %c0_i32 = arith.constant 0 : i32
    %c0_i32_0 = arith.constant 0 : i32
    return %arg1, %arg0, %c0_i32 : i32, i32, i32
  }
}

</mosaic_0001>

<bundles_post_ra>
// kernel: tpu_custom_call.1
= control target key start
LH: loop header
LB: loop body
LE: loop exit
PB: predicated region body
PF: predicated region fallthrough
CT: control target
= control target key end

     0   :  { %11 = vsyncpa [#allocation8], 0  ;;  %s4948_s0 = inlined_call_operand.hbm [shape: bf16[8,2,8], index: 0, kind: input, shape index: {}]   ;;  %s4949_s1 = inlined_call_operand.hbm [shape: f32[2,128], index: 1, kind: input, shape index: {}]   ;;  %s4950_s2 = inlined_call_operand.hbm [shape: f32[2,128], index: 2, kind: input, shape index: {}]   ;;  %s4951_s3 = inlined_call_operand.hbm [shape: f32[1,512], index: 3, kind: input, shape index: {}]   ;;  %s4952_s4 = inlined_call_operand.hbm [shape: bf16[8,512], index: 4, kind: input, shape index: {}]   ;;  %s4953_s5 = inlined_call_operand.hbm [shape: bf16[128,512], index: 5, kind: input, shape index: {}]   ;;  %s4954_s6 = inlined_call_operand.hbm [shape: bf16[8,2,128], index: 6, kind: output, shape index: {}]  }
   0x1   :  { %12 = vsyncpa [#allocation11], 0 }
   0x2   :  { %13 = vsyncpa [#allocation14], 0  ;;  %s33_s23 = sshll.u32 %s4949_s1, 4  ;;  %s34_s23 = int_to_ptr.hbm [resolvable:$true] %s33_s23 }
   0x3   :  { %14 = vsyncpa [#allocation9], 0  ;;  %s4651_s24 = smov [#allocation10]   ;;  %s19_s28 = sshll.u32 %s4948_s0, 4  ;;  %s20_s28 = int_to_ptr.hbm [resolvable:$true] %s19_s28 }
   0x4   :  { %s35_s25 = sshll.u32 %s4651_s24, 4  ;;  %s4652_s29 = smov [#allocation7]   ;;  %s36_s25 = int_to_ptr.vmem [resolvable:$true] %s35_s25 }
   0x5   :  { %38 = dma.hbm_to_vmem [thread:$0]  %s34_s23, 32, %s36_s25, [#allocation11]  }
   0x6   :  { %s21_s30 = sshll.u32 %s4652_s29, 4  ;;  %s4653_s7 = smov 16   ;;  %s22_s30 = int_to_ptr.vmem [resolvable:$true] %s21_s30 }
   0x7   :  { %s4654_s8 = smov 1   ;;  %s44_s10 = sshll.u32 %s4950_s2, 4  ;;  %s45_s10 = int_to_ptr.hbm [resolvable:$true] %s44_s10 }
   0x8   :  { %27 = dma.hbm_to_vmem [thread:$0]  %s20_s28, 128, %s22_s30, [#allocation8], %s4653_s7, %s4653_s7, %s4654_s8  }
   0x9   :  { %s4655_s11 = smov [#allocation12]   ;;  %s55_s14 = sshll.u32 %s4951_s3, 4  ;;  %s56_s14 = int_to_ptr.hbm [resolvable:$true] %s55_s14 }
   0xa   :  { %s46_s12 = sshll.u32 %s4655_s11, 4  ;;  %s4656_s15 = smov [#allocation13]   ;;  %s47_s12 = int_to_ptr.vmem [resolvable:$true] %s46_s12 }
   0xb   :  { %49 = dma.hbm_to_vmem [thread:$0]  %s45_s10, 32, %s47_s12, [#allocation11]  }
   0xc   :  { %s57_s16 = sshll.u32 %s4656_s15, 4  ;;  %s58_s16 = int_to_ptr.vmem [resolvable:$true] %s57_s16 }
   0xd   :  { %60 = dma.hbm_to_vmem [thread:$0]  %s56_s14, 64, %s58_s16, [#allocation14]  }
   0xe   :  { %4639 = dma.done.wait [#allocation8], 128  }
   0xf   :  { %4640 = vsyncadd [#allocation8], 4294967168 }
  0x10   :  { %4641 = dma.done.wait [#allocation11], 64  }
  0x11   :  { %4642 = vsyncadd [#allocation11], 4294967232 }
  0x12   :  { %4643 = dma.done.wait [#allocation14], 64  }
  0x13   :  { %4644 = vsyncadd [#allocation14], 4294967232  ;;  %s89_s18 = sshll.u32 %s4952_s4, 4  ;;  %s4657_s19 = smov [#allocation2]   ;;  %v109_v0 = vld [vmem:[#allocation10] sm:$0x3]  ;;  %s90_s18 = int_to_ptr.hbm [resolvable:$true] %s89_s18 }
  0x14   :  { %s91_s20 = sshll.u32 %s4657_s19, 4  ;;  %s103_s22 = sshll.u32 %s4953_s5, 4  ;;  %v112_v1 = vld [vmem:[#allocation12] sm:$0x3]  ;;  %v110_v2 = vpack.c.bf16 %v109_v0, %v109_v0  ;;  %s92_s20 = int_to_ptr.vmem [resolvable:$true] %s91_s20  ;;  %s104_s22 = int_to_ptr.hbm [resolvable:$true] %s103_s22 }
  0x15   :  { %94 = dma.hbm_to_vmem [thread:$0]  %s90_s18, 256, %s92_s20, [#allocation6]  ;;  %113 = vst [vmem:[#allocation5] sm:$0x3] %v112_v1 }
  0x16   :  { %s4658_s23 = smov [#allocation3]   ;;  %111 = vst [vmem:[#allocation4] sm:$0x1] %v110_v2 }
  0x17   :  { %s105_s24 = sshll.u32 %s4658_s23, 4  ;;  %s106_s24 = int_to_ptr.vmem [resolvable:$true] %s105_s24 }
  0x18   :  { %108 = dma.hbm_to_vmem [thread:$0]  %s104_s22, 4096, %s106_s24, [#allocation6 + $0x1] }
  0x19   :  { %4645 = dma.done.wait [#allocation6], 256 }
  0x1a   :  { %4646 = vsyncadd [#allocation6], 4294967040 }
  0x1b   :  { %4647 = dma.done.wait [#allocation6 + $0x1], 4096 }
  0x1c   :  { %4648 = vsyncadd [#allocation6 + $0x1], 4294963200  ;;  %v3182_v3 = vld [vmem:[#allocation3 + $0xe0] sm:$0xf]  ;;  %v4156_v4 = vld [vmem:[#allocation3 + $0xec] sm:$0xf0] }
  0x1d   :  { %v4154_v5 = vld [vmem:[#allocation3 + $0xe4] sm:$0xf]  ;;  %v3183_v6 = vor.u32 %v4156_v4, %v3182_v3  ;;  %v3184_v7 = vld [vmem:[#allocation3 + $0xf0] sm:$0xf0]  ;;  %v3190_v8 = vld [vmem:[#allocation3 + $0xe8] sm:$0xf] }
  0x1e   :  { %v4157_v9 = vld [vmem:[#allocation3 + $0xf4] sm:$0xf0]  ;;  %v3187_v10 = vor.u32 %v4154_v5, %v3184_v7  ;;  %v4155_v12 = vld [vmem:[#allocation3 + $0xec] sm:$0xf]  ;;  %v3192_v13 = vld [vmem:[#allocation3 + $0xf8] sm:$0xf0] }
  0x1f   :  { %v3191_v11 = vor.u32 %v4157_v9, %v3190_v8  ;;  %v3166_v14 = vld [vmem:[#allocation3 + $0xc0] sm:$0xf]  ;;  %319 = vmatpush.bf16.msra.mxu0 %v3183_v6  ;;  %v3195_v15 = vor.u32 %v4155_v12, %v3192_v13  ;;  %v4152_v16 = vld [vmem:[#allocation3 + $0xcc] sm:$0xf0]  ;;  %v4150_v17 = vld [vmem:[#allocation3 + $0xc4] sm:$0xf] }
  0x20   :  { %v3168_v18 = vld [vmem:[#allocation3 + $0xd0] sm:$0xf0]  ;;  %332 = vmatpush.bf16.msra.mxu1 %v3187_v10  ;;  %v3167_v19 = vor.u32 %v4152_v16, %v3166_v14  ;;  %v3174_v21 = vld [vmem:[#allocation3 + $0xc8] sm:$0xf]  ;;  %v4153_v22 = vld [vmem:[#allocation3 + $0xd4] sm:$0xf0] }
  0x21   :  { %345 = vmatpush.bf16.msra.mxu2 %v3191_v11  ;;  %v3171_v20 = vor.u32 %v4150_v17, %v3168_v18  ;;  %v4151_v23 = vld [vmem:[#allocation3 + $0xcc] sm:$0xf]  ;;  %358 = vmatpush.bf16.msra.mxu3 %v3195_v15  ;;  %v3175_v24 = vor.u32 %v4153_v22, %v3174_v21  ;;  %v3176_v25 = vld [vmem:[#allocation3 + $0xd8] sm:$0xf0]  ;;  %v3150_v26 = vld [vmem:[#allocation3 + $0xa0] sm:$0xf] }
  0x22   :  { %v4148_v27 = vld [vmem:[#allocation3 + $0xac] sm:$0xf0]  ;;  %v3179_v28 = vor.u32 %v4151_v23, %v3176_v25  ;;  %v4146_v29 = vld [vmem:[#allocation3 + $0xa4] sm:$0xf]  ;;  %v3152_v30 = vld [vmem:[#allocation3 + $0xb0] sm:$0xf0] }
  0x23   :  { %v3158_v31 = vld [vmem:[#allocation3 + $0xa8] sm:$0xf]  ;;  %320 = vmatpush.bf16.msra.mxu0 %v3167_v19  ;;  %v3151_v32 = vor.u32 %v4148_v27, %v3150_v26  ;;  %v4149_v33 = vld [vmem:[#allocation3 + $0xb4] sm:$0xf0]  ;;  %v4147_v34 = vld [vmem:[#allocation3 + $0xac] sm:$0xf]  ;;  %v3155_v36 = vor.u32 %v4146_v29, %v3152_v30 }
  0x24   :  { %v3160_v35 = vld [vmem:[#allocation3 + $0xb8] sm:$0xf0]  ;;  %333 = vmatpush.bf16.msra.mxu1 %v3171_v20  ;;  %v3159_v37 = vor.u32 %v4149_v33, %v3158_v31  ;;  %v3134_v38 = vld [vmem:[#allocation3 + $0x80] sm:$0xf]  ;;  %v4144_v39 = vld [vmem:[#allocation3 + $0x8c] sm:$0xf0] }
  0x25   :  { %346 = vmatpush.bf16.msra.mxu2 %v3175_v24  ;;  %v4142_v40 = vld [vmem:[#allocation3 + $0x84] sm:$0xf]  ;;  %359 = vmatpush.bf16.msra.mxu3 %v3179_v28  ;;  %v3163_v41 = vor.u32 %v4147_v34, %v3160_v35  ;;  %v3136_v42 = vld [vmem:[#allocation3 + $0x90] sm:$0xf0]  ;;  %v3142_v43 = vld [vmem:[#allocation3 + $0x88] sm:$0xf]  ;;  %v3135_v47 = vor.u32 %v4144_v39, %v3134_v38 }
  0x26   :  { %v4145_v44 = vld [vmem:[#allocation3 + $0x94] sm:$0xf0]  ;;  %v4143_v45 = vld [vmem:[#allocation3 + $0x8c] sm:$0xf]  ;;  %v3144_v46 = vld [vmem:[#allocation3 + $0x98] sm:$0xf0]  ;;  %v3139_v48 = vor.u32 %v4142_v40, %v3136_v42 }
  0x27   :  { %321 = vmatpush.bf16.msra.mxu0 %v3151_v32  ;;  %v3143_v49 = vor.u32 %v4145_v44, %v3142_v43  ;;  %v3118_v50 = vld [vmem:[#allocation3 + $0x60] sm:$0xf]  ;;  %v4140_v51 = vld [vmem:[#allocation3 + $0x6c] sm:$0xf0]  ;;  %v4138_v52 = vld [vmem:[#allocation3 + $0x64] sm:$0xf]  ;;  %v3147_v53 = vor.u32 %v4143_v45, %v3144_v46 }
  0x28   :  { %334 = vmatpush.bf16.msra.mxu1 %v3155_v36  ;;  %v3120_v54 = vld [vmem:[#allocation3 + $0x70] sm:$0xf0]  ;;  %v3126_v55 = vld [vmem:[#allocation3 + $0x68] sm:$0xf]  ;;  %v4141_v56 = vld [vmem:[#allocation3 + $0x74] sm:$0xf0]  ;;  %v3119_v59 = vor.u32 %v4140_v51, %v3118_v50 }
  0x29   :  { %347 = vmatpush.bf16.msra.mxu2 %v3159_v37  ;;  %360 = vmatpush.bf16.msra.mxu3 %v3163_v41  ;;  %v4139_v57 = vld [vmem:[#allocation3 + $0x6c] sm:$0xf]  ;;  %v3128_v58 = vld [vmem:[#allocation3 + $0x78] sm:$0xf0]  ;;  %v3123_v60 = vor.u32 %v4138_v52, %v3120_v54  ;;  %v3127_v61 = vor.u32 %v4141_v56, %v3126_v55  ;;  %v3102_v62 = vld [vmem:[#allocation3 + $0x40] sm:$0xf] }
  0x2a   :  { %v4136_v63 = vld [vmem:[#allocation3 + $0x4c] sm:$0xf0]  ;;  %v4134_v0 = vld [vmem:[#allocation3 + $0x44] sm:$0xf]  ;;  %v3131_v1 = vor.u32 %v4139_v57, %v3128_v58  ;;  %v3104_v2 = vld [vmem:[#allocation3 + $0x50] sm:$0xf0] }
  0x2b   :  { %322 = vmatpush.bf16.msra.mxu0 %v3135_v47  ;;  %v3110_v3 = vld [vmem:[#allocation3 + $0x48] sm:$0xf]  ;;  %v4137_v4 = vld [vmem:[#allocation3 + $0x54] sm:$0xf0]  ;;  %v4135_v5 = vld [vmem:[#allocation3 + $0x4c] sm:$0xf]  ;;  %v3103_v7 = vor.u32 %v4136_v63, %v3102_v62  ;;  %v3107_v9 = vor.u32 %v4134_v0, %v3104_v2 }
  0x2c   :  { %335 = vmatpush.bf16.msra.mxu1 %v3139_v48  ;;  %v3112_v6 = vld [vmem:[#allocation3 + $0x58] sm:$0xf0]  ;;  %v3086_v8 = vld [vmem:[#allocation3 + $0x20] sm:$0xf]  ;;  %v3111_v10 = vor.u32 %v4137_v4, %v3110_v3  ;;  %v4132_v11 = vld [vmem:[#allocation3 + $0x2c] sm:$0xf0] }
  0x2d   :  { %348 = vmatpush.bf16.msra.mxu2 %v3143_v49  ;;  %361 = vmatpush.bf16.msra.mxu3 %v3147_v53  ;;  %v4130_v12 = vld [vmem:[#allocation3 + $0x24] sm:$0xf]  ;;  %v3088_v13 = vld [vmem:[#allocation3 + $0x30] sm:$0xf0]  ;;  %v3115_v14 = vor.u32 %v4135_v5, %v3112_v6  ;;  %v3094_v15 = vld [vmem:[#allocation3 + $0x28] sm:$0xf]  ;;  %v3087_v22 = vor.u32 %v4132_v11, %v3086_v8 }
  0x2e   :  { %v4133_v16 = vld [vmem:[#allocation3 + $0x34] sm:$0xf0]  ;;  %v125_v17 = vld [vmem:[#allocation2] sm:$0xff]  ;;  %v4131_v18 = vld [vmem:[#allocation3 + $0x2c] sm:$0xf]  ;;  %v3091_v24 = vor.u32 %v4130_v12, %v3088_v13  ;;  %vm385_vm0 = vcmask 1043456  }
  0x2f   :  { %323 = vmatpush.bf16.msra.mxu0 %v3119_v59  ;;  %v3096_v19 = vld [vmem:[#allocation3 + $0x38] sm:$0xf0]  ;;  %v373_v20 = vunpack.c.l.b16 %v125_v17  ;;  %v374_v23 = vunpack.c.h.b16 %v125_v17  ;;  %v3095_v25 = vor.u32 %v4133_v16, %v3094_v15  ;;  %v3070_v26 = vld [vmem:[#allocation3] sm:$0xf]  ;;  %v4128_v27 = vld [vmem:[#allocation3 + $0xc] sm:$0xf0] }
  0x30   :  { %336 = vmatpush.bf16.msra.mxu1 %v3123_v60  ;;  %v126_v21 = vld [vmem:[#allocation2 + $0x8] sm:$0xff]  ;;  %v4126_v28 = vld [vmem:[#allocation3 + $0x4] sm:$0xf]  ;;  %v3099_v29 = vor.u32 %v4131_v18, %v3096_v19  ;;  %v3072_v30 = vld [vmem:[#allocation3 + $0x10] sm:$0xf0]  ;;  %v3071_v38 = vor.u32 %v4128_v27, %v3070_v26  ;;  %vm381_vm1 = vcmask 64512  }
  0x31   :  { %349 = vmatpush.bf16.msra.mxu2 %v3127_v61  ;;  %362 = vmatpush.bf16.msra.mxu3 %v3131_v1  ;;  %v3078_v31 = vld [vmem:[#allocation3 + $0x8] sm:$0xf]  ;;  %v4129_v32 = vld [vmem:[#allocation3 + $0x14] sm:$0xf0]  ;;  %v375_v33 = vunpack.c.l.b16 %v126_v21  ;;  %v4127_v34 = vld [vmem:[#allocation3 + $0xc] sm:$0xf]  ;;  %v377_v36 = vpack.c.b16 %v373_v20, %v373_v20  ;;  %v376_v37 = vunpack.c.h.b16 %v126_v21  ;;  %v378_v39 = vpack.c.b16 %v374_v23, %v374_v23 }
  0x32   :  { %v3080_v35 = vld [vmem:[#allocation3 + $0x18] sm:$0xf0]  ;;  %v3075_v40 = vor.u32 %v4126_v28, %v3072_v30  ;;  %v3079_v41 = vor.u32 %v4129_v32, %v3078_v31  ;;  %v122_v46 = vld [vmem:[#allocation4] sm:$0x1]  ;;  %v124_v50 = vld [vmem:[#allocation7] sm:$0x1] }
  0x33   :  { %324 = vmatpush.bf16.msra.mxu0 %v3103_v7  ;;  %v3083_v42 = vor.u32 %v4127_v34, %v3080_v35  ;;  %v379_v43 = vpack.c.b16 %v375_v33, %v375_v33  ;;  %v4717_v44 = vsel %vm385_vm0, %v377_v36, 0  ;;  %v380_v45 = vpack.c.b16 %v376_v37, %v376_v37  ;;  %v3314_v51 = vld [vmem:[#allocation3 + $0xe0] sm:$0xf]  ;;  %v4188_v52 = vld [vmem:[#allocation3 + $0xec] sm:$0xf0]  ;;  %s4659_s4 = smov [#allocation15]  }
  0x34   :  { %337 = vmatpush.bf16.msra.mxu1 %v3107_v9  ;;  %v4720_v47 = vsel %vm385_vm0, %v378_v39, 0  ;;  %v3315_v53 = vor.u32 %v4188_v52, %v3314_v51  ;;  %v4186_v54 = vld [vmem:[#allocation3 + $0xe4] sm:$0xf]  ;;  %v3316_v55 = vld [vmem:[#allocation3 + $0xf0] sm:$0xf0]  ;;  %s3038_s5 = sshll.u32 %s4659_s4, 4  ;;  %s3039_s5 = int_to_ptr.vmem [resolvable:$true] %s3038_s5 }
  0x35   :  { %350 = vmatpush.bf16.msra.mxu2 %v3111_v10  ;;  %363 = vmatpush.bf16.msra.mxu3 %v3115_v14  ;;  %v4724_v48 = vsel %vm385_vm0, %v379_v43, 0  ;;  %v4728_v49 = vsel %vm385_vm0, %v380_v45, 0  ;;  %v3322_v56 = vld [vmem:[#allocation3 + $0xe8] sm:$0xf]  ;;  %v3319_v57 = vor.u32 %v4186_v54, %v3316_v55  ;;  %v4189_v58 = vld [vmem:[#allocation3 + $0xf4] sm:$0xf0] }
  0x36   :  { %v4187_v59 = vld [vmem:[#allocation3 + $0xec] sm:$0xf]  ;;  %v3324_v60 = vld [vmem:[#allocation3 + $0xf8] sm:$0xf0]  ;;  %v3323_v61 = vor.u32 %v4189_v58, %v3322_v56  ;;  %v3298_v63 = vld [vmem:[#allocation3 + $0xc0] sm:$0xf] }
  0x37   :  { %325 = vmatpush.bf16.msra.mxu0 %v3087_v22  ;;  %v3327_v62 = vor.u32 %v4187_v59, %v3324_v60  ;;  %v4184_v0 = vld [vmem:[#allocation3 + $0xcc] sm:$0xf0]  ;;  %v4182_v1 = vld [vmem:[#allocation3 + $0xc4] sm:$0xf]  ;;  %v3300_v3 = vld [vmem:[#allocation3 + $0xd0] sm:$0xf0] }
  0x38   :  { %338 = vmatpush.bf16.msra.mxu1 %v3091_v24  ;;  %v3299_v2 = vor.u32 %v4184_v0, %v3298_v63  ;;  %v3306_v4 = vld [vmem:[#allocation3 + $0xc8] sm:$0xf]  ;;  %v4185_v5 = vld [vmem:[#allocation3 + $0xd4] sm:$0xf0]  ;;  %v3303_v6 = vor.u32 %v4182_v1, %v3300_v3  ;;  %v4183_v8 = vld [vmem:[#allocation3 + $0xcc] sm:$0xf] }
  0x39   :  { %351 = vmatpush.bf16.msra.mxu2 %v3095_v25  ;;  %364 = vmatpush.bf16.msra.mxu3 %v3099_v29  ;;  %v3307_v7 = vor.u32 %v4185_v5, %v3306_v4  ;;  %v3308_v9 = vld [vmem:[#allocation3 + $0xd8] sm:$0xf0]  ;;  %v3282_v13 = vld [vmem:[#allocation3 + $0xa0] sm:$0xf]  ;;  %v4180_v14 = vld [vmem:[#allocation3 + $0xac] sm:$0xf0] }
  0x3a   :  { %v3311_v11 = vor.u32 %v4183_v8, %v3308_v9  ;;  %v4178_v15 = vld [vmem:[#allocation3 + $0xa4] sm:$0xf]  ;;  %v3283_v16 = vor.u32 %v4180_v14, %v3282_v13  ;;  %v3284_v17 = vld [vmem:[#allocation3 + $0xb0] sm:$0xf0]  ;;  %v3290_v18 = vld [vmem:[#allocation3 + $0xa8] sm:$0xf] }
  0x3b   :  { %326 = vmatpush.bf16.msra.mxu0 %v3071_v38  ;;  %v4181_v19 = vld [vmem:[#allocation3 + $0xb4] sm:$0xf0]  ;;  %v3287_v20 = vor.u32 %v4178_v15, %v3284_v17  ;;  %v4179_v22 = vld [vmem:[#allocation3 + $0xac] sm:$0xf]  ;;  %v3292_v23 = vld [vmem:[#allocation3 + $0xb8] sm:$0xf0] }
  0x3c   :  { %339 = vmatpush.bf16.msra.mxu1 %v3075_v40  ;;  %v3291_v21 = vor.u32 %v4181_v19, %v3290_v18  ;;  %v3295_v24 = vor.u32 %v4179_v22, %v3292_v23  ;;  %v3266_v25 = vld [vmem:[#allocation3 + $0x80] sm:$0xf]  ;;  %v4176_v26 = vld [vmem:[#allocation3 + $0x8c] sm:$0xf0]  ;;  %v4174_v27 = vld [vmem:[#allocation3 + $0x84] sm:$0xf] }
  0x3d   :  { %352 = vmatpush.bf16.msra.mxu2 %v3079_v41  ;;  %365 = vmatpush.bf16.msra.mxu3 %v3083_v42  ;;  %v3267_v28 = vor.u32 %v4176_v26, %v3266_v25  ;;  %v3268_v29 = vld [vmem:[#allocation3 + $0x90] sm:$0xf0]  ;;  %v3274_v30 = vld [vmem:[#allocation3 + $0x88] sm:$0xf]  ;;  %v4177_v31 = vld [vmem:[#allocation3 + $0x94] sm:$0xf0] }
  0x3e   :  { %327 = vmatmul.bf16.vlgmr.msra.gmra.mxu0 %v122_v46  ;;  %v3271_v33 = vor.u32 %v4174_v27, %v3268_v29  ;;  %v3275_v34 = vor.u32 %v4177_v31, %v3274_v30  ;;  %v4175_v35 = vld [vmem:[#allocation3 + $0x8c] sm:$0xf]  ;;  %v3276_v36 = vld [vmem:[#allocation3 + $0x98] sm:$0xf0]  ;;  %v3250_v41 = vld [vmem:[#allocation3 + $0x60] sm:$0xf] }
  0x3f   :  { %405 = vmatpush.bf16.msrb.mxu0 %v4717_v44  ;;  %340 = vmatmul.bf16.vlgmr.msra.gmra.mxu1 %v122_v46  ;;  %v3279_v39 = vor.u32 %v4175_v35, %v3276_v36  ;;  %v4172_v42 = vld [vmem:[#allocation3 + $0x6c] sm:$0xf0]  ;;  %v4170_v43 = vld [vmem:[#allocation3 + $0x64] sm:$0xf]  ;;  %v4173_v51 = vld [vmem:[#allocation3 + $0x74] sm:$0xf0] }
  0x40   :  { %418 = vmatpush.bf16.msrb.mxu1 %v4720_v47  ;;  %353 = vmatmul.bf16.vlgmr.msra.gmra.mxu2 %v122_v46  ;;  %v3251_v45 = vor.u32 %v4172_v42, %v3250_v41  ;;  %v4171_v54 = vld [vmem:[#allocation3 + $0x6c] sm:$0xf]  ;;  %v3260_v55 = vld [vmem:[#allocation3 + $0x78] sm:$0xf0]  ;;  %v3234_v58 = vld [vmem:[#allocation3 + $0x40] sm:$0xf] }
  0x41   :  { %366 = vmatmul.bf16.vlgmr.msra.gmra.mxu3 %v122_v46  ;;  %431 = vmatpush.bf16.msrb.mxu2 %v4724_v48  ;;  %v3252_v46 = vld [vmem:[#allocation3 + $0x70] sm:$0xf0]  ;;  %v4744_v56 = vld [vmem:[#allocation13] sm:$0xf]  ;;  %v4166_v60 = vld [vmem:[#allocation3 + $0x44] sm:$0xf] }
  0x42   :  { %444 = vmatpush.bf16.msrb.mxu3 %v4728_v49  ;;  %v3255_v52 = vor.u32 %v4170_v43, %v3252_v46  ;;  %v4168_v59 = vld [vmem:[#allocation3 + $0x4c] sm:$0xf0]  ;;  %v3242_v63 = vld [vmem:[#allocation3 + $0x48] sm:$0xf]  ;;  %v4169_v0 = vld [vmem:[#allocation3 + $0x54] sm:$0xf0] }
  0x43   :  { %684 = vmatpush.bf16.msra.mxu0 %v3315_v53  ;;  %v3243_v4 = vor.u32 %v4169_v0, %v3242_v63  ;;  %v4167_v5 = vld [vmem:[#allocation3 + $0x4c] sm:$0xf]  ;;  %v453_v9 = vperm.slane %v4744_v56, 1  ;;  %v3218_v15 = vld [vmem:[#allocation3 + $0x20] sm:$0xf]  ;;  %v455_v46 = vperm.slane %v4744_v56, 3 }
  0x44   :  { %697 = vmatpush.bf16.msra.mxu1 %v3319_v57  ;;  %v3263_v57 = vor.u32 %v4171_v54, %v3260_v55  ;;  %v4162_v17 = vld [vmem:[#allocation3 + $0x24] sm:$0xf]  ;;  %v4165_v22 = vld [vmem:[#allocation3 + $0x34] sm:$0xf0]  ;;  %v4163_v26 = vld [vmem:[#allocation3 + $0x2c] sm:$0xf] }
  0x45   :  { %710 = vmatpush.bf16.msra.mxu2 %v3323_v61  ;;  %v3235_v61 = vor.u32 %v4168_v59, %v3234_v58  ;;  %v3228_v27 = vld [vmem:[#allocation3 + $0x38] sm:$0xf0]  ;;  %v4160_v30 = vld [vmem:[#allocation3 + $0xc] sm:$0xf0]  ;;  %v4158_v31 = vld [vmem:[#allocation3 + $0x4] sm:$0xf] }
  0x46   :  { %723 = vmatpush.bf16.msra.mxu3 %v3327_v62  ;;  %v3236_v62 = vld [vmem:[#allocation3 + $0x50] sm:$0xf0]  ;;  %v3231_v29 = vor.u32 %v4163_v26, %v3228_v27  ;;  %v3210_v36 = vld [vmem:[#allocation3 + $0x8] sm:$0xf]  ;;  %v4159_v42 = vld [vmem:[#allocation3 + $0xc] sm:$0xf] }
  0x47   :  { %685 = vmatpush.bf16.msra.mxu0 %v3299_v2  ;;  %v452_v2 = vperm.slane %v4744_v56, 0  ;;  %v3239_v3 = vor.u32 %v4166_v60, %v3236_v62  ;;  %v3212_v43 = vld [vmem:[#allocation3 + $0x18] sm:$0xf0]  ;;  %v123_v63 = vld [vmem:[#allocation5] sm:$0x3]  ;;  %s3040_s27 = sshll.u32 %s4954_s6, 4  ;;  %s3041_s27 = int_to_ptr.hbm [resolvable:$true] %s3040_s27 }
  0x48   :  { %698 = vmatpush.bf16.msra.mxu1 %v3303_v6  ;;  %v3244_v6 = vld [vmem:[#allocation3 + $0x58] sm:$0xf0] }
  0x49   :  { %711 = vmatpush.bf16.msra.mxu2 %v3307_v7  ;;  %v3456_v26 = vld [vmem:[#allocation3 + $0xf8] sm:$0xf0] }
  0x4a   :  { %724 = vmatpush.bf16.msra.mxu3 %v3311_v11  ;;  %v3247_v11 = vor.u32 %v4167_v5, %v3244_v6 }
  0x4b   :  { %686 = vmatpush.bf16.msra.mxu0 %v3283_v16  ;;  %v4164_v16 = vld [vmem:[#allocation3 + $0x2c] sm:$0xf0] }
  0x4c   :  { %699 = vmatpush.bf16.msra.mxu1 %v3287_v20  ;;  %v3219_v19 = vor.u32 %v4164_v16, %v3218_v15  ;;  %v3220_v20 = vld [vmem:[#allocation3 + $0x30] sm:$0xf0]  ;;  %v489_v15 = vld [vmem:[#allocation7 + $0x1] sm:$0x1]  ;;  %v3446_v16 = vld [vmem:[#allocation3 + $0xe0] sm:$0xf] }
  0x4d   :  { %712 = vmatpush.bf16.msra.mxu2 %v3291_v21  ;;  %v3226_v21 = vld [vmem:[#allocation3 + $0x28] sm:$0xf] }
  0x4e   :  { %3196 = vmatmul.msk.bf16.vlgmr.msrb.gmra.mxu0 %vm381_vm1, %v124_v50  ;;  %725 = vmatpush.bf16.msra.mxu3 %v3295_v24  ;;  %v3223_v24 = vor.u32 %v4162_v17, %v3220_v20  ;;  %v3227_v25 = vor.u32 %v4165_v22, %v3226_v21  ;;  %v4220_v17 = vld [vmem:[#allocation3 + $0xec] sm:$0xf0]  ;;  %v3448_v20 = vld [vmem:[#allocation3 + $0xf0] sm:$0xf0]  ;;  %v3454_v21 = vld [vmem:[#allocation3 + $0xe8] sm:$0xf] }
  0x4f   :  { %3197 = vmatmul.msk.bf16.vlgmr.msrb.gmra.mxu1 %vm381_vm1, %v124_v50  ;;  %687 = vmatpush.bf16.msra.mxu0 %v3267_v28  ;;  %v3202_v28 = vld [vmem:[#allocation3] sm:$0xf]  ;;  %v4221_v22 = vld [vmem:[#allocation3 + $0xf4] sm:$0xf0] }
  0x50   :  { %3198 = vmatmul.msk.bf16.vlgmr.msrb.gmra.mxu2 %vm381_vm1, %v124_v50  ;;  %700 = vmatpush.bf16.msra.mxu1 %v3271_v33  ;;  %v3204_v33 = vld [vmem:[#allocation3 + $0x10] sm:$0xf0] }
  0x51   :  { %3199 = vmatmul.msk.bf16.vlgmr.msrb.gmra.mxu3 %vm381_vm1, %v124_v50  ;;  %713 = vmatpush.bf16.msra.mxu2 %v3275_v34  ;;  %v3258_v50 = vld [vmem:[#allocation3 + $0x68] sm:$0xf]  ;;  %v3207_v35 = vor.u32 %v4158_v31, %v3204_v33  ;;  %v3432_v31 = vld [vmem:[#allocation3 + $0xd0] sm:$0xf0] }
  0x52   :  { %726 = vmatpush.bf16.msra.mxu3 %v3279_v39  ;;  %v3259_v53 = vor.u32 %v4173_v51, %v3258_v50  ;;  %v3215_v50 = vor.u32 %v4159_v42, %v3212_v43  ;;  %v3438_v33 = vld [vmem:[#allocation3 + $0xc8] sm:$0xf]  ;;  %v3414_v42 = vld [vmem:[#allocation3 + $0xa0] sm:$0xf]  ;;  %v4212_v43 = vld [vmem:[#allocation3 + $0xac] sm:$0xf0] }
  0x53   :  { %688 = vmatpush.bf16.msra.mxu0 %v3251_v45 }
  0x54   :  { %701 = vmatpush.bf16.msra.mxu1 %v3255_v52 }
  0x55   :  { %714 = vmatpush.bf16.msra.mxu2 %v3259_v53 }
  0x56   :  { %727 = vmatpush.bf16.msra.mxu3 %v3263_v57 }
  0x57   :  { %689 = vmatpush.bf16.msra.mxu0 %v3235_v61 }
  0x58   :  { %702 = vmatpush.bf16.msra.mxu1 %v3239_v3 }
  0x59   :  { %715 = vmatpush.bf16.msra.mxu2 %v3243_v4 }
  0x5a   :  { %728 = vmatpush.bf16.msra.mxu3 %v3247_v11 }
  0x5b   :  { %690 = vmatpush.bf16.msra.mxu0 %v3219_v19  ;;  %v3447_v19 = vor.u32 %v4220_v17, %v3446_v16  ;;  %v4205_v16 = vld [vmem:[#allocation3 + $0x74] sm:$0xf0] }
  0x5c   :  { %703 = vmatpush.bf16.msra.mxu1 %v3223_v24  ;;  %v3455_v24 = vor.u32 %v4221_v22, %v3454_v21  ;;  %v4770_v21 = vld [vmem:[#allocation13] sm:$0xf] }
  0x5d   :  { %716 = vmatpush.bf16.msra.mxu2 %v3227_v25  ;;  %v4219_v25 = vld [vmem:[#allocation3 + $0xec] sm:$0xf] }
  0x5e   :  { %729 = vmatpush.bf16.msra.mxu3 %v3231_v29  ;;  %v3459_v27 = vor.u32 %v4219_v25, %v3456_v26  ;;  %v4214_v29 = vld [vmem:[#allocation3 + $0xc4] sm:$0xf] }
  0x5f   :  { %v4198_v25 = vld [vmem:[#allocation3 + $0x44] sm:$0xf] }
  0x60   :  { %704 = vmatpush.bf16.msra.mxu1 %v3207_v35 }
  0x62   :  { %730 = vmatpush.bf16.msra.mxu3 %v3215_v50  ;;  %v3416_v50 = vld [vmem:[#allocation3 + $0xb0] sm:$0xf0] }
  0x64   :  { %781 = vmatpush.bf16.msrb.mxu1 %v4720_v47 }
  0x66   :  { %807 = vmatpush.bf16.msrb.mxu3 %v4728_v49 }
  0xbb   :  { %v4736_v10 = vpop.f32.mrf.mxu0 }
  0xbc   :  { %v4738_v12 = vpop.f32.mrf.mxu1 }
  0xc3   :  { %v4740_v32 = vpop.f32.mrf.mxu2  ;;  %v330_v38 = vpop.f32.mrf.mxu0 }
  0xc4   :  { %v4742_v37 = vpop.f32.mrf.mxu3  ;;  %v343_v40 = vpop.f32.mrf.mxu1  ;;  %v4161_v38 = vld [vmem:[#allocation3 + $0x14] sm:$0xf0] }
  0xc5   :  { %v454_v40 = vperm.slane %v4744_v56, 2  ;;  %v3211_v41 = vor.u32 %v4161_v38, %v3210_v36  ;;  %v4215_v36 = vld [vmem:[#allocation3 + $0xcc] sm:$0xf]  ;;  %v3440_v38 = vld [vmem:[#allocation3 + $0xd8] sm:$0xf0] }
  0xc7   :  { %717 = vmatpush.bf16.msra.mxu2 %v3211_v41  ;;  %v3443_v41 = vor.u32 %v4215_v36, %v3440_v38  ;;  %v3376_v36 = vld [vmem:[#allocation3 + $0x58] sm:$0xf0] }
  0xcb   :  { %v356_v1 = vpop.f32.mrf.mxu2  ;;  %v407_v8 = vpop.f32.mrf.mxu0  ;;  %794 = vmatpush.bf16.msrb.mxu2 %v4724_v48 }
  0xcc   :  { %v369_v7 = vpop.f32.mrf.mxu3  ;;  %v408_v13 = vadd.f32 %v407_v8, %v4736_v10  ;;  %v420_v14 = vpop.f32.mrf.mxu1 }
  0xcd   :  { %v421_v18 = vadd.f32 %v420_v14, %v4738_v12  ;;  %v3203_v12 = vor.u32 %v4160_v30, %v3202_v28  ;;  %v3430_v28 = vld [vmem:[#allocation3 + $0xc0] sm:$0xf] }
  0xce   :  { %v460_v23 = vadd.f32 %v452_v2, %v408_v13 }
  0xcf   :  { %v461_v10 = vadd.f32 %v453_v9, %v421_v18  ;;  %691 = vmatpush.bf16.msra.mxu0 %v3203_v12  ;;  %v4218_v18 = vld [vmem:[#allocation3 + $0xe4] sm:$0xf]  ;;  %v3435_v12 = vor.u32 %v4214_v29, %v3432_v31  ;;  %v815_v31 = vperm.slane %v4770_v21, 0 }
  0xd0   :  { %v464_v34 = vmul.f32 0.5, %v460_v23  ;;  %v3451_v23 = vor.u32 %v4218_v18, %v3448_v20  ;;  %v3392_v20 = vld [vmem:[#allocation3 + $0x78] sm:$0xf0] }
  0xd1   :  { %v468_v39 = vmul.f32 0.5, %v461_v10  ;;  %v4216_v10 = vld [vmem:[#allocation3 + $0xcc] sm:$0xf0] }
  0xd2   :  { %4391 = vtanh.f32 %v464_v34  ;;  %v3431_v30 = vor.u32 %v4216_v10, %v3430_v28  ;;  %v4217_v34 = vld [vmem:[#allocation3 + $0xd4] sm:$0xf0]  ;;  %v3374_v28 = vld [vmem:[#allocation3 + $0x48] sm:$0xf] }
  0xd3   :  { %v433_v45 = vpop.f32.mrf.mxu2  ;;  %4393 = vtanh.f32 %v468_v39  ;;  %v409_v53 = vpop.f32.mrf.mxu0  ;;  %768 = vmatpush.bf16.msrb.mxu0 %v4717_v44  ;;  %v3439_v35 = vor.u32 %v4217_v34, %v3438_v33  ;;  %v4201_v10 = vld [vmem:[#allocation3 + $0x54] sm:$0xf0]  ;;  %v816_v33 = vperm.slane %v4770_v21, 1 }
  0xd4   :  { %v434_v51 = vadd.f32 %v433_v45, %v4740_v32  ;;  %v446_v52 = vpop.f32.mrf.mxu3  ;;  %v422_v55 = vpop.f32.mrf.mxu1  ;;  %v4210_v45 = vld [vmem:[#allocation3 + $0xa4] sm:$0xf] }
  0xd5   :  { %v447_v54 = vadd.f32 %v446_v52, %v4742_v37  ;;  %v4213_v52 = vld [vmem:[#allocation3 + $0xb4] sm:$0xf0]  ;;  %v3419_v53 = vor.u32 %v4210_v45, %v3416_v50  ;;  %v4211_v55 = vld [vmem:[#allocation3 + $0xac] sm:$0xf]  ;;  %v4196_v50 = vld [vmem:[#allocation3 + $0x2c] sm:$0xf0] }
  0xd6   :  { %v462_v57 = vadd.f32 %v454_v40, %v434_v51  ;;  %v3422_v51 = vld [vmem:[#allocation3 + $0xa8] sm:$0xf] }
  0xd7   :  { %v463_v58 = vadd.f32 %v455_v46, %v447_v54  ;;  %v3415_v46 = vor.u32 %v4212_v43, %v3414_v42  ;;  %v3423_v54 = vor.u32 %v4213_v52, %v3422_v51  ;;  %v4194_v51 = vld [vmem:[#allocation3 + $0x24] sm:$0xf] }
  0xd8   :  { %4395 = vtanh.f32 %v462_v57  ;;  %v4392_v32 = vpop.eup %4391  ;;  %v3424_v57 = vld [vmem:[#allocation3 + $0xb8] sm:$0xf0] }
  0xd9   :  { %v473_v56 = vmul.f32 0.5, %v463_v58  ;;  %v4394_v59 = vpop.eup %4393  ;;  %v466_v60 = vmul.f32 0.5, %v4392_v32  ;;  %v3427_v58 = vor.u32 %v4211_v55, %v3424_v57  ;;  %v3398_v32 = vld [vmem:[#allocation3 + $0x80] sm:$0xf]  ;;  %v4197_v55 = vld [vmem:[#allocation3 + $0x34] sm:$0xf0] }
  0xda   :  { %v470_v37 = vmul.f32 0.5, %v4394_v59  ;;  %v4206_v59 = vld [vmem:[#allocation3 + $0x84] sm:$0xf] }
  0xdb   :  { %4397 = vtanh.f32 %v473_v56  ;;  %v435_v61 = vpop.f32.mrf.mxu2  ;;  %v467_v62 = vadd.f32 0.5, %v466_v60  ;;  %v4208_v56 = vld [vmem:[#allocation3 + $0x8c] sm:$0xf0] }
  0xdc   :  { %v448_v0 = vpop.f32.mrf.mxu3  ;;  %v471_v1 = vadd.f32 0.5, %v470_v37  ;;  %v3399_v60 = vor.u32 %v4208_v56, %v3398_v32  ;;  %v3400_v37 = vld [vmem:[#allocation3 + $0x90] sm:$0xf0]  ;;  %v3406_v61 = vld [vmem:[#allocation3 + $0x88] sm:$0xf] }
  0xde   :  { %v4396_v2 = vpop.eup %4395  ;;  %v477_v3 = vmul.f32 %v471_v1, %v123_v63  ;;  %v3403_v1 = vor.u32 %v4206_v59, %v3400_v37  ;;  %v4195_v59 = vld [vmem:[#allocation3 + $0x2c] sm:$0xf]  ;;  %v3334_v37 = vld [vmem:[#allocation3] sm:$0xf] }
  0xdf   :  { %v478_v4 = vmul.f32 %v4396_v2, %v467_v62  ;;  %v4209_v62 = vld [vmem:[#allocation3 + $0x94] sm:$0xf0] }
  0xe0   :  { %v3407_v2 = vor.u32 %v4209_v62, %v3406_v61  ;;  %v4190_v61 = vld [vmem:[#allocation3 + $0x4] sm:$0xf]  ;;  %v3336_v62 = vld [vmem:[#allocation3 + $0x10] sm:$0xf0] }
  0xe1   :  { %v4398_v5 = vpop.eup %4397  ;;  %v479_v6 = vadd.f32 %v478_v4, %v477_v3  ;;  %v4207_v3 = vld [vmem:[#allocation3 + $0x8c] sm:$0xf]  ;;  %v3408_v4 = vld [vmem:[#allocation3 + $0x98] sm:$0xf0] }
  0xe2   :  { %v475_v7 = vmul.f32 0.5, %v4398_v5 }
  0xe3   :  { %4399 = vtanh.f32 %v479_v6  ;;  %483 = vst [vmem:[#allocation5] sm:$0x3] %v479_v6 }
  0xe4   :  { %v476_v8 = vadd.f32 0.5, %v475_v7  ;;  %v3411_v7 = vor.u32 %v4207_v3, %v3408_v4  ;;  %v3339_v4 = vor.u32 %v4190_v61, %v3336_v62  ;;  %v4247_v62 = vld [vmem:[#allocation3 + $0xcc] sm:$0xf] }
  0xe9   :  { %v4400_v9 = vpop.eup %4399 }
  0xea   :  { %v481_v11 = vmul.f32 %v4400_v9, %v476_v8  ;;  %v3382_v8 = vld [vmem:[#allocation3 + $0x60] sm:$0xf]  ;;  %v4204_v9 = vld [vmem:[#allocation3 + $0x6c] sm:$0xf0] }
  0xec   :  { %v482_v13 = vpack.c.bf16 %v481_v11, %v481_v11  ;;  %v4202_v11 = vld [vmem:[#allocation3 + $0x64] sm:$0xf] }
  0xee   :  { %484 = vst [vmem:[#allocation4] sm:$0x1] %v482_v13 }
  0xef   :  { %485 = vst [vmem:[#allocation15] sm:$0x1] %v482_v13  ;;  %v3383_v13 = vor.u32 %v4204_v9, %v3382_v8  ;;  %v818_v8 = vperm.slane %v4770_v21, 3 }
  0xf5   :  { %v486_v14 = vld [vmem:[#allocation4] sm:$0x1] }
  0xf6   :  { %692 = vmatmul.bf16.vlgmr.msra.gmra.mxu0 %v486_v14  ;;  %705 = vmatmul.bf16.vlgmr.msra.gmra.mxu1 %v486_v14 }
  0xf7   :  { %718 = vmatmul.bf16.vlgmr.msra.gmra.mxu2 %v486_v14  ;;  %731 = vmatmul.bf16.vlgmr.msra.gmra.mxu3 %v486_v14  ;;  %v3384_v14 = vld [vmem:[#allocation3 + $0x70] sm:$0xf0] }
  0xf8   :  { %1048 = vmatpush.bf16.msra.mxu0 %v3447_v19  ;;  %1061 = vmatpush.bf16.msra.mxu1 %v3451_v23  ;;  %v3387_v17 = vor.u32 %v4202_v11, %v3384_v14  ;;  %v4203_v19 = vld [vmem:[#allocation3 + $0x6c] sm:$0xf]  ;;  %v3366_v23 = vld [vmem:[#allocation3 + $0x40] sm:$0xf] }
  0xf9   :  { %1074 = vmatpush.bf16.msra.mxu2 %v3455_v24  ;;  %1087 = vmatpush.bf16.msra.mxu3 %v3459_v27  ;;  %v3395_v22 = vor.u32 %v4203_v19, %v3392_v20  ;;  %v4200_v24 = vld [vmem:[#allocation3 + $0x4c] sm:$0xf0]  ;;  %v3368_v27 = vld [vmem:[#allocation3 + $0x50] sm:$0xf0]  ;;  %v4191_v11 = vld [vmem:[#allocation3 + $0xc] sm:$0xf] }
  0xfa   :  { %v3367_v26 = vor.u32 %v4200_v24, %v3366_v23  ;;  %v3371_v34 = vor.u32 %v4198_v25, %v3368_v27 }
  0xfc   :  { %1049 = vmatpush.bf16.msra.mxu0 %v3431_v30  ;;  %1062 = vmatpush.bf16.msra.mxu1 %v3435_v12  ;;  %v3375_v12 = vor.u32 %v4201_v10, %v3374_v28 }
  0xfd   :  { %1075 = vmatpush.bf16.msra.mxu2 %v3439_v35  ;;  %1088 = vmatpush.bf16.msra.mxu3 %v3443_v41  ;;  %v4199_v35 = vld [vmem:[#allocation3 + $0x4c] sm:$0xf] }
  0xfe   :  { %v3379_v42 = vor.u32 %v4199_v35, %v3376_v36 }
 0x100   :  { %1050 = vmatpush.bf16.msra.mxu0 %v3415_v46  ;;  %1063 = vmatpush.bf16.msra.mxu1 %v3419_v53  ;;  %v3350_v46 = vld [vmem:[#allocation3 + $0x20] sm:$0xf]  ;;  %v3352_v53 = vld [vmem:[#allocation3 + $0x30] sm:$0xf0] }
 0x101   :  { %1076 = vmatpush.bf16.msra.mxu2 %v3423_v54  ;;  %1089 = vmatpush.bf16.msra.mxu3 %v3427_v58  ;;  %v3351_v52 = vor.u32 %v4196_v50, %v3350_v46  ;;  %v3358_v54 = vld [vmem:[#allocation3 + $0x28] sm:$0xf]  ;;  %v3355_v32 = vor.u32 %v4194_v51, %v3352_v53  ;;  %v3580_v46 = vld [vmem:[#allocation3 + $0xf0] sm:$0xf0]  ;;  %v4253_v51 = vld [vmem:[#allocation3 + $0xf4] sm:$0xf0] }
 0x102   :  { %v3359_v56 = vor.u32 %v4197_v55, %v3358_v54  ;;  %v3586_v50 = vld [vmem:[#allocation3 + $0xe8] sm:$0xf]  ;;  %v4251_v54 = vld [vmem:[#allocation3 + $0xec] sm:$0xf]  ;;  %v3588_v55 = vld [vmem:[#allocation3 + $0xf8] sm:$0xf0] }
 0x103   :  { %v3587_v53 = vor.u32 %v4253_v51, %v3586_v50  ;;  %v4230_v50 = vld [vmem:[#allocation3 + $0x44] sm:$0xf] }
 0x104   :  { %1051 = vmatpush.bf16.msra.mxu0 %v3399_v60  ;;  %1064 = vmatpush.bf16.msra.mxu1 %v3403_v1  ;;  %v3360_v60 = vld [vmem:[#allocation3 + $0x38] sm:$0xf0] }
 0x105   :  { %1077 = vmatpush.bf16.msra.mxu2 %v3407_v2  ;;  %1090 = vmatpush.bf16.msra.mxu3 %v3411_v7  ;;  %v817_v7 = vperm.slane %v4770_v21, 2 }
 0x106   :  { %3328 = vmatmul.msk.bf16.vlgmr.msrb.gmra.mxu0 %vm381_vm1, %v489_v15  ;;  %3329 = vmatmul.msk.bf16.vlgmr.msrb.gmra.mxu1 %vm381_vm1, %v489_v15 }
 0x107   :  { %3330 = vmatmul.msk.bf16.vlgmr.msrb.gmra.mxu2 %vm381_vm1, %v489_v15  ;;  %3331 = vmatmul.msk.bf16.vlgmr.msrb.gmra.mxu3 %vm381_vm1, %v489_v15  ;;  %v3390_v15 = vld [vmem:[#allocation3 + $0x68] sm:$0xf] }
 0x108   :  { %v3391_v18 = vor.u32 %v4205_v16, %v3390_v15  ;;  %1052 = vmatpush.bf16.msra.mxu0 %v3383_v13  ;;  %1065 = vmatpush.bf16.msra.mxu1 %v3387_v17  ;;  %v3344_v13 = vld [vmem:[#allocation3 + $0x18] sm:$0xf0] }
 0x109   :  { %1091 = vmatpush.bf16.msra.mxu3 %v3395_v22  ;;  %v3347_v16 = vor.u32 %v4191_v11, %v3344_v13  ;;  %v3554_v11 = vld [vmem:[#allocation3 + $0xa8] sm:$0xf]  ;;  %v4245_v13 = vld [vmem:[#allocation3 + $0xb4] sm:$0xf0] }
 0x10a   :  { %1078 = vmatpush.bf16.msra.mxu2 %v3391_v18 }
 0x10c   :  { %1053 = vmatpush.bf16.msra.mxu0 %v3367_v26  ;;  %1066 = vmatpush.bf16.msra.mxu1 %v3371_v34 }
 0x10d   :  { %1092 = vmatpush.bf16.msra.mxu3 %v3379_v42  ;;  %v4252_v42 = vld [vmem:[#allocation3 + $0xec] sm:$0xf0] }
 0x10e   :  { %1079 = vmatpush.bf16.msra.mxu2 %v3375_v12 }
 0x110   :  { %1054 = vmatpush.bf16.msra.mxu0 %v3351_v52  ;;  %1067 = vmatpush.bf16.msra.mxu1 %v3355_v32  ;;  %v4248_v32 = vld [vmem:[#allocation3 + $0xcc] sm:$0xf0] }
 0x112   :  { %1080 = vmatpush.bf16.msra.mxu2 %v3359_v56  ;;  %v4246_v56 = vld [vmem:[#allocation3 + $0xc4] sm:$0xf] }
 0x114   :  { %1068 = vmatpush.bf16.msra.mxu1 %v3339_v4 }
 0x118   :  { %1145 = vmatpush.bf16.msrb.mxu1 %v4720_v47 }
 0x173   :  { %v4762_v39 = vpop.f32.mrf.mxu0  ;;  %v4764_v40 = vpop.f32.mrf.mxu1 }
 0x17a   :  { %v4766_v63 = vpop.f32.mrf.mxu2  ;;  %v4768_v0 = vpop.f32.mrf.mxu3 }
 0x17b   :  { %v695_v5 = vpop.f32.mrf.mxu0  ;;  %v708_v6 = vpop.f32.mrf.mxu1 }
 0x17c   :  { %v3342_v5 = vld [vmem:[#allocation3 + $0x8] sm:$0xf]  ;;  %v4193_v6 = vld [vmem:[#allocation3 + $0x14] sm:$0xf0] }
 0x17d   :  { %v3343_v9 = vor.u32 %v4193_v6, %v3342_v5  ;;  %v3546_v5 = vld [vmem:[#allocation3 + $0xa0] sm:$0xf]  ;;  %v4244_v6 = vld [vmem:[#allocation3 + $0xac] sm:$0xf0] }
 0x17f   :  { %1081 = vmatpush.bf16.msra.mxu2 %v3343_v9  ;;  %v3548_v9 = vld [vmem:[#allocation3 + $0xb0] sm:$0xf0] }
 0x182   :  { %v721_v29 = vpop.f32.mrf.mxu2  ;;  %v734_v30 = vpop.f32.mrf.mxu3 }
 0x183   :  { %v770_v38 = vpop.f32.mrf.mxu0  ;;  %v783_v41 = vpop.f32.mrf.mxu1  ;;  %1158 = vmatpush.bf16.msrb.mxu2 %v4724_v48  ;;  %v487_v30 = vld [vmem:[#allocation5] sm:$0x3] }
 0x184   :  { %v771_v43 = vadd.f32 %v770_v38, %v4762_v39  ;;  %v784_v45 = vadd.f32 %v783_v41, %v4764_v40  ;;  %v3363_v39 = vor.u32 %v4195_v59, %v3360_v60  ;;  %v4192_v40 = vld [vmem:[#allocation3 + $0xc] sm:$0xf0]  ;;  %v853_v38 = vld [vmem:[#allocation7 + $0x2] sm:$0x1]  ;;  %v3578_v41 = vld [vmem:[#allocation3 + $0xe0] sm:$0xf] }
 0x185   :  { %v3335_v3 = vor.u32 %v4192_v40, %v3334_v37  ;;  %v3564_v60 = vld [vmem:[#allocation3 + $0xd0] sm:$0xf0]  ;;  %v3570_v37 = vld [vmem:[#allocation3 + $0xc8] sm:$0xf] }
 0x186   :  { %v823_v57 = vadd.f32 %v815_v31, %v771_v43  ;;  %v824_v58 = vadd.f32 %v816_v33, %v784_v45  ;;  %1093 = vmatpush.bf16.msra.mxu3 %v3363_v39  ;;  %v4250_v43 = vld [vmem:[#allocation3 + $0xe4] sm:$0xf]  ;;  %v3579_v45 = vor.u32 %v4252_v42, %v3578_v41  ;;  %v4249_v39 = vld [vmem:[#allocation3 + $0xd4] sm:$0xf0]  ;;  %v3567_v40 = vor.u32 %v4246_v56, %v3564_v60  ;;  %v3524_v41 = vld [vmem:[#allocation3 + $0x78] sm:$0xf0] }
 0x187   :  { %1055 = vmatpush.bf16.msra.mxu0 %v3335_v3  ;;  %v3583_v52 = vor.u32 %v4250_v43, %v3580_v46  ;;  %v3571_v61 = vor.u32 %v4249_v39, %v3570_v37  ;;  %v4796_v42 = vld [vmem:[#allocation13] sm:$0xf]  ;;  %v3508_v37 = vld [vmem:[#allocation3 + $0x58] sm:$0xf0] }
 0x188   :  { %v827_v1 = vmul.f32 0.5, %v823_v57  ;;  %v831_v2 = vmul.f32 0.5, %v824_v58  ;;  %v3591_v57 = vor.u32 %v4251_v54, %v3588_v55  ;;  %v3562_v58 = vld [vmem:[#allocation3 + $0xc0] sm:$0xf]  ;;  %v4232_v46 = vld [vmem:[#allocation3 + $0x4c] sm:$0xf0] }
 0x189   :  { %v3563_v59 = vor.u32 %v4248_v32, %v3562_v58  ;;  %v4233_v54 = vld [vmem:[#allocation3 + $0x54] sm:$0xf0]  ;;  %v1179_v58 = vperm.slane %v4796_v42, 0  ;;  %v1180_v32 = vperm.slane %v4796_v42, 1  ;;  %v4231_v60 = vld [vmem:[#allocation3 + $0x4c] sm:$0xf] }
 0x18a   :  { %4401 = vtanh.f32 %v827_v1  ;;  %v796_v14 = vpop.f32.mrf.mxu2  ;;  %v809_v15 = vpop.f32.mrf.mxu3  ;;  %1094 = vmatpush.bf16.msra.mxu3 %v3347_v16  ;;  %v3572_v1 = vld [vmem:[#allocation3 + $0xd8] sm:$0xf0]  ;;  %v4243_v16 = vld [vmem:[#allocation3 + $0xac] sm:$0xf] }
 0x18b   :  { %4403 = vtanh.f32 %v831_v2  ;;  %v797_v17 = vadd.f32 %v796_v14, %v4766_v63  ;;  %v810_v18 = vadd.f32 %v809_v15, %v4768_v0  ;;  %v772_v19 = vpop.f32.mrf.mxu0  ;;  %v785_v20 = vpop.f32.mrf.mxu1  ;;  %1132 = vmatpush.bf16.msrb.mxu0 %v4717_v44  ;;  %v3575_v4 = vor.u32 %v4247_v62, %v3572_v1 }
 0x18c   :  { %v3555_v15 = vor.u32 %v4245_v13, %v3554_v11  ;;  %v3530_v19 = vld [vmem:[#allocation3 + $0x80] sm:$0xf]  ;;  %v4240_v20 = vld [vmem:[#allocation3 + $0x8c] sm:$0xf0]  ;;  %v4229_v11 = vld [vmem:[#allocation3 + $0x34] sm:$0xf0] }
 0x18d   :  { %v825_v22 = vadd.f32 %v817_v7, %v797_v17  ;;  %v826_v21 = vadd.f32 %v818_v8, %v810_v18  ;;  %v4242_v7 = vld [vmem:[#allocation3 + $0xa4] sm:$0xf]  ;;  %v3547_v8 = vor.u32 %v4244_v6, %v3546_v5  ;;  %v3556_v17 = vld [vmem:[#allocation3 + $0xb8] sm:$0xf0]  ;;  %v4228_v5 = vld [vmem:[#allocation3 + $0x2c] sm:$0xf0] }
 0x18e   :  { %1171 = vmatpush.bf16.msrb.mxu3 %v4728_v49  ;;  %v3551_v14 = vor.u32 %v4242_v7, %v3548_v9  ;;  %v3559_v18 = vor.u32 %v4243_v16, %v3556_v17  ;;  %v4226_v6 = vld [vmem:[#allocation3 + $0x24] sm:$0xf]  ;;  %v3490_v9 = vld [vmem:[#allocation3 + $0x28] sm:$0xf]  ;;  %v4227_v17 = vld [vmem:[#allocation3 + $0x2c] sm:$0xf] }
 0x18f   :  { %4405 = vtanh.f32 %v825_v22  ;;  %v836_v23 = vmul.f32 0.5, %v826_v21  ;;  %v4238_v22 = vld [vmem:[#allocation3 + $0x84] sm:$0xf]  ;;  %v3531_v21 = vor.u32 %v4240_v20, %v3530_v19  ;;  %v3491_v16 = vor.u32 %v4229_v11, %v3490_v9  ;;  %v3466_v19 = vld [vmem:[#allocation3] sm:$0xf] }
 0x190   :  { %v4402_v63 = vpop.eup %4401  ;;  %v4222_v20 = vld [vmem:[#allocation3 + $0x4] sm:$0xf] }
 0x191   :  { %v4404_v0 = vpop.eup %4403  ;;  %v829_v24 = vmul.f32 0.5, %v4402_v63  ;;  %4407 = vtanh.f32 %v836_v23  ;;  %v3532_v23 = vld [vmem:[#allocation3 + $0x90] sm:$0xf0]  ;;  %v3538_v63 = vld [vmem:[#allocation3 + $0x88] sm:$0xf] }
 0x192   :  { %v833_v25 = vmul.f32 0.5, %v4404_v0  ;;  %v798_v26 = vpop.f32.mrf.mxu2  ;;  %v811_v27 = vpop.f32.mrf.mxu3  ;;  %v4241_v0 = vld [vmem:[#allocation3 + $0x94] sm:$0xf0] }
 0x193   :  { %v830_v28 = vadd.f32 0.5, %v829_v24  ;;  %v3535_v26 = vor.u32 %v4238_v22, %v3532_v23  ;;  %v3539_v27 = vor.u32 %v4241_v0, %v3538_v63  ;;  %v3468_v22 = vld [vmem:[#allocation3 + $0x10] sm:$0xf0] }
 0x194   :  { %v834_v10 = vadd.f32 0.5, %v833_v25  ;;  %v3471_v0 = vor.u32 %v4222_v20, %v3468_v22  ;;  %v4285_v20 = vld [vmem:[#allocation3 + $0xf4] sm:$0xf0] }
 0x195   :  { %v4406_v29 = vpop.eup %4405 }
 0x196   :  { %v840_v44 = vmul.f32 %v834_v10, %v487_v30  ;;  %v841_v31 = vmul.f32 %v4406_v29, %v830_v28  ;;  %v4239_v28 = vld [vmem:[#allocation3 + $0x8c] sm:$0xf]  ;;  %v3540_v10 = vld [vmem:[#allocation3 + $0x98] sm:$0xf0] }
 0x197   :  { %v4408_v47 = vpop.eup %4407 }
 0x198   :  { %v842_v33 = vadd.f32 %v841_v31, %v840_v44  ;;  %v838_v48 = vmul.f32 0.5, %v4408_v47  ;;  %v3543_v44 = vor.u32 %v4239_v28, %v3540_v10  ;;  %v3514_v31 = vld [vmem:[#allocation3 + $0x60] sm:$0xf]  ;;  %v4236_v47 = vld [vmem:[#allocation3 + $0x6c] sm:$0xf0]  ;;  %v1181_v28 = vperm.slane %v4796_v42, 2 }
 0x199   :  { %v1182_v10 = vperm.slane %v4796_v42, 3 }
 0x19a   :  { %4409 = vtanh.f32 %v842_v33  ;;  %846 = vst [vmem:[#allocation5] sm:$0x3] %v842_v33  ;;  %v839_v34 = vadd.f32 0.5, %v838_v48  ;;  %v4234_v33 = vld [vmem:[#allocation3 + $0x64] sm:$0xf]  ;;  %v3515_v48 = vor.u32 %v4236_v47, %v3514_v31 }
 0x1a0   :  { %v4410_v49 = vpop.eup %4409 }
 0x1a1   :  { %v844_v12 = vmul.f32 %v4410_v49, %v839_v34  ;;  %v3516_v34 = vld [vmem:[#allocation3 + $0x70] sm:$0xf0]  ;;  %v3522_v49 = vld [vmem:[#allocation3 + $0x68] sm:$0xf] }
 0x1a3   :  { %v845_v35 = vpack.c.bf16 %v844_v12, %v844_v12  ;;  %v4237_v12 = vld [vmem:[#allocation3 + $0x74] sm:$0xf0] }
 0x1a5   :  { %847 = vst [vmem:[#allocation4] sm:$0x1] %v845_v35 }
 0x1a6   :  { %849 = vst [vmem:[#allocation15 + $0x1] sm:$0x1] %v845_v35  ;;  %v3519_v35 = vor.u32 %v4234_v33, %v3516_v34 }
 0x1ac   :  { %v850_v36 = vld [vmem:[#allocation4] sm:$0x1] }
 0x1ad   :  { %1056 = vmatmul.bf16.vlgmr.msra.gmra.mxu0 %v850_v36  ;;  %1069 = vmatmul.bf16.vlgmr.msra.gmra.mxu1 %v850_v36 }
 0x1ae   :  { %1082 = vmatmul.bf16.vlgmr.msra.gmra.mxu2 %v850_v36  ;;  %1095 = vmatmul.bf16.vlgmr.msra.gmra.mxu3 %v850_v36  ;;  %v3523_v36 = vor.u32 %v4237_v12, %v3522_v49 }
 0x1af   :  { %1412 = vmatpush.bf16.msra.mxu0 %v3579_v45  ;;  %1425 = vmatpush.bf16.msra.mxu1 %v3583_v52  ;;  %v3498_v45 = vld [vmem:[#allocation3 + $0x40] sm:$0xf]  ;;  %v3500_v52 = vld [vmem:[#allocation3 + $0x50] sm:$0xf0] }
 0x1b0   :  { %1438 = vmatpush.bf16.msra.mxu2 %v3587_v53  ;;  %1451 = vmatpush.bf16.msra.mxu3 %v3591_v57  ;;  %v3499_v51 = vor.u32 %v4232_v46, %v3498_v45  ;;  %v3506_v53 = vld [vmem:[#allocation3 + $0x48] sm:$0xf]  ;;  %v3503_v56 = vor.u32 %v4230_v50, %v3500_v52 }
 0x1b3   :  { %1413 = vmatpush.bf16.msra.mxu0 %v3563_v59  ;;  %1426 = vmatpush.bf16.msra.mxu1 %v3567_v40  ;;  %v3507_v59 = vor.u32 %v4233_v54, %v3506_v53 }
 0x1b4   :  { %1439 = vmatpush.bf16.msra.mxu2 %v3571_v61  ;;  %1452 = vmatpush.bf16.msra.mxu3 %v3575_v4  ;;  %v3511_v61 = vor.u32 %v4231_v60, %v3508_v37  ;;  %v3482_v4 = vld [vmem:[#allocation3 + $0x20] sm:$0xf] }
 0x1b5   :  { %v3483_v7 = vor.u32 %v4228_v5, %v3482_v4 }
 0x1b7   :  { %1414 = vmatpush.bf16.msra.mxu0 %v3547_v8  ;;  %1427 = vmatpush.bf16.msra.mxu1 %v3551_v14  ;;  %v3484_v8 = vld [vmem:[#allocation3 + $0x30] sm:$0xf0] }
 0x1b8   :  { %1440 = vmatpush.bf16.msra.mxu2 %v3555_v15  ;;  %1453 = vmatpush.bf16.msra.mxu3 %v3559_v18  ;;  %v3487_v15 = vor.u32 %v4226_v6, %v3484_v8  ;;  %v3492_v18 = vld [vmem:[#allocation3 + $0x38] sm:$0xf0] }
 0x1bb   :  { %1415 = vmatpush.bf16.msra.mxu0 %v3531_v21  ;;  %1428 = vmatpush.bf16.msra.mxu1 %v3535_v26  ;;  %v3474_v26 = vld [vmem:[#allocation3 + $0x8] sm:$0xf] }
 0x1bc   :  { %1441 = vmatpush.bf16.msra.mxu2 %v3539_v27  ;;  %1454 = vmatpush.bf16.msra.mxu3 %v3543_v44  ;;  %v4225_v27 = vld [vmem:[#allocation3 + $0x14] sm:$0xf0]  ;;  %v3476_v44 = vld [vmem:[#allocation3 + $0x18] sm:$0xf0] }
 0x1bd   :  { %3460 = vmatmul.msk.bf16.vlgmr.msrb.gmra.mxu0 %vm381_vm1, %v853_v38  ;;  %3461 = vmatmul.msk.bf16.vlgmr.msrb.gmra.mxu1 %vm381_vm1, %v853_v38 }
 0x1be   :  { %3462 = vmatmul.msk.bf16.vlgmr.msrb.gmra.mxu2 %vm381_vm1, %v853_v38  ;;  %3463 = vmatmul.msk.bf16.vlgmr.msrb.gmra.mxu3 %vm381_vm1, %v853_v38  ;;  %v4235_v38 = vld [vmem:[#allocation3 + $0x6c] sm:$0xf] }
 0x1bf   :  { %1416 = vmatpush.bf16.msra.mxu0 %v3515_v48  ;;  %v3527_v43 = vor.u32 %v4235_v38, %v3524_v41  ;;  %1429 = vmatpush.bf16.msra.mxu1 %v3519_v35  ;;  %v1218_v38 = vld [vmem:[#allocation2] sm:$0xff]  ;;  %v1219_v41 = vld [vmem:[#allocation2 + $0x8] sm:$0xff] }
 0x1c0   :  { %1442 = vmatpush.bf16.msra.mxu2 %v3523_v36  ;;  %v1467_v45 = vunpack.c.h.b16 %v1218_v38  ;;  %v1468_v50 = vunpack.c.l.b16 %v1219_v41 }
 0x1c1   :  { %1455 = vmatpush.bf16.msra.mxu3 %v3527_v43  ;;  %v1466_v43 = vunpack.c.l.b16 %v1218_v38  ;;  %v4274_v38 = vld [vmem:[#allocation3 + $0xa4] sm:$0xf] }
 0x1c2   :  { %v1471_v53 = vpack.c.b16 %v1467_v45, %v1467_v45  ;;  %v4277_v45 = vld [vmem:[#allocation3 + $0xb4] sm:$0xf0] }
 0x1c3   :  { %1417 = vmatpush.bf16.msra.mxu0 %v3499_v51  ;;  %1430 = vmatpush.bf16.msra.mxu1 %v3503_v56  ;;  %v1469_v51 = vunpack.c.h.b16 %v1219_v41 }
 0x1c4   :  { %1443 = vmatpush.bf16.msra.mxu2 %v3507_v59  ;;  %v4810_v60 = vsel %vm385_vm0, %v1471_v53, 0  ;;  %v4272_v53 = vld [vmem:[#allocation3 + $0x8c] sm:$0xf0] }
 0x1c5   :  { %1456 = vmatpush.bf16.msra.mxu3 %v3511_v61 }
 0x1c7   :  { %1418 = vmatpush.bf16.msra.mxu0 %v3483_v7  ;;  %1431 = vmatpush.bf16.msra.mxu1 %v3487_v15  ;;  %v1217_v15 = vld [vmem:[#allocation7 + $0x3] sm:$0x1] }
 0x1c8   :  { %1444 = vmatpush.bf16.msra.mxu2 %v3491_v16  ;;  %v3710_v16 = vld [vmem:[#allocation3 + $0xe0] sm:$0xf] }
 0x1cb   :  { %1432 = vmatpush.bf16.msra.mxu1 %v3471_v0 }
 0x1cf   :  { %1509 = vmatpush.bf16.msrb.mxu1 %v4810_v60 }
 0x22a   :  { %v4788_v2 = vpop.f32.mrf.mxu0  ;;  %v4790_v3 = vpop.f32.mrf.mxu1 }
 0x231   :  { %v4792_v24 = vpop.f32.mrf.mxu2  ;;  %v4794_v25 = vpop.f32.mrf.mxu3 }
 0x232   :  { %v1059_v29 = vpop.f32.mrf.mxu0  ;;  %v1072_v30 = vpop.f32.mrf.mxu1 }
 0x233   :  { %v3475_v29 = vor.u32 %v4225_v27, %v3474_v26  ;;  %v4223_v30 = vld [vmem:[#allocation3 + $0xc] sm:$0xf]  ;;  %v3694_v26 = vld [vmem:[#allocation3 + $0xc0] sm:$0xf]  ;;  %v4280_v27 = vld [vmem:[#allocation3 + $0xcc] sm:$0xf0] }
 0x234   :  { %v3479_v33 = vor.u32 %v4223_v30, %v3476_v44  ;;  %v3702_v30 = vld [vmem:[#allocation3 + $0xc8] sm:$0xf]  ;;  %v4281_v44 = vld [vmem:[#allocation3 + $0xd4] sm:$0xf0] }
 0x235   :  { %1445 = vmatpush.bf16.msra.mxu2 %v3475_v29  ;;  %v3696_v29 = vld [vmem:[#allocation3 + $0xd0] sm:$0xf0] }
 0x239   :  { %v1085_v55 = vpop.f32.mrf.mxu2  ;;  %v1098_v57 = vpop.f32.mrf.mxu3 }
 0x23a   :  { %v1134_v39 = vpop.f32.mrf.mxu0  ;;  %v1147_v40 = vpop.f32.mrf.mxu1 }
 0x23b   :  { %v1135_v62 = vadd.f32 %v1134_v39, %v4788_v2  ;;  %v1148_v1 = vadd.f32 %v1147_v40, %v4790_v3  ;;  %v3495_v2 = vor.u32 %v4227_v17, %v3492_v18  ;;  %v4224_v3 = vld [vmem:[#allocation3 + $0xc] sm:$0xf0]  ;;  %v4282_v18 = vld [vmem:[#allocation3 + $0xe4] sm:$0xf] }
 0x23c   :  { %v3467_v63 = vor.u32 %v4224_v3, %v3466_v19  ;;  %v4284_v17 = vld [vmem:[#allocation3 + $0xec] sm:$0xf0]  ;;  %v3718_v3 = vld [vmem:[#allocation3 + $0xe8] sm:$0xf] }
 0x23d   :  { %v1187_v13 = vadd.f32 %v1179_v58, %v1135_v62  ;;  %v1188_v14 = vadd.f32 %v1180_v32, %v1148_v1  ;;  %1457 = vmatpush.bf16.msra.mxu3 %v3495_v2  ;;  %v1472_v58 = vpack.c.b16 %v1468_v50, %v1468_v50  ;;  %v1473_v32 = vpack.c.b16 %v1469_v51, %v1469_v51  ;;  %v851_v62 = vld [vmem:[#allocation5] sm:$0x3]  ;;  %v3712_v2 = vld [vmem:[#allocation3 + $0xf0] sm:$0xf0]  ;;  %v4275_v51 = vld [vmem:[#allocation3 + $0xac] sm:$0xf] }
 0x23e   :  { %1419 = vmatpush.bf16.msra.mxu0 %v3467_v63  ;;  %v3711_v19 = vor.u32 %v4284_v17, %v3710_v16  ;;  %v3715_v22 = vor.u32 %v4282_v18, %v3712_v2  ;;  %v3720_v63 = vld [vmem:[#allocation3 + $0xf8] sm:$0xf0]  ;;  %v4269_v16 = vld [vmem:[#allocation3 + $0x74] sm:$0xf0] }
 0x23f   :  { %v1191_v21 = vmul.f32 0.5, %v1187_v13  ;;  %v1195_v23 = vmul.f32 0.5, %v1188_v14  ;;  %v4815_v39 = vsel %vm385_vm0, %v1472_v58, 0  ;;  %v4818_v40 = vsel %vm385_vm0, %v1473_v32, 0  ;;  %v3670_v58 = vld [vmem:[#allocation3 + $0x88] sm:$0xf] }
 0x240   :  { %1522 = vmatpush.bf16.msrb.mxu2 %v4815_v39  ;;  %v4273_v32 = vld [vmem:[#allocation3 + $0x94] sm:$0xf0]  ;;  %v3656_v2 = vld [vmem:[#allocation3 + $0x78] sm:$0xf0] }
 0x241   :  { %4411 = vtanh.f32 %v1191_v21  ;;  %v1160_v31 = vpop.f32.mrf.mxu2  ;;  %v1173_v47 = vpop.f32.mrf.mxu3  ;;  %1458 = vmatpush.bf16.msra.mxu3 %v3479_v33  ;;  %v3719_v21 = vor.u32 %v4285_v20, %v3718_v3  ;;  %v4279_v33 = vld [vmem:[#allocation3 + $0xcc] sm:$0xf] }
 0x242   :  { %4413 = vtanh.f32 %v1195_v23  ;;  %v1161_v48 = vadd.f32 %v1160_v31, %v4792_v24  ;;  %v1174_v34 = vadd.f32 %v1173_v47, %v4794_v25  ;;  %v1136_v49 = vpop.f32.mrf.mxu0  ;;  %v1149_v12 = vpop.f32.mrf.mxu1  ;;  %v1470_v25 = vpack.c.b16 %v1466_v43, %v1466_v43  ;;  %v4283_v23 = vld [vmem:[#allocation3 + $0xec] sm:$0xf]  ;;  %v3686_v43 = vld [vmem:[#allocation3 + $0xa8] sm:$0xf] }
 0x243   :  { %v3723_v0 = vor.u32 %v4283_v23, %v3720_v63  ;;  %v3703_v47 = vor.u32 %v4281_v44, %v3702_v30  ;;  %v3687_v50 = vor.u32 %v4277_v45, %v3686_v43  ;;  %v4834_v3 = vld [vmem:[#allocation13] sm:$0xf]  ;;  %v4262_v23 = vld [vmem:[#allocation3 + $0x44] sm:$0xf] }
 0x244   :  { %v1189_v35 = vadd.f32 %v1181_v28, %v1161_v48  ;;  %v1190_v36 = vadd.f32 %v1182_v10, %v1174_v34  ;;  %v4807_v59 = vsel %vm385_vm0, %v1470_v25, 0  ;;  %v4278_v28 = vld [vmem:[#allocation3 + $0xc4] sm:$0xf]  ;;  %v3695_v10 = vor.u32 %v4280_v27, %v3694_v26  ;;  %v3704_v48 = vld [vmem:[#allocation3 + $0xd8] sm:$0xf0] }
 0x245   :  { %1496 = vmatpush.bf16.msrb.mxu0 %v4807_v59  ;;  %1535 = vmatpush.bf16.msrb.mxu3 %v4818_v40  ;;  %v3699_v31 = vor.u32 %v4278_v28, %v3696_v29  ;;  %v3707_v12 = vor.u32 %v4279_v33, %v3704_v48  ;;  %v3662_v25 = vld [vmem:[#allocation3 + $0x80] sm:$0xf]  ;;  %v3638_v26 = vld [vmem:[#allocation3 + $0x48] sm:$0xf]  ;;  %v4265_v27 = vld [vmem:[#allocation3 + $0x54] sm:$0xf0] }
 0x246   :  { %4415 = vtanh.f32 %v1189_v35  ;;  %v1200_v42 = vmul.f32 0.5, %v1190_v36  ;;  %v3678_v35 = vld [vmem:[#allocation3 + $0xa0] sm:$0xf]  ;;  %v4276_v36 = vld [vmem:[#allocation3 + $0xac] sm:$0xf0]  ;;  %v1543_v29 = vperm.slane %v4834_v3, 0 }
 0x247   :  { %v4412_v46 = vpop.eup %4411  ;;  %v3679_v41 = vor.u32 %v4276_v36, %v3678_v35  ;;  %v1544_v30 = vperm.slane %v4834_v3, 1  ;;  %v3640_v33 = vld [vmem:[#allocation3 + $0x58] sm:$0xf0]  ;;  %v4258_v43 = vld [vmem:[#allocation3 + $0x24] sm:$0xf] }
 0x248   :  { %v4414_v24 = vpop.eup %4413  ;;  %v1193_v52 = vmul.f32 0.5, %v4412_v46  ;;  %4417 = vtanh.f32 %v1200_v42  ;;  %v3680_v42 = vld [vmem:[#allocation3 + $0xb0] sm:$0xf0] }
 0x249   :  { %v1197_v54 = vmul.f32 0.5, %v4414_v24  ;;  %v1162_v55 = vpop.f32.mrf.mxu2  ;;  %v1175_v57 = vpop.f32.mrf.mxu3  ;;  %v3683_v46 = vor.u32 %v4274_v38, %v3680_v42  ;;  %v3688_v24 = vld [vmem:[#allocation3 + $0xb8] sm:$0xf0]  ;;  %v4260_v42 = vld [vmem:[#allocation3 + $0x2c] sm:$0xf0] }
 0x24a   :  { %v1194_v56 = vadd.f32 0.5, %v1193_v52  ;;  %v3691_v52 = vor.u32 %v4275_v51, %v3688_v24  ;;  %v3663_v55 = vor.u32 %v4272_v53, %v3662_v25  ;;  %v3664_v57 = vld [vmem:[#allocation3 + $0x90] sm:$0xf0]  ;;  %v4261_v51 = vld [vmem:[#allocation3 + $0x34] sm:$0xf0] }
 0x24b   :  { %v1198_v37 = vadd.f32 0.5, %v1197_v54  ;;  %v4270_v54 = vld [vmem:[#allocation3 + $0x84] sm:$0xf] }
 0x24c   :  { %v4416_v61 = vpop.eup %4415 }
 0x24d   :  { %v1204_v1 = vmul.f32 %v1198_v37, %v851_v62  ;;  %v1205_v4 = vmul.f32 %v4416_v61, %v1194_v56  ;;  %v3667_v61 = vor.u32 %v4270_v54, %v3664_v57  ;;  %v3671_v62 = vor.u32 %v4273_v32, %v3670_v58  ;;  %v4259_v54 = vld [vmem:[#allocation3 + $0x2c] sm:$0xf]  ;;  %v3598_v57 = vld [vmem:[#allocation3] sm:$0xf]  ;;  %v4254_v58 = vld [vmem:[#allocation3 + $0x4] sm:$0xf] }
 0x24e   :  { %v4418_v5 = vpop.eup %4417  ;;  %v3600_v32 = vld [vmem:[#allocation3 + $0x10] sm:$0xf0] }
 0x24f   :  { %v1206_v6 = vadd.f32 %v1205_v4, %v1204_v1  ;;  %v1202_v7 = vmul.f32 0.5, %v4418_v5  ;;  %v4271_v1 = vld [vmem:[#allocation3 + $0x8c] sm:$0xf]  ;;  %v3672_v4 = vld [vmem:[#allocation3 + $0x98] sm:$0xf0] }
 0x251   :  { %4419 = vtanh.f32 %v1206_v6  ;;  %1210 = vst [vmem:[#allocation5] sm:$0x3] %v1206_v6  ;;  %v1203_v8 = vadd.f32 0.5, %v1202_v7  ;;  %v3675_v7 = vor.u32 %v4271_v1, %v3672_v4  ;;  %v3603_v4 = vor.u32 %v4254_v58, %v3600_v32  ;;  %v3828_v58 = vld [vmem:[#allocation3 + $0xd0] sm:$0xf0] }
 0x252   :  { %v3834_v32 = vld [vmem:[#allocation3 + $0xc8] sm:$0xf] }
 0x257   :  { %v4420_v9 = vpop.eup %4419 }
 0x258   :  { %v1208_v11 = vmul.f32 %v4420_v9, %v1203_v8  ;;  %v3646_v8 = vld [vmem:[#allocation3 + $0x60] sm:$0xf]  ;;  %v4268_v9 = vld [vmem:[#allocation3 + $0x6c] sm:$0xf0] }
 0x25a   :  { %v1209_v13 = vpack.c.bf16 %v1208_v11, %v1208_v11  ;;  %v4266_v11 = vld [vmem:[#allocation3 + $0x64] sm:$0xf] }
 0x25c   :  { %1211 = vst [vmem:[#allocation4] sm:$0x1] %v1209_v13 }
 0x25d   :  { %1213 = vst [vmem:[#allocation15 + $0x2] sm:$0x1] %v1209_v13  ;;  %v3647_v13 = vor.u32 %v4268_v9, %v3646_v8  ;;  %v1546_v8 = vperm.slane %v4834_v3, 3 }
 0x263   :  { %v1214_v14 = vld [vmem:[#allocation4] sm:$0x1] }
 0x264   :  { %1420 = vmatmul.bf16.vlgmr.msra.gmra.mxu0 %v1214_v14  ;;  %1433 = vmatmul.bf16.vlgmr.msra.gmra.mxu1 %v1214_v14 }
 0x265   :  { %1446 = vmatmul.bf16.vlgmr.msra.gmra.mxu2 %v1214_v14  ;;  %1459 = vmatmul.bf16.vlgmr.msra.gmra.mxu3 %v1214_v14  ;;  %v3648_v14 = vld [vmem:[#allocation3 + $0x70] sm:$0xf0] }
 0x266   :  { %1776 = vmatpush.bf16.msra.mxu0 %v3711_v19  ;;  %1789 = vmatpush.bf16.msra.mxu1 %v3715_v22  ;;  %v3651_v17 = vor.u32 %v4266_v11, %v3648_v14  ;;  %v4267_v19 = vld [vmem:[#allocation3 + $0x6c] sm:$0xf]  ;;  %v3630_v22 = vld [vmem:[#allocation3 + $0x40] sm:$0xf] }
 0x267   :  { %1802 = vmatpush.bf16.msra.mxu2 %v3719_v21  ;;  %1815 = vmatpush.bf16.msra.mxu3 %v3723_v0  ;;  %v3659_v20 = vor.u32 %v4267_v19, %v3656_v2  ;;  %v4264_v21 = vld [vmem:[#allocation3 + $0x4c] sm:$0xf0]  ;;  %v3632_v0 = vld [vmem:[#allocation3 + $0x50] sm:$0xf0]  ;;  %v4255_v11 = vld [vmem:[#allocation3 + $0xc] sm:$0xf] }
 0x268   :  { %v3631_v63 = vor.u32 %v4264_v21, %v3630_v22  ;;  %v3635_v44 = vor.u32 %v4262_v23, %v3632_v0 }
 0x26a   :  { %1777 = vmatpush.bf16.msra.mxu0 %v3695_v10  ;;  %1790 = vmatpush.bf16.msra.mxu1 %v3699_v31  ;;  %v3639_v31 = vor.u32 %v4265_v27, %v3638_v26 }
 0x26b   :  { %1803 = vmatpush.bf16.msra.mxu2 %v3703_v47  ;;  %1816 = vmatpush.bf16.msra.mxu3 %v3707_v12  ;;  %v4263_v47 = vld [vmem:[#allocation3 + $0x4c] sm:$0xf] }
 0x26c   :  { %v3643_v35 = vor.u32 %v4263_v47, %v3640_v33 }
 0x26e   :  { %1778 = vmatpush.bf16.msra.mxu0 %v3679_v41  ;;  %1791 = vmatpush.bf16.msra.mxu1 %v3683_v46  ;;  %v3614_v41 = vld [vmem:[#allocation3 + $0x20] sm:$0xf]  ;;  %v3616_v46 = vld [vmem:[#allocation3 + $0x30] sm:$0xf0] }
 0x26f   :  { %1804 = vmatpush.bf16.msra.mxu2 %v3687_v50  ;;  %1817 = vmatpush.bf16.msra.mxu3 %v3691_v52  ;;  %v3615_v45 = vor.u32 %v4260_v42, %v3614_v41  ;;  %v3622_v50 = vld [vmem:[#allocation3 + $0x28] sm:$0xf]  ;;  %v3619_v25 = vor.u32 %v4258_v43, %v3616_v46  ;;  %v3842_v41 = vld [vmem:[#allocation3 + $0xe0] sm:$0xf]  ;;  %v4316_v42 = vld [vmem:[#allocation3 + $0xec] sm:$0xf0] }
 0x270   :  { %v3623_v53 = vor.u32 %v4261_v51, %v3622_v50  ;;  %v4314_v43 = vld [vmem:[#allocation3 + $0xe4] sm:$0xf]  ;;  %v3844_v46 = vld [vmem:[#allocation3 + $0xf0] sm:$0xf0]  ;;  %v3850_v50 = vld [vmem:[#allocation3 + $0xe8] sm:$0xf] }
 0x271   :  { %v4317_v51 = vld [vmem:[#allocation3 + $0xf4] sm:$0xf0] }
 0x272   :  { %1779 = vmatpush.bf16.msra.mxu0 %v3663_v55  ;;  %1792 = vmatpush.bf16.msra.mxu1 %v3667_v61  ;;  %v3624_v55 = vld [vmem:[#allocation3 + $0x38] sm:$0xf0] }
 0x273   :  { %1805 = vmatpush.bf16.msra.mxu2 %v3671_v62  ;;  %1818 = vmatpush.bf16.msra.mxu3 %v3675_v7  ;;  %v1545_v7 = vperm.slane %v4834_v3, 2 }
 0x274   :  { %3592 = vmatmul.msk.bf16.vlgmr.msrb.gmra.mxu0 %vm381_vm1, %v1217_v15  ;;  %3593 = vmatmul.msk.bf16.vlgmr.msrb.gmra.mxu1 %vm381_vm1, %v1217_v15 }
 0x275   :  { %3594 = vmatmul.msk.bf16.vlgmr.msrb.gmra.mxu2 %vm381_vm1, %v1217_v15  ;;  %3595 = vmatmul.msk.bf16.vlgmr.msrb.gmra.mxu3 %vm381_vm1, %v1217_v15  ;;  %v3654_v15 = vld [vmem:[#allocation3 + $0x68] sm:$0xf] }
 0x276   :  { %v3655_v18 = vor.u32 %v4269_v16, %v3654_v15  ;;  %1780 = vmatpush.bf16.msra.mxu0 %v3647_v13  ;;  %1793 = vmatpush.bf16.msra.mxu1 %v3651_v17  ;;  %v3608_v13 = vld [vmem:[#allocation3 + $0x18] sm:$0xf0] }
 0x277   :  { %1819 = vmatpush.bf16.msra.mxu3 %v3659_v20  ;;  %v3611_v16 = vor.u32 %v4255_v11, %v3608_v13  ;;  %v4308_v11 = vld [vmem:[#allocation3 + $0xac] sm:$0xf0]  ;;  %v4306_v13 = vld [vmem:[#allocation3 + $0xa4] sm:$0xf] }
 0x278   :  { %1806 = vmatpush.bf16.msra.mxu2 %v3655_v18 }
 0x27a   :  { %1781 = vmatpush.bf16.msra.mxu0 %v3631_v63  ;;  %1794 = vmatpush.bf16.msra.mxu1 %v3635_v44 }
 0x27b   :  { %1820 = vmatpush.bf16.msra.mxu3 %v3643_v35 }
 0x27c   :  { %1807 = vmatpush.bf16.msra.mxu2 %v3639_v31 }
 0x27e   :  { %1782 = vmatpush.bf16.msra.mxu0 %v3615_v45  ;;  %1795 = vmatpush.bf16.msra.mxu1 %v3619_v25  ;;  %v3843_v45 = vor.u32 %v4316_v42, %v3842_v41  ;;  %v4315_v25 = vld [vmem:[#allocation3 + $0xec] sm:$0xf]  ;;  %v4301_v41 = vld [vmem:[#allocation3 + $0x74] sm:$0xf0] }
 0x280   :  { %1808 = vmatpush.bf16.msra.mxu2 %v3623_v53  ;;  %v3852_v53 = vld [vmem:[#allocation3 + $0xf8] sm:$0xf0] }
 0x282   :  { %1796 = vmatpush.bf16.msra.mxu1 %v3603_v4  ;;  %v4311_v4 = vld [vmem:[#allocation3 + $0xcc] sm:$0xf] }
 0x286   :  { %1873 = vmatpush.bf16.msrb.mxu1 %v4810_v60 }
 0x2e1   :  { %v4826_v34 = vpop.f32.mrf.mxu0  ;;  %v4828_v49 = vpop.f32.mrf.mxu1 }
 0x2e8   :  { %v4830_v56 = vpop.f32.mrf.mxu2  ;;  %v4832_v37 = vpop.f32.mrf.mxu3 }
 0x2e9   :  { %v1423_v5 = vpop.f32.mrf.mxu0  ;;  %v1436_v6 = vpop.f32.mrf.mxu1 }
 0x2ea   :  { %v3606_v5 = vld [vmem:[#allocation3 + $0x8] sm:$0xf]  ;;  %v4257_v6 = vld [vmem:[#allocation3 + $0x14] sm:$0xf0] }
 0x2eb   :  { %v3607_v9 = vor.u32 %v4257_v6, %v3606_v5  ;;  %v3836_v5 = vld [vmem:[#allocation3 + $0xd8] sm:$0xf0] }
 0x2ed   :  { %1809 = vmatpush.bf16.msra.mxu2 %v3607_v9  ;;  %v3810_v9 = vld [vmem:[#allocation3 + $0xa0] sm:$0xf] }
 0x2f0   :  { %v1449_v28 = vpop.f32.mrf.mxu2  ;;  %v1462_v10 = vpop.f32.mrf.mxu3 }
 0x2f1   :  { %v1498_v48 = vpop.f32.mrf.mxu0  ;;  %v1511_v12 = vpop.f32.mrf.mxu1  ;;  %1886 = vmatpush.bf16.msrb.mxu2 %v4815_v39  ;;  %v1215_v10 = vld [vmem:[#allocation5] sm:$0x3] }
 0x2f2   :  { %v1499_v36 = vadd.f32 %v1498_v48, %v4826_v34  ;;  %v1512_v38 = vadd.f32 %v1511_v12, %v4828_v49  ;;  %v3627_v34 = vor.u32 %v4259_v54, %v3624_v55  ;;  %v4256_v49 = vld [vmem:[#allocation3 + $0xc] sm:$0xf0]  ;;  %v3855_v54 = vor.u32 %v4315_v25, %v3852_v53  ;;  %v3826_v55 = vld [vmem:[#allocation3 + $0xc0] sm:$0xf]  ;;  %v4294_v25 = vld [vmem:[#allocation3 + $0x44] sm:$0xf] }
 0x2f3   :  { %v3599_v1 = vor.u32 %v4256_v49, %v3598_v57  ;;  %v4312_v57 = vld [vmem:[#allocation3 + $0xcc] sm:$0xf0] }
 0x2f4   :  { %v1551_v24 = vadd.f32 %v1543_v29, %v1499_v36  ;;  %v1552_v52 = vadd.f32 %v1544_v30, %v1512_v38  ;;  %1821 = vmatpush.bf16.msra.mxu3 %v3627_v34  ;;  %v1581_v38 = vld [vmem:[#allocation7 + $0x4] sm:$0x1]  ;;  %v3827_v49 = vor.u32 %v4312_v57, %v3826_v55  ;;  %v3770_v55 = vld [vmem:[#allocation3 + $0x48] sm:$0xf]  ;;  %v4297_v57 = vld [vmem:[#allocation3 + $0x54] sm:$0xf0] }
 0x2f5   :  { %1783 = vmatpush.bf16.msra.mxu0 %v3599_v1  ;;  %v4310_v34 = vld [vmem:[#allocation3 + $0xc4] sm:$0xf] }
 0x2f6   :  { %v1555_v61 = vmul.f32 0.5, %v1551_v24  ;;  %v1559_v62 = vmul.f32 0.5, %v1552_v52  ;;  %v3847_v24 = vor.u32 %v4314_v43, %v3844_v46  ;;  %v3851_v52 = vor.u32 %v4317_v51, %v3850_v50  ;;  %v3788_v46 = vld [vmem:[#allocation3 + $0x78] sm:$0xf0]  ;;  %v4860_v50 = vld [vmem:[#allocation13] sm:$0xf] }
 0x2f8   :  { %4421 = vtanh.f32 %v1555_v61  ;;  %v1524_v14 = vpop.f32.mrf.mxu2  ;;  %v1537_v15 = vpop.f32.mrf.mxu3  ;;  %1822 = vmatpush.bf16.msra.mxu3 %v3611_v16  ;;  %v4313_v61 = vld [vmem:[#allocation3 + $0xd4] sm:$0xf0]  ;;  %v3818_v16 = vld [vmem:[#allocation3 + $0xa8] sm:$0xf] }
 0x2f9   :  { %4423 = vtanh.f32 %v1559_v62  ;;  %v1525_v17 = vadd.f32 %v1524_v14, %v4830_v56  ;;  %v1538_v18 = vadd.f32 %v1537_v15, %v4832_v37  ;;  %v1500_v19 = vpop.f32.mrf.mxu0  ;;  %v1513_v2 = vpop.f32.mrf.mxu1  ;;  %1860 = vmatpush.bf16.msrb.mxu0 %v4807_v59  ;;  %v3831_v62 = vor.u32 %v4310_v34, %v3828_v58  ;;  %v3812_v15 = vld [vmem:[#allocation3 + $0xb0] sm:$0xf0] }
 0x2fa   :  { %v3835_v1 = vor.u32 %v4313_v61, %v3834_v32  ;;  %v3811_v14 = vor.u32 %v4308_v11, %v3810_v9  ;;  %v4307_v2 = vld [vmem:[#allocation3 + $0xac] sm:$0xf]  ;;  %v1907_v58 = vperm.slane %v4860_v50, 0  ;;  %v1908_v32 = vperm.slane %v4860_v50, 1 }
 0x2fb   :  { %v1553_v20 = vadd.f32 %v1545_v7, %v1525_v17  ;;  %v1554_v3 = vadd.f32 %v1546_v8, %v1538_v18  ;;  %v3839_v8 = vor.u32 %v4311_v4, %v3836_v5  ;;  %v4309_v17 = vld [vmem:[#allocation3 + $0xb4] sm:$0xf0]  ;;  %v3815_v18 = vor.u32 %v4306_v13, %v3812_v15  ;;  %v3772_v4 = vld [vmem:[#allocation3 + $0x58] sm:$0xf0]  ;;  %v4292_v15 = vld [vmem:[#allocation3 + $0x2c] sm:$0xf0] }
 0x2fc   :  { %1899 = vmatpush.bf16.msrb.mxu3 %v4818_v40  ;;  %v3819_v19 = vor.u32 %v4309_v17, %v3818_v16  ;;  %v4290_v16 = vld [vmem:[#allocation3 + $0x24] sm:$0xf] }
 0x2fd   :  { %4425 = vtanh.f32 %v1553_v20  ;;  %v1564_v22 = vmul.f32 0.5, %v1554_v3  ;;  %v3820_v20 = vld [vmem:[#allocation3 + $0xb8] sm:$0xf0] }
 0x2fe   :  { %v4422_v56 = vpop.eup %4421  ;;  %v3823_v3 = vor.u32 %v4307_v2, %v3820_v20  ;;  %v4293_v2 = vld [vmem:[#allocation3 + $0x34] sm:$0xf0] }
 0x2ff   :  { %v4424_v37 = vpop.eup %4423  ;;  %v1557_v21 = vmul.f32 0.5, %v4422_v56  ;;  %4427 = vtanh.f32 %v1564_v22  ;;  %v3794_v22 = vld [vmem:[#allocation3 + $0x80] sm:$0xf]  ;;  %v4304_v56 = vld [vmem:[#allocation3 + $0x8c] sm:$0xf0] }
 0x300   :  { %v1561_v23 = vmul.f32 0.5, %v4424_v37  ;;  %v1526_v63 = vpop.f32.mrf.mxu2  ;;  %v1539_v0 = vpop.f32.mrf.mxu3  ;;  %v4302_v37 = vld [vmem:[#allocation3 + $0x84] sm:$0xf] }
 0x301   :  { %v1558_v26 = vadd.f32 0.5, %v1557_v21  ;;  %v3795_v21 = vor.u32 %v4304_v56, %v3794_v22  ;;  %v3802_v63 = vld [vmem:[#allocation3 + $0x88] sm:$0xf]  ;;  %v4305_v0 = vld [vmem:[#allocation3 + $0x94] sm:$0xf0] }
 0x302   :  { %v1562_v27 = vadd.f32 0.5, %v1561_v23  ;;  %v3796_v23 = vld [vmem:[#allocation3 + $0x90] sm:$0xf0] }
 0x303   :  { %v4426_v28 = vpop.eup %4425 }
 0x304   :  { %v1568_v29 = vmul.f32 %v1562_v27, %v1215_v10  ;;  %v1569_v30 = vmul.f32 %v4426_v28, %v1558_v26  ;;  %v3799_v28 = vor.u32 %v4302_v37, %v3796_v23  ;;  %v3803_v10 = vor.u32 %v4305_v0, %v3802_v63  ;;  %v4291_v37 = vld [vmem:[#allocation3 + $0x2c] sm:$0xf]  ;;  %v3730_v23 = vld [vmem:[#allocation3] sm:$0xf]  ;;  %v4286_v63 = vld [vmem:[#allocation3 + $0x4] sm:$0xf] }
 0x305   :  { %v4428_v44 = vpop.eup %4427  ;;  %v3732_v0 = vld [vmem:[#allocation3 + $0x10] sm:$0xf0] }
 0x306   :  { %v1570_v31 = vadd.f32 %v1569_v30, %v1568_v29  ;;  %v1566_v47 = vmul.f32 0.5, %v4428_v44  ;;  %v4303_v29 = vld [vmem:[#allocation3 + $0x8c] sm:$0xf]  ;;  %v3804_v30 = vld [vmem:[#allocation3 + $0x98] sm:$0xf0] }
 0x308   :  { %4429 = vtanh.f32 %v1570_v31  ;;  %1574 = vst [vmem:[#allocation5] sm:$0x3] %v1570_v31  ;;  %v1567_v33 = vadd.f32 0.5, %v1566_v47  ;;  %v3807_v47 = vor.u32 %v4303_v29, %v3804_v30  ;;  %v3735_v30 = vor.u32 %v4286_v63, %v3732_v0  ;;  %v4343_v0 = vld [vmem:[#allocation3 + $0xcc] sm:$0xf] }
 0x30e   :  { %v4430_v48 = vpop.eup %4429 }
 0x30f   :  { %v1572_v12 = vmul.f32 %v4430_v48, %v1567_v33  ;;  %v3778_v33 = vld [vmem:[#allocation3 + $0x60] sm:$0xf]  ;;  %v4300_v48 = vld [vmem:[#allocation3 + $0x6c] sm:$0xf0] }
 0x311   :  { %v1573_v35 = vpack.c.bf16 %v1572_v12, %v1572_v12  ;;  %v4298_v12 = vld [vmem:[#allocation3 + $0x64] sm:$0xf] }
 0x313   :  { %1575 = vst [vmem:[#allocation4] sm:$0x1] %v1573_v35 }
 0x314   :  { %1577 = vst [vmem:[#allocation15 + $0x3] sm:$0x1] %v1573_v35  ;;  %v3779_v35 = vor.u32 %v4300_v48, %v3778_v33  ;;  %v1910_v33 = vperm.slane %v4860_v50, 3 }
 0x31a   :  { %v1578_v36 = vld [vmem:[#allocation4] sm:$0x1] }
 0x31b   :  { %1784 = vmatmul.bf16.vlgmr.msra.gmra.mxu0 %v1578_v36  ;;  %1797 = vmatmul.bf16.vlgmr.msra.gmra.mxu1 %v1578_v36 }
 0x31c   :  { %1810 = vmatmul.bf16.vlgmr.msra.gmra.mxu2 %v1578_v36  ;;  %1823 = vmatmul.bf16.vlgmr.msra.gmra.mxu3 %v1578_v36  ;;  %v3780_v36 = vld [vmem:[#allocation3 + $0x70] sm:$0xf0] }
 0x31d   :  { %2140 = vmatpush.bf16.msra.mxu0 %v3843_v45  ;;  %2153 = vmatpush.bf16.msra.mxu1 %v3847_v24  ;;  %v3783_v42 = vor.u32 %v4298_v12, %v3780_v36  ;;  %v4299_v45 = vld [vmem:[#allocation3 + $0x6c] sm:$0xf]  ;;  %v3762_v24 = vld [vmem:[#allocation3 + $0x40] sm:$0xf] }
 0x31e   :  { %2166 = vmatpush.bf16.msra.mxu2 %v3851_v52  ;;  %2179 = vmatpush.bf16.msra.mxu3 %v3855_v54  ;;  %v3791_v51 = vor.u32 %v4299_v45, %v3788_v46  ;;  %v4296_v52 = vld [vmem:[#allocation3 + $0x4c] sm:$0xf0]  ;;  %v3764_v54 = vld [vmem:[#allocation3 + $0x50] sm:$0xf0]  ;;  %v4287_v12 = vld [vmem:[#allocation3 + $0xc] sm:$0xf] }
 0x31f   :  { %v3763_v53 = vor.u32 %v4296_v52, %v3762_v24  ;;  %v3767_v61 = vor.u32 %v4294_v25, %v3764_v54 }
 0x321   :  { %2141 = vmatpush.bf16.msra.mxu0 %v3827_v49  ;;  %2154 = vmatpush.bf16.msra.mxu1 %v3831_v62  ;;  %v3771_v62 = vor.u32 %v4297_v57, %v3770_v55 }
 0x322   :  { %2167 = vmatpush.bf16.msra.mxu2 %v3835_v1  ;;  %2180 = vmatpush.bf16.msra.mxu3 %v3839_v8  ;;  %v4295_v1 = vld [vmem:[#allocation3 + $0x4c] sm:$0xf] }
 0x323   :  { %v3775_v9 = vor.u32 %v4295_v1, %v3772_v4 }
 0x325   :  { %2142 = vmatpush.bf16.msra.mxu0 %v3811_v14  ;;  %2155 = vmatpush.bf16.msra.mxu1 %v3815_v18  ;;  %v3746_v14 = vld [vmem:[#allocation3 + $0x20] sm:$0xf]  ;;  %v3748_v18 = vld [vmem:[#allocation3 + $0x30] sm:$0xf0] }
 0x326   :  { %2168 = vmatpush.bf16.msra.mxu2 %v3819_v19  ;;  %2181 = vmatpush.bf16.msra.mxu3 %v3823_v3  ;;  %v3747_v17 = vor.u32 %v4292_v15, %v3746_v14  ;;  %v3754_v19 = vld [vmem:[#allocation3 + $0x28] sm:$0xf]  ;;  %v3751_v22 = vor.u32 %v4290_v16, %v3748_v18  ;;  %v3976_v14 = vld [vmem:[#allocation3 + $0xf0] sm:$0xf0]  ;;  %v4349_v16 = vld [vmem:[#allocation3 + $0xf4] sm:$0xf0] }
 0x327   :  { %v3755_v56 = vor.u32 %v4293_v2, %v3754_v19  ;;  %v3982_v15 = vld [vmem:[#allocation3 + $0xe8] sm:$0xf]  ;;  %v4347_v19 = vld [vmem:[#allocation3 + $0xec] sm:$0xf]  ;;  %v3984_v2 = vld [vmem:[#allocation3 + $0xf8] sm:$0xf0] }
 0x328   :  { %v3983_v18 = vor.u32 %v4349_v16, %v3982_v15  ;;  %v4326_v15 = vld [vmem:[#allocation3 + $0x44] sm:$0xf] }
 0x329   :  { %2143 = vmatpush.bf16.msra.mxu0 %v3795_v21  ;;  %2156 = vmatpush.bf16.msra.mxu1 %v3799_v28  ;;  %v3756_v21 = vld [vmem:[#allocation3 + $0x38] sm:$0xf0] }
 0x32a   :  { %2169 = vmatpush.bf16.msra.mxu2 %v3803_v10  ;;  %2182 = vmatpush.bf16.msra.mxu3 %v3807_v47  ;;  %v1909_v47 = vperm.slane %v4860_v50, 2 }
 0x32b   :  { %3724 = vmatmul.msk.bf16.vlgmr.msrb.gmra.mxu0 %vm381_vm1, %v1581_v38  ;;  %3725 = vmatmul.msk.bf16.vlgmr.msrb.gmra.mxu1 %vm381_vm1, %v1581_v38 }
 0x32c   :  { %3726 = vmatmul.msk.bf16.vlgmr.msrb.gmra.mxu2 %vm381_vm1, %v1581_v38  ;;  %3727 = vmatmul.msk.bf16.vlgmr.msrb.gmra.mxu3 %vm381_vm1, %v1581_v38  ;;  %v3786_v38 = vld [vmem:[#allocation3 + $0x68] sm:$0xf] }
 0x32d   :  { %v3787_v43 = vor.u32 %v4301_v41, %v3786_v38  ;;  %2144 = vmatpush.bf16.msra.mxu0 %v3779_v35  ;;  %2157 = vmatpush.bf16.msra.mxu1 %v3783_v42  ;;  %v3740_v35 = vld [vmem:[#allocation3 + $0x18] sm:$0xf0] }
 0x32e   :  { %2183 = vmatpush.bf16.msra.mxu3 %v3791_v51  ;;  %v3743_v41 = vor.u32 %v4287_v12, %v3740_v35  ;;  %v3950_v12 = vld [vmem:[#allocation3 + $0xa8] sm:$0xf]  ;;  %v4341_v35 = vld [vmem:[#allocation3 + $0xb4] sm:$0xf0] }
 0x32f   :  { %2170 = vmatpush.bf16.msra.mxu2 %v3787_v43 }
 0x331   :  { %2145 = vmatpush.bf16.msra.mxu0 %v3763_v53  ;;  %2158 = vmatpush.bf16.msra.mxu1 %v3767_v61 }
 0x332   :  { %2184 = vmatpush.bf16.msra.mxu3 %v3775_v9  ;;  %v4348_v9 = vld [vmem:[#allocation3 + $0xec] sm:$0xf0] }
 0x333   :  { %2171 = vmatpush.bf16.msra.mxu2 %v3771_v62 }
 0x335   :  { %2146 = vmatpush.bf16.msra.mxu0 %v3747_v17  ;;  %2159 = vmatpush.bf16.msra.mxu1 %v3751_v22  ;;  %v4344_v22 = vld [vmem:[#allocation3 + $0xcc] sm:$0xf0] }
 0x337   :  { %2172 = vmatpush.bf16.msra.mxu2 %v3755_v56  ;;  %v4342_v56 = vld [vmem:[#allocation3 + $0xc4] sm:$0xf] }
 0x339   :  { %2160 = vmatpush.bf16.msra.mxu1 %v3735_v30 }
 0x33d   :  { %2237 = vmatpush.bf16.msrb.mxu1 %v4810_v60 }
 0x398   :  { %v4852_v6 = vpop.f32.mrf.mxu0  ;;  %v4854_v7 = vpop.f32.mrf.mxu1 }
 0x39f   :  { %v4856_v26 = vpop.f32.mrf.mxu2  ;;  %v4858_v27 = vpop.f32.mrf.mxu3 }
 0x3a0   :  { %v1787_v44 = vpop.f32.mrf.mxu0  ;;  %v1800_v31 = vpop.f32.mrf.mxu1 }
 0x3a1   :  { %v3738_v44 = vld [vmem:[#allocation3 + $0x8] sm:$0xf]  ;;  %v4289_v31 = vld [vmem:[#allocation3 + $0x14] sm:$0xf0] }
 0x3a2   :  { %v3739_v48 = vor.u32 %v4289_v31, %v3738_v44  ;;  %v3942_v44 = vld [vmem:[#allocation3 + $0xa0] sm:$0xf]  ;;  %v4340_v31 = vld [vmem:[#allocation3 + $0xac] sm:$0xf0] }
 0x3a4   :  { %2173 = vmatpush.bf16.msra.mxu2 %v3739_v48  ;;  %v3944_v48 = vld [vmem:[#allocation3 + $0xb0] sm:$0xf0] }
 0x3a7   :  { %v1813_v34 = vpop.f32.mrf.mxu2  ;;  %v1826_v49 = vpop.f32.mrf.mxu3 }
 0x3a8   :  { %v1862_v5 = vpop.f32.mrf.mxu0  ;;  %v1875_v8 = vpop.f32.mrf.mxu1  ;;  %2250 = vmatpush.bf16.msrb.mxu2 %v4815_v39  ;;  %v1579_v49 = vld [vmem:[#allocation5] sm:$0x3] }
 0x3a9   :  { %v1863_v11 = vadd.f32 %v1862_v5, %v4852_v6  ;;  %v1876_v13 = vadd.f32 %v1875_v8, %v4854_v7  ;;  %v3759_v6 = vor.u32 %v4291_v37, %v3756_v21  ;;  %v4288_v7 = vld [vmem:[#allocation3 + $0xc] sm:$0xf0]  ;;  %v1945_v5 = vld [vmem:[#allocation7 + $0x5] sm:$0x1]  ;;  %v3974_v8 = vld [vmem:[#allocation3 + $0xe0] sm:$0xf] }
 0x3aa   :  { %v3731_v29 = vor.u32 %v4288_v7, %v3730_v23  ;;  %v3960_v21 = vld [vmem:[#allocation3 + $0xd0] sm:$0xf0]  ;;  %v3966_v23 = vld [vmem:[#allocation3 + $0xc8] sm:$0xf] }
 0x3ab   :  { %v1915_v20 = vadd.f32 %v1907_v58, %v1863_v11  ;;  %v1916_v3 = vadd.f32 %v1908_v32, %v1876_v13  ;;  %2185 = vmatpush.bf16.msra.mxu3 %v3759_v6  ;;  %v4346_v11 = vld [vmem:[#allocation3 + $0xe4] sm:$0xf]  ;;  %v3975_v13 = vor.u32 %v4348_v9, %v3974_v8  ;;  %v4345_v6 = vld [vmem:[#allocation3 + $0xd4] sm:$0xf0]  ;;  %v3963_v7 = vor.u32 %v4342_v56, %v3960_v21  ;;  %v3920_v8 = vld [vmem:[#allocation3 + $0x78] sm:$0xf0] }
 0x3ac   :  { %2147 = vmatpush.bf16.msra.mxu0 %v3731_v29  ;;  %v3979_v17 = vor.u32 %v4346_v11, %v3976_v14  ;;  %v3967_v63 = vor.u32 %v4345_v6, %v3966_v23  ;;  %v4886_v9 = vld [vmem:[#allocation13] sm:$0xf]  ;;  %v3904_v23 = vld [vmem:[#allocation3 + $0x58] sm:$0xf0] }
 0x3ad   :  { %v1919_v28 = vmul.f32 0.5, %v1915_v20  ;;  %v1923_v10 = vmul.f32 0.5, %v1916_v3  ;;  %v3987_v20 = vor.u32 %v4347_v19, %v3984_v2  ;;  %v3958_v3 = vld [vmem:[#allocation3 + $0xc0] sm:$0xf]  ;;  %v4328_v14 = vld [vmem:[#allocation3 + $0x4c] sm:$0xf0] }
 0x3ae   :  { %v3959_v37 = vor.u32 %v4344_v22, %v3958_v3  ;;  %v4329_v19 = vld [vmem:[#allocation3 + $0x54] sm:$0xf0]  ;;  %v2271_v3 = vperm.slane %v4886_v9, 0  ;;  %v2272_v22 = vperm.slane %v4886_v9, 1  ;;  %v4327_v21 = vld [vmem:[#allocation3 + $0x4c] sm:$0xf] }
 0x3af   :  { %4431 = vtanh.f32 %v1919_v28  ;;  %v1888_v36 = vpop.f32.mrf.mxu2  ;;  %v1901_v38 = vpop.f32.mrf.mxu3  ;;  %2186 = vmatpush.bf16.msra.mxu3 %v3743_v41  ;;  %v3968_v28 = vld [vmem:[#allocation3 + $0xd8] sm:$0xf0]  ;;  %v4339_v41 = vld [vmem:[#allocation3 + $0xac] sm:$0xf] }
 0x3b0   :  { %4433 = vtanh.f32 %v1923_v10  ;;  %v1889_v42 = vadd.f32 %v1888_v36, %v4856_v26  ;;  %v1902_v43 = vadd.f32 %v1901_v38, %v4858_v27  ;;  %v1864_v45 = vpop.f32.mrf.mxu0  ;;  %v1877_v46 = vpop.f32.mrf.mxu1  ;;  %2224 = vmatpush.bf16.msrb.mxu0 %v4807_v59  ;;  %v3971_v30 = vor.u32 %v4343_v0, %v3968_v28 }
 0x3b1   :  { %v3951_v38 = vor.u32 %v4341_v35, %v3950_v12  ;;  %v3926_v45 = vld [vmem:[#allocation3 + $0x80] sm:$0xf]  ;;  %v4336_v46 = vld [vmem:[#allocation3 + $0x8c] sm:$0xf0]  ;;  %v4325_v12 = vld [vmem:[#allocation3 + $0x34] sm:$0xf0] }
 0x3b2   :  { %v1917_v51 = vadd.f32 %v1909_v47, %v1889_v42  ;;  %v1918_v50 = vadd.f32 %v1910_v33, %v1902_v43  ;;  %v4338_v47 = vld [vmem:[#allocation3 + $0xa4] sm:$0xf]  ;;  %v3943_v33 = vor.u32 %v4340_v31, %v3942_v44  ;;  %v3952_v42 = vld [vmem:[#allocation3 + $0xb8] sm:$0xf0]  ;;  %v4324_v44 = vld [vmem:[#allocation3 + $0x2c] sm:$0xf0] }
 0x3b3   :  { %2263 = vmatpush.bf16.msrb.mxu3 %v4818_v40  ;;  %v3947_v36 = vor.u32 %v4338_v47, %v3944_v48  ;;  %v3955_v43 = vor.u32 %v4339_v41, %v3952_v42  ;;  %v4322_v31 = vld [vmem:[#allocation3 + $0x24] sm:$0xf]  ;;  %v3886_v48 = vld [vmem:[#allocation3 + $0x28] sm:$0xf]  ;;  %v4323_v42 = vld [vmem:[#allocation3 + $0x2c] sm:$0xf] }
 0x3b4   :  { %4435 = vtanh.f32 %v1917_v51  ;;  %v1928_v24 = vmul.f32 0.5, %v1918_v50  ;;  %v4334_v51 = vld [vmem:[#allocation3 + $0x84] sm:$0xf]  ;;  %v3927_v50 = vor.u32 %v4336_v46, %v3926_v45  ;;  %v3887_v41 = vor.u32 %v4325_v12, %v3886_v48  ;;  %v3862_v45 = vld [vmem:[#allocation3] sm:$0xf] }
 0x3b5   :  { %v4432_v26 = vpop.eup %4431  ;;  %v4318_v46 = vld [vmem:[#allocation3 + $0x4] sm:$0xf] }
 0x3b6   :  { %v4434_v27 = vpop.eup %4433  ;;  %v1921_v52 = vmul.f32 0.5, %v4432_v26  ;;  %4437 = vtanh.f32 %v1928_v24  ;;  %v3928_v24 = vld [vmem:[#allocation3 + $0x90] sm:$0xf0]  ;;  %v3934_v26 = vld [vmem:[#allocation3 + $0x88] sm:$0xf] }
 0x3b7   :  { %v1925_v25 = vmul.f32 0.5, %v4434_v27  ;;  %v1890_v53 = vpop.f32.mrf.mxu2  ;;  %v1903_v54 = vpop.f32.mrf.mxu3  ;;  %v4337_v27 = vld [vmem:[#allocation3 + $0x94] sm:$0xf0] }
 0x3b8   :  { %v1922_v55 = vadd.f32 0.5, %v1921_v52  ;;  %v3931_v53 = vor.u32 %v4334_v51, %v3928_v24  ;;  %v3935_v54 = vor.u32 %v4337_v27, %v3934_v26  ;;  %v3864_v51 = vld [vmem:[#allocation3 + $0x10] sm:$0xf0] }
 0x3b9   :  { %v1926_v57 = vadd.f32 0.5, %v1925_v25  ;;  %v3867_v27 = vor.u32 %v4318_v46, %v3864_v51  ;;  %v4381_v46 = vld [vmem:[#allocation3 + $0xf4] sm:$0xf0] }
 0x3ba   :  { %v4436_v34 = vpop.eup %4435 }
 0x3bb   :  { %v1932_v59 = vmul.f32 %v1926_v57, %v1579_v49  ;;  %v1933_v58 = vmul.f32 %v4436_v34, %v1922_v55  ;;  %v4335_v55 = vld [vmem:[#allocation3 + $0x8c] sm:$0xf]  ;;  %v3936_v57 = vld [vmem:[#allocation3 + $0x98] sm:$0xf0] }
 0x3bc   :  { %v4438_v60 = vpop.eup %4437 }
 0x3bd   :  { %v1934_v32 = vadd.f32 %v1933_v58, %v1932_v59  ;;  %v1930_v39 = vmul.f32 0.5, %v4438_v60  ;;  %v3939_v59 = vor.u32 %v4335_v55, %v3936_v57  ;;  %v3910_v58 = vld [vmem:[#allocation3 + $0x60] sm:$0xf]  ;;  %v4332_v60 = vld [vmem:[#allocation3 + $0x6c] sm:$0xf0]  ;;  %v2273_v55 = vperm.slane %v4886_v9, 2 }
 0x3be   :  { %v2274_v57 = vperm.slane %v4886_v9, 3  ;;  %v2311_v9 = vld [vmem:[#allocation2 + $0x8] sm:$0xff] }
 0x3bf   :  { %4439 = vtanh.f32 %v1934_v32  ;;  %1938 = vst [vmem:[#allocation5] sm:$0x3] %v1934_v32  ;;  %v1931_v61 = vadd.f32 0.5, %v1930_v39  ;;  %v4330_v32 = vld [vmem:[#allocation3 + $0x64] sm:$0xf]  ;;  %v3911_v39 = vor.u32 %v4332_v60, %v3910_v58 }
 0x3c5   :  { %v4440_v40 = vpop.eup %4439 }
 0x3c6   :  { %v1936_v62 = vmul.f32 %v4440_v40, %v1931_v61  ;;  %v3912_v61 = vld [vmem:[#allocation3 + $0x70] sm:$0xf0]  ;;  %v3918_v40 = vld [vmem:[#allocation3 + $0x68] sm:$0xf] }
 0x3c8   :  { %v1937_v1 = vpack.c.bf16 %v1936_v62, %v1936_v62  ;;  %v4333_v62 = vld [vmem:[#allocation3 + $0x74] sm:$0xf0] }
 0x3ca   :  { %1939 = vst [vmem:[#allocation4] sm:$0x1] %v1937_v1 }
 0x3cb   :  { %1941 = vst [vmem:[#allocation15 + $0x4] sm:$0x1] %v1937_v1  ;;  %v3915_v1 = vor.u32 %v4330_v32, %v3912_v61 }
 0x3d1   :  { %v1942_v4 = vld [vmem:[#allocation4] sm:$0x1] }
 0x3d2   :  { %2148 = vmatmul.bf16.vlgmr.msra.gmra.mxu0 %v1942_v4  ;;  %2161 = vmatmul.bf16.vlgmr.msra.gmra.mxu1 %v1942_v4 }
 0x3d3   :  { %2174 = vmatmul.bf16.vlgmr.msra.gmra.mxu2 %v1942_v4  ;;  %2187 = vmatmul.bf16.vlgmr.msra.gmra.mxu3 %v1942_v4  ;;  %v3919_v4 = vor.u32 %v4333_v62, %v3918_v40 }
 0x3d4   :  { %2504 = vmatpush.bf16.msra.mxu0 %v3975_v13  ;;  %2517 = vmatpush.bf16.msra.mxu1 %v3979_v17  ;;  %v3894_v13 = vld [vmem:[#allocation3 + $0x40] sm:$0xf]  ;;  %v3896_v17 = vld [vmem:[#allocation3 + $0x50] sm:$0xf0] }
 0x3d5   :  { %2530 = vmatpush.bf16.msra.mxu2 %v3983_v18  ;;  %2543 = vmatpush.bf16.msra.mxu3 %v3987_v20  ;;  %v3895_v16 = vor.u32 %v4328_v14, %v3894_v13  ;;  %v3902_v18 = vld [vmem:[#allocation3 + $0x48] sm:$0xf]  ;;  %v3899_v56 = vor.u32 %v4326_v15, %v3896_v17  ;;  %v2560_v15 = vunpack.c.l.b16 %v2311_v9 }
 0x3d8   :  { %2505 = vmatpush.bf16.msra.mxu0 %v3959_v37  ;;  %2518 = vmatpush.bf16.msra.mxu1 %v3963_v7  ;;  %v3903_v37 = vor.u32 %v4329_v19, %v3902_v18 }
 0x3d9   :  { %2531 = vmatpush.bf16.msra.mxu2 %v3967_v63  ;;  %2544 = vmatpush.bf16.msra.mxu3 %v3971_v30  ;;  %v3907_v63 = vor.u32 %v4327_v21, %v3904_v23  ;;  %v3878_v30 = vld [vmem:[#allocation3 + $0x20] sm:$0xf] }
 0x3da   :  { %v3879_v47 = vor.u32 %v4324_v44, %v3878_v30 }
 0x3dc   :  { %2506 = vmatpush.bf16.msra.mxu0 %v3943_v33  ;;  %2519 = vmatpush.bf16.msra.mxu1 %v3947_v36  ;;  %v3880_v33 = vld [vmem:[#allocation3 + $0x30] sm:$0xf0] }
 0x3dd   :  { %2532 = vmatpush.bf16.msra.mxu2 %v3951_v38  ;;  %2545 = vmatpush.bf16.msra.mxu3 %v3955_v43  ;;  %v3883_v38 = vor.u32 %v4322_v31, %v3880_v33  ;;  %v3888_v43 = vld [vmem:[#allocation3 + $0x38] sm:$0xf0] }
 0x3e0   :  { %2507 = vmatpush.bf16.msra.mxu0 %v3927_v50  ;;  %2520 = vmatpush.bf16.msra.mxu1 %v3931_v53  ;;  %v3870_v53 = vld [vmem:[#allocation3 + $0x8] sm:$0xf] }
 0x3e1   :  { %2533 = vmatpush.bf16.msra.mxu2 %v3935_v54  ;;  %2546 = vmatpush.bf16.msra.mxu3 %v3939_v59  ;;  %v4321_v54 = vld [vmem:[#allocation3 + $0x14] sm:$0xf0]  ;;  %v3872_v59 = vld [vmem:[#allocation3 + $0x18] sm:$0xf0] }
 0x3e2   :  { %3856 = vmatmul.msk.bf16.vlgmr.msrb.gmra.mxu0 %vm381_vm1, %v1945_v5  ;;  %3857 = vmatmul.msk.bf16.vlgmr.msrb.gmra.mxu1 %vm381_vm1, %v1945_v5 }
 0x3e3   :  { %3858 = vmatmul.msk.bf16.vlgmr.msrb.gmra.mxu2 %vm381_vm1, %v1945_v5  ;;  %3859 = vmatmul.msk.bf16.vlgmr.msrb.gmra.mxu3 %vm381_vm1, %v1945_v5  ;;  %v4331_v5 = vld [vmem:[#allocation3 + $0x6c] sm:$0xf] }
 0x3e4   :  { %2508 = vmatpush.bf16.msra.mxu0 %v3911_v39  ;;  %v3923_v11 = vor.u32 %v4331_v5, %v3920_v8  ;;  %2521 = vmatpush.bf16.msra.mxu1 %v3915_v1  ;;  %v2310_v8 = vld [vmem:[#allocation2] sm:$0xff] }
 0x3e5   :  { %2534 = vmatpush.bf16.msra.mxu2 %v3919_v4  ;;  %v2558_v13 = vunpack.c.l.b16 %v2310_v8  ;;  %v2559_v14 = vunpack.c.h.b16 %v2310_v8 }
 0x3e6   :  { %2547 = vmatpush.bf16.msra.mxu3 %v3923_v11 }
 0x3e8   :  { %2509 = vmatpush.bf16.msra.mxu0 %v3895_v16  ;;  %2522 = vmatpush.bf16.msra.mxu1 %v3899_v56  ;;  %v2561_v16 = vunpack.c.h.b16 %v2311_v9  ;;  %v4076_v9 = vld [vmem:[#allocation3 + $0xb0] sm:$0xf0] }
 0x3e9   :  { %2535 = vmatpush.bf16.msra.mxu2 %v3903_v37 }
 0x3ea   :  { %2548 = vmatpush.bf16.msra.mxu3 %v3907_v63  ;;  %v2565_v56 = vpack.c.b16 %v2561_v16, %v2561_v16  ;;  %v1943_v63 = vld [vmem:[#allocation5] sm:$0x3]  ;;  %v4371_v16 = vld [vmem:[#allocation3 + $0xac] sm:$0xf] }
 0x3ec   :  { %2510 = vmatpush.bf16.msra.mxu0 %v3879_v47  ;;  %2523 = vmatpush.bf16.msra.mxu1 %v3883_v38  ;;  %v2309_v38 = vld [vmem:[#allocation7 + $0x6] sm:$0x1] }
 0x3ed   :  { %2536 = vmatpush.bf16.msra.mxu2 %v3887_v41  ;;  %v4106_v41 = vld [vmem:[#allocation3 + $0xe0] sm:$0xf] }
 0x3f0   :  { %2524 = vmatpush.bf16.msra.mxu1 %v3867_v27 }
 0x44f   :  { %v4878_v10 = vpop.f32.mrf.mxu0  ;;  %v4880_v29 = vpop.f32.mrf.mxu1 }
 0x456   :  { %v4882_v52 = vpop.f32.mrf.mxu2  ;;  %v4884_v25 = vpop.f32.mrf.mxu3 }
 0x457   :  { %v2151_v34 = vpop.f32.mrf.mxu0  ;;  %v2164_v49 = vpop.f32.mrf.mxu1 }
 0x458   :  { %v3871_v34 = vor.u32 %v4321_v54, %v3870_v53  ;;  %v4319_v49 = vld [vmem:[#allocation3 + $0xc] sm:$0xf]  ;;  %v4090_v53 = vld [vmem:[#allocation3 + $0xc0] sm:$0xf]  ;;  %v4376_v54 = vld [vmem:[#allocation3 + $0xcc] sm:$0xf0] }
 0x459   :  { %v3875_v32 = vor.u32 %v4319_v49, %v3872_v59  ;;  %v4098_v49 = vld [vmem:[#allocation3 + $0xc8] sm:$0xf]  ;;  %v4377_v59 = vld [vmem:[#allocation3 + $0xd4] sm:$0xf0] }
 0x45a   :  { %2537 = vmatpush.bf16.msra.mxu2 %v3871_v34  ;;  %v4092_v34 = vld [vmem:[#allocation3 + $0xd0] sm:$0xf0] }
 0x45e   :  { %v2177_v2 = vpop.f32.mrf.mxu2  ;;  %v2190_v20 = vpop.f32.mrf.mxu3 }
 0x45f   :  { %v2226_v6 = vpop.f32.mrf.mxu0  ;;  %v2239_v7 = vpop.f32.mrf.mxu1  ;;  %v2562_v2 = vpack.c.b16 %v2558_v13, %v2558_v13  ;;  %v2563_v20 = vpack.c.b16 %v2559_v14, %v2559_v14  ;;  %v4373_v13 = vld [vmem:[#allocation3 + $0xb4] sm:$0xf0] }
 0x460   :  { %v2227_v0 = vadd.f32 %v2226_v6, %v4878_v10  ;;  %v2240_v28 = vadd.f32 %v2239_v7, %v4880_v29  ;;  %v3891_v10 = vor.u32 %v4323_v42, %v3888_v43  ;;  %v4320_v29 = vld [vmem:[#allocation3 + $0xc] sm:$0xf0]  ;;  %v4378_v43 = vld [vmem:[#allocation3 + $0xe4] sm:$0xf] }
 0x461   :  { %v3863_v26 = vor.u32 %v4320_v29, %v3862_v45  ;;  %v4897_v21 = vsel %vm385_vm0, %v2562_v2, 0  ;;  %v4900_v23 = vsel %vm385_vm0, %v2563_v20, 0  ;;  %v4380_v42 = vld [vmem:[#allocation3 + $0xec] sm:$0xf0]  ;;  %v4114_v29 = vld [vmem:[#allocation3 + $0xe8] sm:$0xf] }
 0x462   :  { %v2279_v35 = vadd.f32 %v2271_v3, %v2227_v0  ;;  %v2280_v36 = vadd.f32 %v2272_v22, %v2240_v28  ;;  %2549 = vmatpush.bf16.msra.mxu3 %v3891_v10  ;;  %v2564_v3 = vpack.c.b16 %v2560_v15, %v2560_v15  ;;  %2601 = vmatpush.bf16.msrb.mxu1 %v4900_v23  ;;  %v4908_v0 = vsel %vm385_vm0, %v2565_v56, 0  ;;  %v4108_v10 = vld [vmem:[#allocation3 + $0xf0] sm:$0xf0] }
 0x463   :  { %2511 = vmatpush.bf16.msra.mxu0 %v3863_v26  ;;  %v4107_v45 = vor.u32 %v4380_v42, %v4106_v41  ;;  %v4111_v51 = vor.u32 %v4378_v43, %v4108_v10  ;;  %v4116_v26 = vld [vmem:[#allocation3 + $0xf8] sm:$0xf0]  ;;  %v4060_v20 = vld [vmem:[#allocation3 + $0x90] sm:$0xf0]  ;;  %v4365_v41 = vld [vmem:[#allocation3 + $0x74] sm:$0xf0] }
 0x464   :  { %v2283_v50 = vmul.f32 0.5, %v2279_v35  ;;  %v2287_v24 = vmul.f32 0.5, %v2280_v36  ;;  %v4903_v6 = vsel %vm385_vm0, %v2564_v3, 0  ;;  %v4066_v3 = vld [vmem:[#allocation3 + $0x88] sm:$0xf] }
 0x465   :  { %2614 = vmatpush.bf16.msrb.mxu2 %v4903_v6  ;;  %v4052_v10 = vld [vmem:[#allocation3 + $0x78] sm:$0xf0] }
 0x466   :  { %4441 = vtanh.f32 %v2283_v50  ;;  %v2252_v58 = vpop.f32.mrf.mxu2  ;;  %v2265_v60 = vpop.f32.mrf.mxu3  ;;  %2550 = vmatpush.bf16.msra.mxu3 %v3875_v32  ;;  %v4115_v50 = vor.u32 %v4381_v46, %v4114_v29  ;;  %v4375_v32 = vld [vmem:[#allocation3 + $0xcc] sm:$0xf] }
 0x467   :  { %4443 = vtanh.f32 %v2287_v24  ;;  %v2253_v39 = vadd.f32 %v2252_v58, %v4882_v52  ;;  %v2266_v61 = vadd.f32 %v2265_v60, %v4884_v25  ;;  %v2228_v40 = vpop.f32.mrf.mxu0  ;;  %v2241_v62 = vpop.f32.mrf.mxu1  ;;  %2588 = vmatpush.bf16.msrb.mxu0 %v4897_v21  ;;  %v4379_v24 = vld [vmem:[#allocation3 + $0xec] sm:$0xf]  ;;  %v4099_v60 = vor.u32 %v4377_v59, %v4098_v49 }
 0x468   :  { %v4119_v27 = vor.u32 %v4379_v24, %v4116_v26  ;;  %v4924_v29 = vld [vmem:[#allocation13] sm:$0xf]  ;;  %v4358_v24 = vld [vmem:[#allocation3 + $0x44] sm:$0xf] }
 0x469   :  { %v2281_v1 = vadd.f32 %v2273_v55, %v2253_v39  ;;  %v2282_v4 = vadd.f32 %v2274_v57, %v2266_v61  ;;  %v4374_v55 = vld [vmem:[#allocation3 + $0xc4] sm:$0xf]  ;;  %v4091_v57 = vor.u32 %v4376_v54, %v4090_v53  ;;  %v4100_v39 = vld [vmem:[#allocation3 + $0xd8] sm:$0xf0]  ;;  %v4034_v53 = vld [vmem:[#allocation3 + $0x48] sm:$0xf] }
 0x46a   :  { %2627 = vmatpush.bf16.msrb.mxu3 %v4908_v0  ;;  %v4095_v58 = vor.u32 %v4374_v55, %v4092_v34  ;;  %v4103_v62 = vor.u32 %v4375_v32, %v4100_v39  ;;  %v4361_v54 = vld [vmem:[#allocation3 + $0x54] sm:$0xf0]  ;;  %v2635_v34 = vperm.slane %v4924_v29, 0  ;;  %v2636_v49 = vperm.slane %v4924_v29, 1  ;;  %v4036_v32 = vld [vmem:[#allocation3 + $0x58] sm:$0xf0] }
 0x46b   :  { %4445 = vtanh.f32 %v2281_v1  ;;  %v2292_v5 = vmul.f32 0.5, %v2282_v4  ;;  %v4074_v1 = vld [vmem:[#allocation3 + $0xa0] sm:$0xf]  ;;  %v4372_v4 = vld [vmem:[#allocation3 + $0xac] sm:$0xf0] }
 0x46c   :  { %v4442_v11 = vpop.eup %4441  ;;  %v4075_v8 = vor.u32 %v4372_v4, %v4074_v1 }
 0x46d   :  { %v4444_v52 = vpop.eup %4443  ;;  %v2285_v17 = vmul.f32 0.5, %v4442_v11  ;;  %4447 = vtanh.f32 %v2292_v5  ;;  %v4370_v5 = vld [vmem:[#allocation3 + $0xa4] sm:$0xf]  ;;  %v4082_v11 = vld [vmem:[#allocation3 + $0xa8] sm:$0xf] }
 0x46e   :  { %v2289_v25 = vmul.f32 0.5, %v4444_v52  ;;  %v2254_v18 = vpop.f32.mrf.mxu2  ;;  %v2267_v19 = vpop.f32.mrf.mxu3  ;;  %v4079_v14 = vor.u32 %v4370_v5, %v4076_v9  ;;  %v4083_v15 = vor.u32 %v4373_v13, %v4082_v11  ;;  %v4084_v52 = vld [vmem:[#allocation3 + $0xb8] sm:$0xf0]  ;;  %v4356_v9 = vld [vmem:[#allocation3 + $0x2c] sm:$0xf0] }
 0x46f   :  { %v2286_v22 = vadd.f32 0.5, %v2285_v17  ;;  %v4087_v17 = vor.u32 %v4371_v16, %v4084_v52  ;;  %v4368_v18 = vld [vmem:[#allocation3 + $0x8c] sm:$0xf0]  ;;  %v4366_v19 = vld [vmem:[#allocation3 + $0x84] sm:$0xf] }
 0x470   :  { %v2290_v37 = vadd.f32 0.5, %v2289_v25  ;;  %v4058_v25 = vld [vmem:[#allocation3 + $0x80] sm:$0xf]  ;;  %v4354_v11 = vld [vmem:[#allocation3 + $0x24] sm:$0xf] }
 0x471   :  { %v4446_v7 = vpop.eup %4445  ;;  %v4059_v2 = vor.u32 %v4368_v18, %v4058_v25  ;;  %v4357_v16 = vld [vmem:[#allocation3 + $0x34] sm:$0xf0] }
 0x472   :  { %v2296_v28 = vmul.f32 %v2290_v37, %v1943_v63  ;;  %v2297_v30 = vmul.f32 %v4446_v7, %v2286_v22  ;;  %v4369_v22 = vld [vmem:[#allocation3 + $0x94] sm:$0xf0]  ;;  %v4063_v7 = vor.u32 %v4366_v19, %v4060_v20  ;;  %v4355_v19 = vld [vmem:[#allocation3 + $0x2c] sm:$0xf]  ;;  %v3994_v20 = vld [vmem:[#allocation3] sm:$0xf] }
 0x473   :  { %v4448_v44 = vpop.eup %4447  ;;  %v4067_v63 = vor.u32 %v4369_v22, %v4066_v3  ;;  %v4350_v3 = vld [vmem:[#allocation3 + $0x4] sm:$0xf]  ;;  %v3996_v22 = vld [vmem:[#allocation3 + $0x10] sm:$0xf0] }
 0x474   :  { %v2298_v31 = vadd.f32 %v2297_v30, %v2296_v28  ;;  %v2294_v47 = vmul.f32 0.5, %v4448_v44  ;;  %v4367_v28 = vld [vmem:[#allocation3 + $0x8c] sm:$0xf]  ;;  %v4068_v30 = vld [vmem:[#allocation3 + $0x98] sm:$0xf0] }
 0x476   :  { %4449 = vtanh.f32 %v2298_v31  ;;  %2302 = vst [vmem:[#allocation5] sm:$0x3] %v2298_v31  ;;  %v2295_v33 = vadd.f32 0.5, %v2294_v47  ;;  %v4071_v47 = vor.u32 %v4367_v28, %v4068_v30  ;;  %v3999_v30 = vor.u32 %v4350_v3, %v3996_v22 }
 0x47c   :  { %v4450_v48 = vpop.eup %4449 }
 0x47d   :  { %v2300_v12 = vmul.f32 %v4450_v48, %v2295_v33  ;;  %v4042_v33 = vld [vmem:[#allocation3 + $0x60] sm:$0xf]  ;;  %v4364_v48 = vld [vmem:[#allocation3 + $0x6c] sm:$0xf0] }
 0x47f   :  { %v2301_v35 = vpack.c.bf16 %v2300_v12, %v2300_v12  ;;  %v4362_v12 = vld [vmem:[#allocation3 + $0x64] sm:$0xf] }
 0x481   :  { %2305 = vst [vmem:[#allocation15 + $0x5] sm:$0x1] %v2301_v35 }
 0x482   :  { %2303 = vst [vmem:[#allocation4] sm:$0x1] %v2301_v35  ;;  %v4043_v35 = vor.u32 %v4364_v48, %v4042_v33  ;;  %v2638_v33 = vperm.slane %v4924_v29, 3 }
 0x489   :  { %v2306_v36 = vld [vmem:[#allocation4] sm:$0x1] }
 0x48a   :  { %2512 = vmatmul.bf16.vlgmr.msra.gmra.mxu0 %v2306_v36  ;;  %2525 = vmatmul.bf16.vlgmr.msra.gmra.mxu1 %v2306_v36 }
 0x48b   :  { %2538 = vmatmul.bf16.vlgmr.msra.gmra.mxu2 %v2306_v36  ;;  %2551 = vmatmul.bf16.vlgmr.msra.gmra.mxu3 %v2306_v36  ;;  %v4044_v36 = vld [vmem:[#allocation3 + $0x70] sm:$0xf0] }
 0x48c   :  { %2868 = vmatpush.bf16.msra.mxu0 %v4107_v45  ;;  %2881 = vmatpush.bf16.msra.mxu1 %v4111_v51  ;;  %v4047_v42 = vor.u32 %v4362_v12, %v4044_v36  ;;  %v4363_v45 = vld [vmem:[#allocation3 + $0x6c] sm:$0xf]  ;;  %v4026_v51 = vld [vmem:[#allocation3 + $0x40] sm:$0xf] }
 0x48d   :  { %2894 = vmatpush.bf16.msra.mxu2 %v4115_v50  ;;  %2907 = vmatpush.bf16.msra.mxu3 %v4119_v27  ;;  %v4055_v46 = vor.u32 %v4363_v45, %v4052_v10  ;;  %v4360_v50 = vld [vmem:[#allocation3 + $0x4c] sm:$0xf0]  ;;  %v4028_v27 = vld [vmem:[#allocation3 + $0x50] sm:$0xf0]  ;;  %v4351_v12 = vld [vmem:[#allocation3 + $0xc] sm:$0xf] }
 0x48e   :  { %v4027_v26 = vor.u32 %v4360_v50, %v4026_v51  ;;  %v4031_v59 = vor.u32 %v4358_v24, %v4028_v27 }
 0x490   :  { %2869 = vmatpush.bf16.msra.mxu0 %v4091_v57  ;;  %2882 = vmatpush.bf16.msra.mxu1 %v4095_v58  ;;  %v4035_v58 = vor.u32 %v4361_v54, %v4034_v53 }
 0x491   :  { %2895 = vmatpush.bf16.msra.mxu2 %v4099_v60  ;;  %2908 = vmatpush.bf16.msra.mxu3 %v4103_v62  ;;  %v4359_v60 = vld [vmem:[#allocation3 + $0x4c] sm:$0xf] }
 0x492   :  { %v4039_v1 = vor.u32 %v4359_v60, %v4036_v32 }
 0x494   :  { %2870 = vmatpush.bf16.msra.mxu0 %v4075_v8  ;;  %2883 = vmatpush.bf16.msra.mxu1 %v4079_v14  ;;  %v4010_v8 = vld [vmem:[#allocation3 + $0x20] sm:$0xf]  ;;  %v4012_v14 = vld [vmem:[#allocation3 + $0x30] sm:$0xf0] }
 0x495   :  { %2896 = vmatpush.bf16.msra.mxu2 %v4083_v15  ;;  %2909 = vmatpush.bf16.msra.mxu3 %v4087_v17  ;;  %v4011_v13 = vor.u32 %v4356_v9, %v4010_v8  ;;  %v4018_v15 = vld [vmem:[#allocation3 + $0x28] sm:$0xf]  ;;  %v4015_v25 = vor.u32 %v4354_v11, %v4012_v14  ;;  %v2997_v11 = vld [vmem:[#allocation13] sm:$0xf] }
 0x496   :  { %v4019_v18 = vor.u32 %v4357_v16, %v4018_v15  ;;  %v2999_v15 = vperm.slane %v2997_v11, 0  ;;  %v3000_v16 = vperm.slane %v2997_v11, 1  ;;  %v3002_v3 = vperm.slane %v2997_v11, 3 }
 0x498   :  { %2871 = vmatpush.bf16.msra.mxu0 %v4059_v2  ;;  %2884 = vmatpush.bf16.msra.mxu1 %v4063_v7  ;;  %v4020_v2 = vld [vmem:[#allocation3 + $0x38] sm:$0xf0] }
 0x499   :  { %2897 = vmatpush.bf16.msra.mxu2 %v4067_v63  ;;  %2910 = vmatpush.bf16.msra.mxu3 %v4071_v47  ;;  %v2637_v47 = vperm.slane %v4924_v29, 2 }
 0x49a   :  { %3988 = vmatmul.msk.bf16.vlgmr.msrb.gmra.mxu0 %vm381_vm1, %v2309_v38  ;;  %3989 = vmatmul.msk.bf16.vlgmr.msrb.gmra.mxu1 %vm381_vm1, %v2309_v38 }
 0x49b   :  { %3990 = vmatmul.msk.bf16.vlgmr.msrb.gmra.mxu2 %vm381_vm1, %v2309_v38  ;;  %3991 = vmatmul.msk.bf16.vlgmr.msrb.gmra.mxu3 %vm381_vm1, %v2309_v38  ;;  %v4050_v38 = vld [vmem:[#allocation3 + $0x68] sm:$0xf] }
 0x49c   :  { %v4051_v43 = vor.u32 %v4365_v41, %v4050_v38  ;;  %2872 = vmatpush.bf16.msra.mxu0 %v4043_v35  ;;  %2885 = vmatpush.bf16.msra.mxu1 %v4047_v42  ;;  %v4004_v35 = vld [vmem:[#allocation3 + $0x18] sm:$0xf0] }
 0x49d   :  { %2911 = vmatpush.bf16.msra.mxu3 %v4055_v46  ;;  %v4007_v41 = vor.u32 %v4351_v12, %v4004_v35 }
 0x49e   :  { %2898 = vmatpush.bf16.msra.mxu2 %v4051_v43 }
 0x4a0   :  { %2873 = vmatpush.bf16.msra.mxu0 %v4027_v26  ;;  %2886 = vmatpush.bf16.msra.mxu1 %v4031_v59 }
 0x4a1   :  { %2912 = vmatpush.bf16.msra.mxu3 %v4039_v1 }
 0x4a2   :  { %2899 = vmatpush.bf16.msra.mxu2 %v4035_v58 }
 0x4a4   :  { %2874 = vmatpush.bf16.msra.mxu0 %v4011_v13  ;;  %2887 = vmatpush.bf16.msra.mxu1 %v4015_v25 }
 0x4a6   :  { %2900 = vmatpush.bf16.msra.mxu2 %v4019_v18 }
 0x4a8   :  { %2888 = vmatpush.bf16.msra.mxu1 %v3999_v30 }
 0x4ac   :  { %2965 = vmatpush.bf16.msrb.mxu1 %v4900_v23 }
 0x507   :  { %v4916_v61 = vpop.f32.mrf.mxu0  ;;  %v4918_v40 = vpop.f32.mrf.mxu1 }
 0x50e   :  { %v4920_v56 = vpop.f32.mrf.mxu2  ;;  %v4922_v37 = vpop.f32.mrf.mxu3 }
 0x50f   :  { %v2515_v44 = vpop.f32.mrf.mxu0  ;;  %v2528_v31 = vpop.f32.mrf.mxu1 }
 0x510   :  { %v4002_v44 = vld [vmem:[#allocation3 + $0x8] sm:$0xf]  ;;  %v4353_v31 = vld [vmem:[#allocation3 + $0x14] sm:$0xf0] }
 0x511   :  { %v4003_v48 = vor.u32 %v4353_v31, %v4002_v44 }
 0x513   :  { %2901 = vmatpush.bf16.msra.mxu2 %v4003_v48 }
 0x516   :  { %v2541_v55 = vpop.f32.mrf.mxu2  ;;  %v2554_v57 = vpop.f32.mrf.mxu3 }
 0x517   :  { %v2590_v39 = vpop.f32.mrf.mxu0  ;;  %v2603_v62 = vpop.f32.mrf.mxu1  ;;  %2978 = vmatpush.bf16.msrb.mxu2 %v4903_v6  ;;  %v2307_v57 = vld [vmem:[#allocation5] sm:$0x3] }
 0x518   :  { %v2591_v4 = vadd.f32 %v2590_v39, %v4916_v61  ;;  %v2604_v5 = vadd.f32 %v2603_v62, %v4918_v40  ;;  %v4023_v61 = vor.u32 %v4355_v19, %v4020_v2  ;;  %v4352_v40 = vld [vmem:[#allocation3 + $0xc] sm:$0xf0]  ;;  %v2673_v39 = vld [vmem:[#allocation7 + $0x7] sm:$0x1] }
 0x519   :  { %v3995_v28 = vor.u32 %v4352_v40, %v3994_v20  ;;  %v3001_v40 = vperm.slane %v2997_v11, 2 }
 0x51a   :  { %v2643_v52 = vadd.f32 %v2635_v34, %v2591_v4  ;;  %v2644_v17 = vadd.f32 %v2636_v49, %v2604_v5  ;;  %2913 = vmatpush.bf16.msra.mxu3 %v4023_v61 }
 0x51b   :  { %2875 = vmatpush.bf16.msra.mxu0 %v3995_v28 }
 0x51c   :  { %v2647_v7 = vmul.f32 0.5, %v2643_v52  ;;  %v2651_v63 = vmul.f32 0.5, %v2644_v17 }
 0x51e   :  { %4451 = vtanh.f32 %v2647_v7  ;;  %v2616_v36 = vpop.f32.mrf.mxu2  ;;  %v2629_v38 = vpop.f32.mrf.mxu3  ;;  %2914 = vmatpush.bf16.msra.mxu3 %v4007_v41 }
 0x51f   :  { %4453 = vtanh.f32 %v2651_v63  ;;  %v2617_v42 = vadd.f32 %v2616_v36, %v4920_v56  ;;  %v2630_v43 = vadd.f32 %v2629_v38, %v4922_v37  ;;  %v2592_v45 = vpop.f32.mrf.mxu0  ;;  %v2605_v10 = vpop.f32.mrf.mxu1  ;;  %2952 = vmatpush.bf16.msrb.mxu0 %v4897_v21 }
 0x521   :  { %v2645_v46 = vadd.f32 %v2637_v47, %v2617_v42  ;;  %v2646_v29 = vadd.f32 %v2638_v33, %v2630_v43 }
 0x522   :  { %2991 = vmatpush.bf16.msrb.mxu3 %v4908_v0 }
 0x523   :  { %4455 = vtanh.f32 %v2645_v46  ;;  %v2656_v51 = vmul.f32 0.5, %v2646_v29 }
 0x524   :  { %v4452_v56 = vpop.eup %4451 }
 0x525   :  { %v4454_v37 = vpop.eup %4453  ;;  %v2649_v50 = vmul.f32 0.5, %v4452_v56  ;;  %4457 = vtanh.f32 %v2656_v51 }
 0x526   :  { %v2653_v24 = vmul.f32 0.5, %v4454_v37  ;;  %v2618_v26 = vpop.f32.mrf.mxu2  ;;  %v2631_v27 = vpop.f32.mrf.mxu3 }
 0x527   :  { %v2650_v53 = vadd.f32 0.5, %v2649_v50 }
 0x528   :  { %v2654_v54 = vadd.f32 0.5, %v2653_v24 }
 0x529   :  { %v4456_v55 = vpop.eup %4455 }
 0x52a   :  { %v2660_v21 = vmul.f32 %v2654_v54, %v2307_v57  ;;  %v2661_v34 = vmul.f32 %v4456_v55, %v2650_v53 }
 0x52b   :  { %v4458_v23 = vpop.eup %4457 }
 0x52c   :  { %v2662_v49 = vadd.f32 %v2661_v34, %v2660_v21  ;;  %v2658_v6 = vmul.f32 0.5, %v4458_v23 }
 0x52e   :  { %4459 = vtanh.f32 %v2662_v49  ;;  %2666 = vst [vmem:[#allocation5] sm:$0x3] %v2662_v49  ;;  %v2659_v59 = vadd.f32 0.5, %v2658_v6 }
 0x534   :  { %v4460_v0 = vpop.eup %4459 }
 0x535   :  { %v2664_v58 = vmul.f32 %v4460_v0, %v2659_v59  ;;  %v2671_v10 = vld [vmem:[#allocation5] sm:$0x3] }
 0x537   :  { %v2665_v60 = vpack.c.bf16 %v2664_v58, %v2664_v58 }
 0x539   :  { %2669 = vst [vmem:[#allocation15 + $0x6] sm:$0x1] %v2665_v60 }
 0x53a   :  { %2667 = vst [vmem:[#allocation4] sm:$0x1] %v2665_v60 }
 0x541   :  { %v2670_v32 = vld [vmem:[#allocation4] sm:$0x1] }
 0x542   :  { %2876 = vmatmul.bf16.vlgmr.msra.gmra.mxu0 %v2670_v32  ;;  %2889 = vmatmul.bf16.vlgmr.msra.gmra.mxu1 %v2670_v32 }
 0x543   :  { %2902 = vmatmul.bf16.vlgmr.msra.gmra.mxu2 %v2670_v32  ;;  %2915 = vmatmul.bf16.vlgmr.msra.gmra.mxu3 %v2670_v32 }
 0x552   :  { %4120 = vmatmul.msk.bf16.vlgmr.msrb.gmra.mxu0 %vm381_vm1, %v2673_v39  ;;  %4121 = vmatmul.msk.bf16.vlgmr.msrb.gmra.mxu1 %vm381_vm1, %v2673_v39 }
 0x553   :  { %4122 = vmatmul.msk.bf16.vlgmr.msrb.gmra.mxu2 %vm381_vm1, %v2673_v39  ;;  %4123 = vmatmul.msk.bf16.vlgmr.msrb.gmra.mxu3 %vm381_vm1, %v2673_v39 }
 0x5bf   :  { %v2877_v62 = vpop.f32.mrf.mxu0  ;;  %v2890_v1 = vpop.f32.mrf.mxu1 }
 0x5c6   :  { %v2903_v4 = vpop.f32.mrf.mxu2  ;;  %v2916_v5 = vpop.f32.mrf.mxu3 }
 0x5c7   :  { %v2879_v8 = vpop.f32.mrf.mxu0  ;;  %v2892_v9 = vpop.f32.mrf.mxu1 }
 0x5ce   :  { %v2905_v13 = vpop.f32.mrf.mxu2  ;;  %v2918_v14 = vpop.f32.mrf.mxu3 }
 0x5cf   :  { %v2954_v52 = vpop.f32.mrf.mxu0  ;;  %v2967_v17 = vpop.f32.mrf.mxu1 }
 0x5d0   :  { %v2955_v25 = vadd.f32 %v2954_v52, %v2877_v62  ;;  %v2968_v18 = vadd.f32 %v2967_v17, %v2890_v1 }
 0x5d2   :  { %v3007_v19 = vadd.f32 %v2999_v15, %v2955_v25  ;;  %v3008_v2 = vadd.f32 %v3000_v16, %v2968_v18 }
 0x5d4   :  { %v3011_v20 = vmul.f32 0.5, %v3007_v19  ;;  %v3015_v61 = vmul.f32 0.5, %v3008_v2 }
 0x5d6   :  { %4461 = vtanh.f32 %v3011_v20  ;;  %v2980_v22 = vpop.f32.mrf.mxu2  ;;  %v2993_v7 = vpop.f32.mrf.mxu3 }
 0x5d7   :  { %4463 = vtanh.f32 %v3015_v61  ;;  %v2981_v63 = vadd.f32 %v2980_v22, %v2903_v4  ;;  %v2994_v28 = vadd.f32 %v2993_v7, %v2916_v5  ;;  %v2956_v30 = vpop.f32.mrf.mxu0  ;;  %v2969_v44 = vpop.f32.mrf.mxu1 }
 0x5d9   :  { %v3009_v31 = vadd.f32 %v3001_v40, %v2981_v63  ;;  %v3010_v47 = vadd.f32 %v3002_v3, %v2994_v28 }
 0x5db   :  { %4465 = vtanh.f32 %v3009_v31  ;;  %v3020_v33 = vmul.f32 0.5, %v3010_v47 }
 0x5dc   :  { %v4462_v48 = vpop.eup %4461 }
 0x5dd   :  { %v4464_v12 = vpop.eup %4463  ;;  %v3013_v35 = vmul.f32 0.5, %v4462_v48  ;;  %4467 = vtanh.f32 %v3020_v33 }
 0x5de   :  { %v3017_v36 = vmul.f32 0.5, %v4464_v12  ;;  %v2982_v38 = vpop.f32.mrf.mxu2  ;;  %v2995_v41 = vpop.f32.mrf.mxu3 }
 0x5df   :  { %v3014_v42 = vadd.f32 0.5, %v3013_v35 }
 0x5e0   :  { %v3018_v43 = vadd.f32 0.5, %v3017_v36 }
 0x5e1   :  { %v4466_v45 = vpop.eup %4465 }
 0x5e2   :  { %v3024_v46 = vmul.f32 %v3018_v43, %v2671_v10  ;;  %v3025_v29 = vmul.f32 %v4466_v45, %v3014_v42 }
 0x5e3   :  { %v4468_v51 = vpop.eup %4467 }
 0x5e4   :  { %v3026_v56 = vadd.f32 %v3025_v29, %v3024_v46  ;;  %v3022_v37 = vmul.f32 0.5, %v4468_v51 }
 0x5e6   :  { %4469 = vtanh.f32 %v3026_v56  ;;  %3030 = vst [vmem:[#allocation5] sm:$0x3] %v3026_v56  ;;  %v3023_v50 = vadd.f32 0.5, %v3022_v37 }
 0x5ec   :  { %v4470_v24 = vpop.eup %4469 }
 0x5ed   :  { %v3028_v26 = vmul.f32 %v4470_v24, %v3023_v50 }
 0x5ef   :  { %v3029_v27 = vpack.c.bf16 %v3028_v26, %v3028_v26 }
 0x5f1   :  { %3031 = vst [vmem:[#allocation4] sm:$0x1] %v3029_v27 }
 0x5f2   :  { %3033 = vst [vmem:[#allocation15 + $0x7] sm:$0x1] %v3029_v27 }
 0x5f3   :  { %3046 = dma.vmem_to_hbm [thread:$0]  %s3039_s5, 128, %s3041_s27, [#allocation9], %s4653_s7, %s4653_s7, %s4654_s8  }
 0x5f4   :  { %4649 = dma.done.wait [#allocation9], 128  }
 0x5f5   :  { %4650 = vsyncadd [#allocation9], 4294967168 }
 0x5f6   :  { %3051 = vsyncpa [#allocation8], 1 }
 0x5f7   :  { %3052 = vsyncpa [#allocation11], 1 }
 0x5f8   :  { %3053 = vsyncpa [#allocation14], 1 }
 0x5f9   :  { %3054 = vsyncpa [#allocation9], 1 }
 0x5fa   :  { %3055 = vsyncmov [#allocation6] }
 0x5fd   :  { %s3056_s28 = vpop.sfrf %3055 }
 0x5fe   :  { %p4124_p0 = scmp.ne.s32.totalorder %s3056_s28, 0 }
 0x600   :  { %3060 = shalt.err (%p4124_p0)  }
 0x601   :  { %3062 = vsyncmov [#allocation6 + $0x1] }
 0x604   :  { %s3063_s6 = vpop.sfrf %3062 }
 0x605   :  { %p4125_p1 = scmp.ne.s32.totalorder %s3063_s6, 0 }
 0x607   :  { %3067 = shalt.err (%p4125_p1)  }

</bundles_post_ra>
